<compile_context>
chip_gen: v5e
topology: v5e:2x2
jax: 0.10.0
libtpu: 0.0.40
codegen_flags: <defaults>
</compile_context>

<pallas_src>
import math

import jax
import jax.numpy as jnp
from jax.experimental import pallas as pl
from jax.experimental.pallas import tpu as pltpu

# ----------------------- small synthetic config -----------------------
D_MODEL = 128          # lane-dense stand-in for the 512-d encoder
N_HEADS = 4
HEAD_DIM = D_MODEL // N_HEADS   # 32
FFN_DIM = 256
N_LAYERS = 2
VOCAB = 33             # len(ESM-1b alphabet)
VOCAB_PAD = 128        # lane-dense logits store; sliced back to 33 in the wrapper
FEAT_DIM = 10          # 3 backbone atoms * xyz + confidence scalar
FEAT_PAD = 16          # padded contraction dim
EMBED_SCALE = math.sqrt(D_MODEL)
NEG_INF = -1e9


# ----------------------------- kernel ---------------------------------
def _layer_norm(v, g, b, eps=1e-5):
    mu = jnp.mean(v, axis=-1, keepdims=True)
    var = jnp.mean((v - mu) ** 2, axis=-1, keepdims=True)
    return (v - mu) * jax.lax.rsqrt(var + eps) * g + b


def fused_encoder_kernel(feat_ref, keep_ref, kbias_ref, pos_ref,
                         emb_w_ref, emb_b_ref,
                         wq_ref, bq_ref, wk_ref, bk_ref, wv_ref, bv_ref,
                         wo_ref, bo_ref, ln1_g_ref, ln1_b_ref,
                         w1_ref, b1_ref, w2_ref, b2_ref,
                         ln2_g_ref, ln2_b_ref,
                         fln_g_ref, fln_b_ref, ow_ref, ob_ref,
                         feats_ref, logits_ref):
    """Whole forward for one batch element (grid step): [L, D] activations in VMEM."""
    feat = feat_ref[...]                                     # [L, FEAT_PAD] f32
    keep = keep_ref[...]                                     # [L, 1]  1.0 = valid token
    kbias = kbias_ref[...]                                   # [1, L]  0 / -1e9 per key

    # Embedding stand-in: scale the embedding, add bias + positional encoding, then
    # zero padded rows (fairseq TransformerEncoder behavior).
    x = jnp.dot(feat.astype(jnp.bfloat16), emb_w_ref[...],
                preferred_element_type=jnp.float32) * EMBED_SCALE
    x = (x + emb_b_ref[...] + pos_ref[...]) * keep           # [L, D] f32

    inv_sqrt = 1.0 / math.sqrt(HEAD_DIM)
    for l in range(N_LAYERS):                                # static unroll over layers
        # ---- self-attention block (pre-LN); per-head, zero-relayout weight windows ----
        h = _layer_norm(x, ln1_g_ref[l], ln1_b_ref[l])
        hb = h.astype(jnp.bfloat16)
        attn = jnp.zeros_like(x)                             # [L, D] f32 accumulator
        for hh in range(N_HEADS):                            # static unroll over heads
            qh = jnp.dot(hb, wq_ref[l, hh],
                         preferred_element_type=jnp.float32) + bq_ref[l, hh]   # [L, dh]
            kh = jnp.dot(hb, wk_ref[l, hh],
                         preferred_element_type=jnp.float32) + bk_ref[l, hh]
            vh = jnp.dot(hb, wv_ref[l, hh],
                         preferred_element_type=jnp.float32) + bv_ref[l, hh]
            # scores: contraction on the last dims (trans_b form, no explicit transpose)
            s = jax.lax.dot_general(
                qh.astype(jnp.bfloat16), kh.astype(jnp.bfloat16),
                dimension_numbers=(((1,), (1,)), ((), ())),
                preferred_element_type=jnp.float32) * inv_sqrt                 # [L, L]
            s = s + kbias                                    # mask padded keys
            s = s - jnp.max(s, axis=-1, keepdims=True)
            p = jnp.exp(s)
            p = p * pl.reciprocal(jnp.sum(p, axis=-1, keepdims=True), approx=True)
            o = jnp.dot(p.astype(jnp.bfloat16), vh.astype(jnp.bfloat16),
                        preferred_element_type=jnp.float32)                    # [L, dh]
            # fold this head's output straight into the output projection (no concat)
            attn = attn + jnp.dot(o.astype(jnp.bfloat16), wo_ref[l, hh],
                                  preferred_element_type=jnp.float32)          # [L, D]
        x = x + attn + bo_ref[l]

        # ---- feed-forward block (pre-LN) ----
        h = _layer_norm(x, ln2_g_ref[l], ln2_b_ref[l])
        h = jnp.dot(h.astype(jnp.bfloat16), w1_ref[l],
                    preferred_element_type=jnp.float32) + b1_ref[l]
        # TODO(synk): PyTorch/fairseq use exact erf GELU; tanh approximation used here.
        h = jax.nn.gelu(h, approximate=True)
        h = jnp.dot(h.astype(jnp.bfloat16), w2_ref[l],
                    preferred_element_type=jnp.float32) + b2_ref[l]
        x = x + h

    x = _layer_norm(x, fln_g_ref[...], fln_b_ref[...])
    feats_ref[...] = x                                       # lane-dense (128-wide) store
    logits_ref[...] = (jnp.dot(x.astype(jnp.bfloat16), ow_ref[...],
                               preferred_element_type=jnp.float32) + ob_ref[...])


# ------------------------ pallas_call wrapper --------------------------
def _fused_call(feat, keep, kbias, pos, p):
    B, L, _ = feat.shape

    def whole(a):
        nd = a.ndim
        return pl.BlockSpec(a.shape, lambda b, _nd=nd: (0,) * _nd)

    def per_batch(a):
        tail = a.shape[1:]
        return pl.BlockSpec((None,) + tail,
                            lambda b, _n=len(tail): (b,) + (0,) * _n)

    weights = (p['embed_w'], p['embed_b'],
               p['wq'], p['bq'], p['wk'], p['bk'], p['wv'], p['bv'],
               p['wo'], p['bo'], p['ln1_g'], p['ln1_b'],
               p['w1'], p['b1'], p['w2'], p['b2'],
               p['ln2_g'], p['ln2_b'],
               p['final_ln_g'], p['final_ln_b'],
               p['out_w_pad'], p['out_b_pad'])

    in_specs = ([per_batch(feat), per_batch(keep), per_batch(kbias), whole(pos)]
                + [whole(w) for w in weights])
    out_specs = [
        pl.BlockSpec((None, L, D_MODEL), lambda b: (b, 0, 0)),
        pl.BlockSpec((None, L, VOCAB_PAD), lambda b: (b, 0, 0)),
    ]

    return pl.pallas_call(
        fused_encoder_kernel,
        out_shape=(jax.ShapeDtypeStruct((B, L, D_MODEL), jnp.float32),
                   jax.ShapeDtypeStruct((B, L, VOCAB_PAD), jnp.float32)),
        grid_spec=pltpu.PrefetchScalarGridSpec(
            num_scalar_prefetch=0,
            grid=(B,),
            in_specs=in_specs,
            out_specs=out_specs),
        compiler_params=pltpu.CompilerParams(
            dimension_semantics=("parallel",)),      # megacore-splittable batch axis
    )(feat, keep, kbias, pos, *weights)


# ------------------------ params & glue (JAX) --------------------------
def init_params(key):
    keys = iter(jax.random.split(key, 64))

    def lin(kin, kout):
        s = 1.0 / math.sqrt(kin)
        w = jax.random.uniform(next(keys), (kin, kout), jnp.float32, -s, s)
        return w, jnp.zeros((1, kout), jnp.float32)

    def stacked_lin(kin, kout):
        ws, bs = [], []
        for _ in range(N_LAYERS):
            w, b = lin(kin, kout)
            ws.append(w.astype(jnp.bfloat16))
            bs.append(b)
        return jnp.stack(ws), jnp.stack(bs)

    def stacked_head_proj():          # [NL, H, D, dh] bf16, [NL, H, 1, dh] f32
        s = 1.0 / math.sqrt(D_MODEL)
        ws, bs = [], []
        for _ in range(N_LAYERS):
            w = jax.random.uniform(next(keys), (N_HEADS, D_MODEL, HEAD_DIM),
                                   jnp.float32, -s, s)
            ws.append(w.astype(jnp.bfloat16))
            bs.append(jnp.zeros((N_HEADS, 1, HEAD_DIM), jnp.float32))
        return jnp.stack(ws), jnp.stack(bs)

    def stacked_head_out():           # [NL, H, dh, D] bf16, [NL, 1, D] f32
        s = 1.0 / math.sqrt(D_MODEL)
        ws = []
        for _ in range(N_LAYERS):
            w = jax.random.uniform(next(keys), (N_HEADS, HEAD_DIM, D_MODEL),
                                   jnp.float32, -s, s)
            ws.append(w.astype(jnp.bfloat16))
        return jnp.stack(ws), jnp.zeros((N_LAYERS, 1, D_MODEL), jnp.float32)

    p = {}
    ew, eb = lin(FEAT_DIM, D_MODEL)
    p['embed_w'] = (jnp.zeros((FEAT_PAD, D_MODEL), jnp.float32)
                    .at[:FEAT_DIM].set(ew).astype(jnp.bfloat16))
    p['embed_b'] = eb
    p['wq'], p['bq'] = stacked_head_proj()
    p['wk'], p['bk'] = stacked_head_proj()
    p['wv'], p['bv'] = stacked_head_proj()
    p['wo'], p['bo'] = stacked_head_out()
    p['ln1_g'] = jnp.ones((N_LAYERS, 1, D_MODEL), jnp.float32)
    p['ln1_b'] = jnp.zeros((N_LAYERS, 1, D_MODEL), jnp.float32)
    p['w1'], p['b1'] = stacked_lin(D_MODEL, FFN_DIM)
    p['w2'], p['b2'] = stacked_lin(FFN_DIM, D_MODEL)
    p['ln2_g'] = jnp.ones((N_LAYERS, 1, D_MODEL), jnp.float32)
    p['ln2_b'] = jnp.zeros((N_LAYERS, 1, D_MODEL), jnp.float32)
    p['final_ln_g'] = jnp.ones((1, D_MODEL), jnp.float32)
    p['final_ln_b'] = jnp.zeros((1, D_MODEL), jnp.float32)
    ow, ob = lin(D_MODEL, VOCAB)
    p['out_w_pad'] = (jnp.zeros((D_MODEL, VOCAB_PAD), jnp.float32)
                      .at[:, :VOCAB].set(ow).astype(jnp.bfloat16))
    p['out_b_pad'] = jnp.zeros((1, VOCAB_PAD), jnp.float32).at[:, :VOCAB].set(ob)
    return p


def sinusoidal_pos_emb(L, D):
    # TODO(synk): fairseq interleaves sin/cos and offsets by padding_idx; [sin|cos] used.
    pos = jnp.arange(L, dtype=jnp.float32)[:, None]
    i = jnp.arange(D // 2, dtype=jnp.float32)[None, :]
    ang = pos / jnp.power(10000.0, 2.0 * i / D)
    return jnp.concatenate([jnp.sin(ang), jnp.cos(ang)], axis=-1)        # [L, D]


def gvp_transformer_encoder_forward(coords, params, output_logits=False):
    """Mirrors GVPTransformerEncoderWrapper.forward(batch, output_logits=...)."""
    B, L = coords.shape[0], coords.shape[1]
    padding_mask = jnp.isnan(coords[:, :, 0, 0])                         # [B, L] bool
    coords3 = coords[:, :, :3, :]                                        # [B, L, 3, 3]
    confidence = jnp.ones((B, L), jnp.float32)

    # TODO(synk): the pretrained GVP-GNN geometric featurizer (vector channels, k-NN
    # graph, dihedrals) from esm_if1_gvp4_t16_142M_UR50 is not reimplemented;
    # stand-in features = cleaned backbone coords + confidence, zero-padded to 16.
    raw = jnp.concatenate(
        [jnp.nan_to_num(coords3).reshape(B, L, 9), confidence[..., None]], axis=-1)
    feat = jnp.zeros((B, L, FEAT_PAD), jnp.float32).at[..., :FEAT_DIM].set(raw)

    keep = (1.0 - padding_mask.astype(jnp.float32))[..., None]           # [B, L, 1]
    kbias = jnp.where(padding_mask, NEG_INF, 0.0).astype(jnp.float32)[:, None, :]  # [B,1,L]
    pos = sinusoidal_pos_emb(L, D_MODEL)                                 # [L, D] (not tiled)

    feats, logits_pad = _fused_call(feat, keep, kbias, pos, params)

    encoder_out = {
        'encoder_out': [jnp.transpose(feats, (1, 0, 2))],                # [L, B, D]
        'encoder_padding_mask': [padding_mask],
        'feats': feats,                                                  # == transpose(0,1)
    }
    if output_logits:
        logits = logits_pad[..., :VOCAB]                                 # [B, L, 33]
        return logits, encoder_out
    return encoder_out


# ------------------------------- main ----------------------------------
if __name__ == "__main__":
    key = jax.random.PRNGKey(0)
    k_coords, k_params = jax.random.split(key)

    B, L, A = 2, 8, 4
    coords = jax.random.normal(k_coords, (B, L, A, 3), jnp.float32)
    coords = coords.at[1, 6:].set(jnp.nan)                               # padded tail (NaN)

    params = init_params(k_params)

    logits, enc = gvp_transformer_encoder_forward(coords, params, output_logits=True)
    jax.block_until_ready(logits)
    jax.block_until_ready(enc['encoder_out'][0])

    assert logits.shape == (B, L, VOCAB)
    assert enc['feats'].shape == (B, L, D_MODEL)
    assert enc['encoder_out'][0].shape == (L, B, D_MODEL)
    assert enc['encoder_padding_mask'][0].shape == (B, L)
    assert bool(jnp.all(jnp.isfinite(logits)))
    assert bool(jnp.all(jnp.isfinite(enc['feats'])))
    print("KERNEL_OK")
</pallas_src>

<mosaic_0001>
module attributes {stable_mosaic.version = 11 : i64} {
  func.func @fused_encoder_kernel(%arg0: i32, %arg1: memref<1x8x16xf32, #tpu.memory_space<vmem>>, %arg2: memref<1x8x1xf32, #tpu.memory_space<vmem>>, %arg3: memref<1x1x8xf32, #tpu.memory_space<vmem>>, %arg4: memref<8x128xf32, #tpu.memory_space<vmem>>, %arg5: memref<16x128xbf16, #tpu.memory_space<vmem>>, %arg6: memref<1x128xf32, #tpu.memory_space<vmem>>, %arg7: memref<2x4x128x32xbf16, #tpu.memory_space<vmem>>, %arg8: memref<2x4x1x32xf32, #tpu.memory_space<vmem>>, %arg9: memref<2x4x128x32xbf16, #tpu.memory_space<vmem>>, %arg10: memref<2x4x1x32xf32, #tpu.memory_space<vmem>>, %arg11: memref<2x4x128x32xbf16, #tpu.memory_space<vmem>>, %arg12: memref<2x4x1x32xf32, #tpu.memory_space<vmem>>, %arg13: memref<2x4x32x128xbf16, #tpu.memory_space<vmem>>, %arg14: memref<2x1x128xf32, #tpu.memory_space<vmem>>, %arg15: memref<2x1x128xf32, #tpu.memory_space<vmem>>, %arg16: memref<2x1x128xf32, #tpu.memory_space<vmem>>, %arg17: memref<2x128x256xbf16, #tpu.memory_space<vmem>>, %arg18: memref<2x1x256xf32, #tpu.memory_space<vmem>>, %arg19: memref<2x256x128xbf16, #tpu.memory_space<vmem>>, %arg20: memref<2x1x128xf32, #tpu.memory_space<vmem>>, %arg21: memref<2x1x128xf32, #tpu.memory_space<vmem>>, %arg22: memref<2x1x128xf32, #tpu.memory_space<vmem>>, %arg23: memref<1x128xf32, #tpu.memory_space<vmem>>, %arg24: memref<1x128xf32, #tpu.memory_space<vmem>>, %arg25: memref<128x128xbf16, #tpu.memory_space<vmem>>, %arg26: memref<1x128xf32, #tpu.memory_space<vmem>>, %arg27: memref<1x8x128xf32, #tpu.memory_space<vmem>>, %arg28: memref<1x8x128xf32, #tpu.memory_space<vmem>>) attributes {dimension_semantics = [#tpu.dimension_semantics<parallel>], iteration_bounds = array<i64: 2>, scalar_prefetch = 0 : i64, scratch_operands = 0 : i64, tpu.core_type = #tpu.core_type<tc>, window_params = [{transform_indices = @transform_0, window_bounds = array<i64: 1, 8, 16>}, {transform_indices = @transform_1, window_bounds = array<i64: 1, 8, 1>}, {transform_indices = @transform_2, window_bounds = array<i64: 1, 1, 8>}, {pipeline_mode = #tpu.pipeline_mode<synchronous>, transform_indices = @transform_3, window_bounds = array<i64: 8, 128>}, {pipeline_mode = #tpu.pipeline_mode<synchronous>, transform_indices = @transform_4, window_bounds = array<i64: 16, 128>}, {pipeline_mode = #tpu.pipeline_mode<synchronous>, transform_indices = @transform_5, window_bounds = array<i64: 1, 128>}, {pipeline_mode = #tpu.pipeline_mode<synchronous>, transform_indices = @transform_6, window_bounds = array<i64: 2, 4, 128, 32>}, {pipeline_mode = #tpu.pipeline_mode<synchronous>, transform_indices = @transform_7, window_bounds = array<i64: 2, 4, 1, 32>}, {pipeline_mode = #tpu.pipeline_mode<synchronous>, transform_indices = @transform_8, window_bounds = array<i64: 2, 4, 128, 32>}, {pipeline_mode = #tpu.pipeline_mode<synchronous>, transform_indices = @transform_9, window_bounds = array<i64: 2, 4, 1, 32>}, {pipeline_mode = #tpu.pipeline_mode<synchronous>, transform_indices = @transform_10, window_bounds = array<i64: 2, 4, 128, 32>}, {pipeline_mode = #tpu.pipeline_mode<synchronous>, transform_indices = @transform_11, window_bounds = array<i64: 2, 4, 1, 32>}, {pipeline_mode = #tpu.pipeline_mode<synchronous>, transform_indices = @transform_12, window_bounds = array<i64: 2, 4, 32, 128>}, {pipeline_mode = #tpu.pipeline_mode<synchronous>, transform_indices = @transform_13, window_bounds = array<i64: 2, 1, 128>}, {pipeline_mode = #tpu.pipeline_mode<synchronous>, transform_indices = @transform_14, window_bounds = array<i64: 2, 1, 128>}, {pipeline_mode = #tpu.pipeline_mode<synchronous>, transform_indices = @transform_15, window_bounds = array<i64: 2, 1, 128>}, {pipeline_mode = #tpu.pipeline_mode<synchronous>, transform_indices = @transform_16, window_bounds = array<i64: 2, 128, 256>}, {pipeline_mode = #tpu.pipeline_mode<synchronous>, transform_indices = @transform_17, window_bounds = array<i64: 2, 1, 256>}, {pipeline_mode = #tpu.pipeline_mode<synchronous>, transform_indices = @transform_18, window_bounds = array<i64: 2, 256, 128>}, {pipeline_mode = #tpu.pipeline_mode<synchronous>, transform_indices = @transform_19, window_bounds = array<i64: 2, 1, 128>}, {pipeline_mode = #tpu.pipeline_mode<synchronous>, transform_indices = @transform_20, window_bounds = array<i64: 2, 1, 128>}, {pipeline_mode = #tpu.pipeline_mode<synchronous>, transform_indices = @transform_21, window_bounds = array<i64: 2, 1, 128>}, {pipeline_mode = #tpu.pipeline_mode<synchronous>, transform_indices = @transform_22, window_bounds = array<i64: 1, 128>}, {pipeline_mode = #tpu.pipeline_mode<synchronous>, transform_indices = @transform_23, window_bounds = array<i64: 1, 128>}, {pipeline_mode = #tpu.pipeline_mode<synchronous>, transform_indices = @transform_24, window_bounds = array<i64: 128, 128>}, {pipeline_mode = #tpu.pipeline_mode<synchronous>, transform_indices = @transform_25, window_bounds = array<i64: 1, 128>}, {transform_indices = @transform_26, window_bounds = array<i64: 1, 8, 128>}, {transform_indices = @transform_27, window_bounds = array<i64: 1, 8, 128>}]} {
    %c0 = arith.constant 0 : index
    %c0_0 = arith.constant 0 : index
    %c0_1 = arith.constant 0 : index
    %0 = vector.load %arg1[%c0, %c0_0, %c0_1] : memref<1x8x16xf32, #tpu.memory_space<vmem>>, vector<1x8x16xf32>
    %1 = vector.shape_cast %0 : vector<1x8x16xf32> to vector<8x16xf32>
    %c0_2 = arith.constant 0 : index
    %c0_3 = arith.constant 0 : index
    %c0_4 = arith.constant 0 : index
    %2 = vector.load %arg2[%c0_2, %c0_3, %c0_4] : memref<1x8x1xf32, #tpu.memory_space<vmem>>, vector<1x8x1xf32>
    %3 = vector.shape_cast %2 : vector<1x8x1xf32> to vector<8x1xf32>
    %c0_5 = arith.constant 0 : index
    %c0_6 = arith.constant 0 : index
    %c0_7 = arith.constant 0 : index
    %4 = vector.load %arg3[%c0_5, %c0_6, %c0_7] : memref<1x1x8xf32, #tpu.memory_space<vmem>>, vector<1x1x8xf32>
    %5 = vector.shape_cast %4 : vector<1x1x8xf32> to vector<1x8xf32>
    %6 = arith.truncf %1 : vector<8x16xf32> to vector<8x16xbf16>
    %c0_8 = arith.constant 0 : index
    %c0_9 = arith.constant 0 : index
    %7 = vector.load %arg5[%c0_8, %c0_9] : memref<16x128xbf16, #tpu.memory_space<vmem>>, vector<16x128xbf16>
    %cst = arith.constant dense<0.000000e+00> : vector<8x128xf32>
    %8 = tpu.matmul %6, %7, %cst {dimension_numbers = #tpu.dot_dimension_numbers<[1], [0], [0], [1], [0, 0, 1, 1], [], []>} : vector<8x16xbf16>, vector<16x128xbf16>, vector<8x128xf32> -> vector<8x128xf32>
    %cst_10 = arith.constant 11.3137083 : f32
    %9 = vector.broadcast %cst_10 : f32 to vector<8x128xf32>
    %10 = arith.mulf %8, %9 : vector<8x128xf32>
    %c0_11 = arith.constant 0 : index
    %c0_12 = arith.constant 0 : index
    %11 = vector.load %arg6[%c0_11, %c0_12] : memref<1x128xf32, #tpu.memory_space<vmem>>, vector<1x128xf32>
    %12 = vector.broadcast %11 : vector<1x128xf32> to vector<8x128xf32>
    %13 = arith.addf %10, %12 : vector<8x128xf32>
    %c0_13 = arith.constant 0 : index
    %c0_14 = arith.constant 0 : index
    %14 = vector.load %arg4[%c0_13, %c0_14] : memref<8x128xf32, #tpu.memory_space<vmem>>, vector<8x128xf32>
    %15 = arith.addf %13, %14 : vector<8x128xf32>
    %16 = vector.broadcast %3 : vector<8x1xf32> to vector<8x128xf32>
    %17 = arith.mulf %15, %16 : vector<8x128xf32>
    %c0_15 = arith.constant 0 : index
    %c0_16 = arith.constant 0 : index
    %c0_17 = arith.constant 0 : index
    %18 = vector.load %arg15[%c0_15, %c0_16, %c0_17] : memref<2x1x128xf32, #tpu.memory_space<vmem>>, vector<1x1x128xf32>
    %19 = vector.shape_cast %18 : vector<1x1x128xf32> to vector<1x128xf32>
    %c0_18 = arith.constant 0 : index
    %c0_19 = arith.constant 0 : index
    %c0_20 = arith.constant 0 : index
    %20 = vector.load %arg16[%c0_18, %c0_19, %c0_20] : memref<2x1x128xf32, #tpu.memory_space<vmem>>, vector<1x1x128xf32>
    %21 = vector.shape_cast %20 : vector<1x1x128xf32> to vector<1x128xf32>
    %cst_21 = arith.constant dense<0.000000e+00> : vector<8xf32>
    %22 = vector.multi_reduction <add>, %17, %cst_21 [1] : vector<8x128xf32> to vector<8xf32>
    %23 = vector.shape_cast %22 : vector<8xf32> to vector<8x1xf32>
    %cst_22 = arith.constant 1.280000e+02 : f32
    %24 = vector.broadcast %cst_22 : f32 to vector<8x1xf32>
    %25 = arith.divf %23, %24 : vector<8x1xf32>
    %26 = vector.broadcast %25 : vector<8x1xf32> to vector<8x128xf32>
    %27 = arith.subf %17, %26 : vector<8x128xf32>
    %28 = arith.mulf %27, %27 : vector<8x128xf32>
    %cst_23 = arith.constant dense<0.000000e+00> : vector<8xf32>
    %29 = vector.multi_reduction <add>, %28, %cst_23 [1] : vector<8x128xf32> to vector<8xf32>
    %30 = vector.shape_cast %29 : vector<8xf32> to vector<8x1xf32>
    %cst_24 = arith.constant 1.280000e+02 : f32
    %31 = vector.broadcast %cst_24 : f32 to vector<8x1xf32>
    %32 = arith.divf %30, %31 : vector<8x1xf32>
    %33 = vector.broadcast %25 : vector<8x1xf32> to vector<8x128xf32>
    %34 = arith.subf %17, %33 : vector<8x128xf32>
    %cst_25 = arith.constant 9.99999974E-6 : f32
    %35 = vector.broadcast %cst_25 : f32 to vector<8x1xf32>
    %36 = arith.addf %32, %35 : vector<8x1xf32>
    %37 = math.rsqrt %36 : vector<8x1xf32>
    %38 = vector.broadcast %37 : vector<8x1xf32> to vector<8x128xf32>
    %39 = arith.mulf %34, %38 : vector<8x128xf32>
    %40 = vector.broadcast %19 : vector<1x128xf32> to vector<8x128xf32>
    %41 = arith.mulf %39, %40 : vector<8x128xf32>
    %42 = vector.broadcast %21 : vector<1x128xf32> to vector<8x128xf32>
    %43 = arith.addf %41, %42 : vector<8x128xf32>
    %44 = arith.truncf %43 : vector<8x128xf32> to vector<8x128xbf16>
    %cst_26 = arith.constant 0.000000e+00 : f32
    %45 = vector.broadcast %cst_26 : f32 to vector<8x128xf32>
    %c0_27 = arith.constant 0 : index
    %c0_28 = arith.constant 0 : index
    %c0_29 = arith.constant 0 : index
    %c0_30 = arith.constant 0 : index
    %46 = vector.load %arg7[%c0_27, %c0_28, %c0_29, %c0_30] : memref<2x4x128x32xbf16, #tpu.memory_space<vmem>>, vector<1x1x128x32xbf16>
    %47 = vector.shape_cast %46 : vector<1x1x128x32xbf16> to vector<128x32xbf16>
    %cst_31 = arith.constant dense<0.000000e+00> : vector<8x32xf32>
    %48 = tpu.matmul %44, %47, %cst_31 {dimension_numbers = #tpu.dot_dimension_numbers<[1], [0], [0], [1], [0, 0, 1, 1], [], []>} : vector<8x128xbf16>, vector<128x32xbf16>, vector<8x32xf32> -> vector<8x32xf32>
    %c0_32 = arith.constant 0 : index
    %c0_33 = arith.constant 0 : index
    %c0_34 = arith.constant 0 : index
    %c0_35 = arith.constant 0 : index
    %49 = vector.load %arg8[%c0_32, %c0_33, %c0_34, %c0_35] : memref<2x4x1x32xf32, #tpu.memory_space<vmem>>, vector<1x1x1x32xf32>
    %50 = vector.shape_cast %49 : vector<1x1x1x32xf32> to vector<1x32xf32>
    %51 = vector.broadcast %50 : vector<1x32xf32> to vector<8x32xf32>
    %52 = arith.addf %48, %51 : vector<8x32xf32>
    %c0_36 = arith.constant 0 : index
    %c0_37 = arith.constant 0 : index
    %c0_38 = arith.constant 0 : index
    %c0_39 = arith.constant 0 : index
    %53 = vector.load %arg9[%c0_36, %c0_37, %c0_38, %c0_39] : memref<2x4x128x32xbf16, #tpu.memory_space<vmem>>, vector<1x1x128x32xbf16>
    %54 = vector.shape_cast %53 : vector<1x1x128x32xbf16> to vector<128x32xbf16>
    %cst_40 = arith.constant dense<0.000000e+00> : vector<8x32xf32>
    %55 = tpu.matmul %44, %54, %cst_40 {dimension_numbers = #tpu.dot_dimension_numbers<[1], [0], [0], [1], [0, 0, 1, 1], [], []>} : vector<8x128xbf16>, vector<128x32xbf16>, vector<8x32xf32> -> vector<8x32xf32>
    %c0_41 = arith.constant 0 : index
    %c0_42 = arith.constant 0 : index
    %c0_43 = arith.constant 0 : index
    %c0_44 = arith.constant 0 : index
    %56 = vector.load %arg10[%c0_41, %c0_42, %c0_43, %c0_44] : memref<2x4x1x32xf32, #tpu.memory_space<vmem>>, vector<1x1x1x32xf32>
    %57 = vector.shape_cast %56 : vector<1x1x1x32xf32> to vector<1x32xf32>
    %58 = vector.broadcast %57 : vector<1x32xf32> to vector<8x32xf32>
    %59 = arith.addf %55, %58 : vector<8x32xf32>
    %c0_45 = arith.constant 0 : index
    %c0_46 = arith.constant 0 : index
    %c0_47 = arith.constant 0 : index
    %c0_48 = arith.constant 0 : index
    %60 = vector.load %arg11[%c0_45, %c0_46, %c0_47, %c0_48] : memref<2x4x128x32xbf16, #tpu.memory_space<vmem>>, vector<1x1x128x32xbf16>
    %61 = vector.shape_cast %60 : vector<1x1x128x32xbf16> to vector<128x32xbf16>
    %cst_49 = arith.constant dense<0.000000e+00> : vector<8x32xf32>
    %62 = tpu.matmul %44, %61, %cst_49 {dimension_numbers = #tpu.dot_dimension_numbers<[1], [0], [0], [1], [0, 0, 1, 1], [], []>} : vector<8x128xbf16>, vector<128x32xbf16>, vector<8x32xf32> -> vector<8x32xf32>
    %c0_50 = arith.constant 0 : index
    %c0_51 = arith.constant 0 : index
    %c0_52 = arith.constant 0 : index
    %c0_53 = arith.constant 0 : index
    %63 = vector.load %arg12[%c0_50, %c0_51, %c0_52, %c0_53] : memref<2x4x1x32xf32, #tpu.memory_space<vmem>>, vector<1x1x1x32xf32>
    %64 = vector.shape_cast %63 : vector<1x1x1x32xf32> to vector<1x32xf32>
    %65 = vector.broadcast %64 : vector<1x32xf32> to vector<8x32xf32>
    %66 = arith.addf %62, %65 : vector<8x32xf32>
    %67 = arith.truncf %52 : vector<8x32xf32> to vector<8x32xbf16>
    %68 = arith.truncf %59 : vector<8x32xf32> to vector<8x32xbf16>
    %cst_54 = arith.constant dense<0.000000e+00> : vector<8x8xf32>
    %69 = tpu.matmul %67, %68, %cst_54 {dimension_numbers = #tpu.dot_dimension_numbers<[1], [1], [0], [0], [0, 0, 1, 0], [], []>} : vector<8x32xbf16>, vector<8x32xbf16>, vector<8x8xf32> -> vector<8x8xf32>
    %cst_55 = arith.constant 0.176776692 : f32
    %70 = vector.broadcast %cst_55 : f32 to vector<8x8xf32>
    %71 = arith.mulf %69, %70 : vector<8x8xf32>
    %72 = vector.broadcast %5 : vector<1x8xf32> to vector<8x8xf32>
    %73 = arith.addf %71, %72 : vector<8x8xf32>
    %cst_56 = arith.constant dense<0xFF800000> : vector<8xf32>
    %74 = vector.multi_reduction <maximumf>, %73, %cst_56 [1] : vector<8x8xf32> to vector<8xf32>
    %75 = vector.shape_cast %74 : vector<8xf32> to vector<8x1xf32>
    %76 = vector.broadcast %75 : vector<8x1xf32> to vector<8x8xf32>
    %77 = arith.subf %73, %76 : vector<8x8xf32>
    %78 = math.exp %77 : vector<8x8xf32>
    %cst_57 = arith.constant dense<0.000000e+00> : vector<8xf32>
    %79 = vector.multi_reduction <add>, %78, %cst_57 [1] : vector<8x8xf32> to vector<8xf32>
    %80 = vector.shape_cast %79 : vector<8xf32> to vector<8x1xf32>
    %81 = tpu.reciprocal %80 {approx = true} : vector<8x1xf32> -> vector<8x1xf32>
    %82 = vector.broadcast %81 : vector<8x1xf32> to vector<8x8xf32>
    %83 = arith.mulf %78, %82 : vector<8x8xf32>
    %84 = arith.truncf %83 : vector<8x8xf32> to vector<8x8xbf16>
    %85 = arith.truncf %66 : vector<8x32xf32> to vector<8x32xbf16>
    %cst_58 = arith.constant dense<0.000000e+00> : vector<8x32xf32>
    %86 = tpu.matmul %84, %85, %cst_58 {dimension_numbers = #tpu.dot_dimension_numbers<[1], [0], [0], [1], [0, 0, 1, 1], [], []>} : vector<8x8xbf16>, vector<8x32xbf16>, vector<8x32xf32> -> vector<8x32xf32>
    %87 = arith.truncf %86 : vector<8x32xf32> to vector<8x32xbf16>
    %c0_59 = arith.constant 0 : index
    %c0_60 = arith.constant 0 : index
    %c0_61 = arith.constant 0 : index
    %c0_62 = arith.constant 0 : index
    %88 = vector.load %arg13[%c0_59, %c0_60, %c0_61, %c0_62] : memref<2x4x32x128xbf16, #tpu.memory_space<vmem>>, vector<1x1x32x128xbf16>
    %89 = vector.shape_cast %88 : vector<1x1x32x128xbf16> to vector<32x128xbf16>
    %cst_63 = arith.constant dense<0.000000e+00> : vector<8x128xf32>
    %90 = tpu.matmul %87, %89, %cst_63 {dimension_numbers = #tpu.dot_dimension_numbers<[1], [0], [0], [1], [0, 0, 1, 1], [], []>} : vector<8x32xbf16>, vector<32x128xbf16>, vector<8x128xf32> -> vector<8x128xf32>
    %91 = arith.addf %45, %90 : vector<8x128xf32>
    %c0_64 = arith.constant 0 : index
    %c1 = arith.constant 1 : index
    %c0_65 = arith.constant 0 : index
    %c0_66 = arith.constant 0 : index
    %92 = vector.load %arg7[%c0_64, %c1, %c0_65, %c0_66] : memref<2x4x128x32xbf16, #tpu.memory_space<vmem>>, vector<1x1x128x32xbf16>
    %93 = vector.shape_cast %92 : vector<1x1x128x32xbf16> to vector<128x32xbf16>
    %cst_67 = arith.constant dense<0.000000e+00> : vector<8x32xf32>
    %94 = tpu.matmul %44, %93, %cst_67 {dimension_numbers = #tpu.dot_dimension_numbers<[1], [0], [0], [1], [0, 0, 1, 1], [], []>} : vector<8x128xbf16>, vector<128x32xbf16>, vector<8x32xf32> -> vector<8x32xf32>
    %c0_68 = arith.constant 0 : index
    %c1_69 = arith.constant 1 : index
    %c0_70 = arith.constant 0 : index
    %c0_71 = arith.constant 0 : index
    %95 = vector.load %arg8[%c0_68, %c1_69, %c0_70, %c0_71] : memref<2x4x1x32xf32, #tpu.memory_space<vmem>>, vector<1x1x1x32xf32>
    %96 = vector.shape_cast %95 : vector<1x1x1x32xf32> to vector<1x32xf32>
    %97 = vector.broadcast %96 : vector<1x32xf32> to vector<8x32xf32>
    %98 = arith.addf %94, %97 : vector<8x32xf32>
    %c0_72 = arith.constant 0 : index
    %c1_73 = arith.constant 1 : index
    %c0_74 = arith.constant 0 : index
    %c0_75 = arith.constant 0 : index
    %99 = vector.load %arg9[%c0_72, %c1_73, %c0_74, %c0_75] : memref<2x4x128x32xbf16, #tpu.memory_space<vmem>>, vector<1x1x128x32xbf16>
    %100 = vector.shape_cast %99 : vector<1x1x128x32xbf16> to vector<128x32xbf16>
    %cst_76 = arith.constant dense<0.000000e+00> : vector<8x32xf32>
    %101 = tpu.matmul %44, %100, %cst_76 {dimension_numbers = #tpu.dot_dimension_numbers<[1], [0], [0], [1], [0, 0, 1, 1], [], []>} : vector<8x128xbf16>, vector<128x32xbf16>, vector<8x32xf32> -> vector<8x32xf32>
    %c0_77 = arith.constant 0 : index
    %c1_78 = arith.constant 1 : index
    %c0_79 = arith.constant 0 : index
    %c0_80 = arith.constant 0 : index
    %102 = vector.load %arg10[%c0_77, %c1_78, %c0_79, %c0_80] : memref<2x4x1x32xf32, #tpu.memory_space<vmem>>, vector<1x1x1x32xf32>
    %103 = vector.shape_cast %102 : vector<1x1x1x32xf32> to vector<1x32xf32>
    %104 = vector.broadcast %103 : vector<1x32xf32> to vector<8x32xf32>
    %105 = arith.addf %101, %104 : vector<8x32xf32>
    %c0_81 = arith.constant 0 : index
    %c1_82 = arith.constant 1 : index
    %c0_83 = arith.constant 0 : index
    %c0_84 = arith.constant 0 : index
    %106 = vector.load %arg11[%c0_81, %c1_82, %c0_83, %c0_84] : memref<2x4x128x32xbf16, #tpu.memory_space<vmem>>, vector<1x1x128x32xbf16>
    %107 = vector.shape_cast %106 : vector<1x1x128x32xbf16> to vector<128x32xbf16>
    %cst_85 = arith.constant dense<0.000000e+00> : vector<8x32xf32>
    %108 = tpu.matmul %44, %107, %cst_85 {dimension_numbers = #tpu.dot_dimension_numbers<[1], [0], [0], [1], [0, 0, 1, 1], [], []>} : vector<8x128xbf16>, vector<128x32xbf16>, vector<8x32xf32> -> vector<8x32xf32>
    %c0_86 = arith.constant 0 : index
    %c1_87 = arith.constant 1 : index
    %c0_88 = arith.constant 0 : index
    %c0_89 = arith.constant 0 : index
    %109 = vector.load %arg12[%c0_86, %c1_87, %c0_88, %c0_89] : memref<2x4x1x32xf32, #tpu.memory_space<vmem>>, vector<1x1x1x32xf32>
    %110 = vector.shape_cast %109 : vector<1x1x1x32xf32> to vector<1x32xf32>
    %111 = vector.broadcast %110 : vector<1x32xf32> to vector<8x32xf32>
    %112 = arith.addf %108, %111 : vector<8x32xf32>
    %113 = arith.truncf %98 : vector<8x32xf32> to vector<8x32xbf16>
    %114 = arith.truncf %105 : vector<8x32xf32> to vector<8x32xbf16>
    %cst_90 = arith.constant dense<0.000000e+00> : vector<8x8xf32>
    %115 = tpu.matmul %113, %114, %cst_90 {dimension_numbers = #tpu.dot_dimension_numbers<[1], [1], [0], [0], [0, 0, 1, 0], [], []>} : vector<8x32xbf16>, vector<8x32xbf16>, vector<8x8xf32> -> vector<8x8xf32>
    %cst_91 = arith.constant 0.176776692 : f32
    %116 = vector.broadcast %cst_91 : f32 to vector<8x8xf32>
    %117 = arith.mulf %115, %116 : vector<8x8xf32>
    %118 = vector.broadcast %5 : vector<1x8xf32> to vector<8x8xf32>
    %119 = arith.addf %117, %118 : vector<8x8xf32>
    %cst_92 = arith.constant dense<0xFF800000> : vector<8xf32>
    %120 = vector.multi_reduction <maximumf>, %119, %cst_92 [1] : vector<8x8xf32> to vector<8xf32>
    %121 = vector.shape_cast %120 : vector<8xf32> to vector<8x1xf32>
    %122 = vector.broadcast %121 : vector<8x1xf32> to vector<8x8xf32>
    %123 = arith.subf %119, %122 : vector<8x8xf32>
    %124 = math.exp %123 : vector<8x8xf32>
    %cst_93 = arith.constant dense<0.000000e+00> : vector<8xf32>
    %125 = vector.multi_reduction <add>, %124, %cst_93 [1] : vector<8x8xf32> to vector<8xf32>
    %126 = vector.shape_cast %125 : vector<8xf32> to vector<8x1xf32>
    %127 = tpu.reciprocal %126 {approx = true} : vector<8x1xf32> -> vector<8x1xf32>
    %128 = vector.broadcast %127 : vector<8x1xf32> to vector<8x8xf32>
    %129 = arith.mulf %124, %128 : vector<8x8xf32>
    %130 = arith.truncf %129 : vector<8x8xf32> to vector<8x8xbf16>
    %131 = arith.truncf %112 : vector<8x32xf32> to vector<8x32xbf16>
    %cst_94 = arith.constant dense<0.000000e+00> : vector<8x32xf32>
    %132 = tpu.matmul %130, %131, %cst_94 {dimension_numbers = #tpu.dot_dimension_numbers<[1], [0], [0], [1], [0, 0, 1, 1], [], []>} : vector<8x8xbf16>, vector<8x32xbf16>, vector<8x32xf32> -> vector<8x32xf32>
    %133 = arith.truncf %132 : vector<8x32xf32> to vector<8x32xbf16>
    %c0_95 = arith.constant 0 : index
    %c1_96 = arith.constant 1 : index
    %c0_97 = arith.constant 0 : index
    %c0_98 = arith.constant 0 : index
    %134 = vector.load %arg13[%c0_95, %c1_96, %c0_97, %c0_98] : memref<2x4x32x128xbf16, #tpu.memory_space<vmem>>, vector<1x1x32x128xbf16>
    %135 = vector.shape_cast %134 : vector<1x1x32x128xbf16> to vector<32x128xbf16>
    %cst_99 = arith.constant dense<0.000000e+00> : vector<8x128xf32>
    %136 = tpu.matmul %133, %135, %cst_99 {dimension_numbers = #tpu.dot_dimension_numbers<[1], [0], [0], [1], [0, 0, 1, 1], [], []>} : vector<8x32xbf16>, vector<32x128xbf16>, vector<8x128xf32> -> vector<8x128xf32>
    %137 = arith.addf %91, %136 : vector<8x128xf32>
    %c0_100 = arith.constant 0 : index
    %c2 = arith.constant 2 : index
    %c0_101 = arith.constant 0 : index
    %c0_102 = arith.constant 0 : index
    %138 = vector.load %arg7[%c0_100, %c2, %c0_101, %c0_102] : memref<2x4x128x32xbf16, #tpu.memory_space<vmem>>, vector<1x1x128x32xbf16>
    %139 = vector.shape_cast %138 : vector<1x1x128x32xbf16> to vector<128x32xbf16>
    %cst_103 = arith.constant dense<0.000000e+00> : vector<8x32xf32>
    %140 = tpu.matmul %44, %139, %cst_103 {dimension_numbers = #tpu.dot_dimension_numbers<[1], [0], [0], [1], [0, 0, 1, 1], [], []>} : vector<8x128xbf16>, vector<128x32xbf16>, vector<8x32xf32> -> vector<8x32xf32>
    %c0_104 = arith.constant 0 : index
    %c2_105 = arith.constant 2 : index
    %c0_106 = arith.constant 0 : index
    %c0_107 = arith.constant 0 : index
    %141 = vector.load %arg8[%c0_104, %c2_105, %c0_106, %c0_107] : memref<2x4x1x32xf32, #tpu.memory_space<vmem>>, vector<1x1x1x32xf32>
    %142 = vector.shape_cast %141 : vector<1x1x1x32xf32> to vector<1x32xf32>
    %143 = vector.broadcast %142 : vector<1x32xf32> to vector<8x32xf32>
    %144 = arith.addf %140, %143 : vector<8x32xf32>
    %c0_108 = arith.constant 0 : index
    %c2_109 = arith.constant 2 : index
    %c0_110 = arith.constant 0 : index
    %c0_111 = arith.constant 0 : index
    %145 = vector.load %arg9[%c0_108, %c2_109, %c0_110, %c0_111] : memref<2x4x128x32xbf16, #tpu.memory_space<vmem>>, vector<1x1x128x32xbf16>
    %146 = vector.shape_cast %145 : vector<1x1x128x32xbf16> to vector<128x32xbf16>
    %cst_112 = arith.constant dense<0.000000e+00> : vector<8x32xf32>
    %147 = tpu.matmul %44, %146, %cst_112 {dimension_numbers = #tpu.dot_dimension_numbers<[1], [0], [0], [1], [0, 0, 1, 1], [], []>} : vector<8x128xbf16>, vector<128x32xbf16>, vector<8x32xf32> -> vector<8x32xf32>
    %c0_113 = arith.constant 0 : index
    %c2_114 = arith.constant 2 : index
    %c0_115 = arith.constant 0 : index
    %c0_116 = arith.constant 0 : index
    %148 = vector.load %arg10[%c0_113, %c2_114, %c0_115, %c0_116] : memref<2x4x1x32xf32, #tpu.memory_space<vmem>>, vector<1x1x1x32xf32>
    %149 = vector.shape_cast %148 : vector<1x1x1x32xf32> to vector<1x32xf32>
    %150 = vector.broadcast %149 : vector<1x32xf32> to vector<8x32xf32>
    %151 = arith.addf %147, %150 : vector<8x32xf32>
    %c0_117 = arith.constant 0 : index
    %c2_118 = arith.constant 2 : index
    %c0_119 = arith.constant 0 : index
    %c0_120 = arith.constant 0 : index
    %152 = vector.load %arg11[%c0_117, %c2_118, %c0_119, %c0_120] : memref<2x4x128x32xbf16, #tpu.memory_space<vmem>>, vector<1x1x128x32xbf16>
    %153 = vector.shape_cast %152 : vector<1x1x128x32xbf16> to vector<128x32xbf16>
    %cst_121 = arith.constant dense<0.000000e+00> : vector<8x32xf32>
    %154 = tpu.matmul %44, %153, %cst_121 {dimension_numbers = #tpu.dot_dimension_numbers<[1], [0], [0], [1], [0, 0, 1, 1], [], []>} : vector<8x128xbf16>, vector<128x32xbf16>, vector<8x32xf32> -> vector<8x32xf32>
    %c0_122 = arith.constant 0 : index
    %c2_123 = arith.constant 2 : index
    %c0_124 = arith.constant 0 : index
    %c0_125 = arith.constant 0 : index
    %155 = vector.load %arg12[%c0_122, %c2_123, %c0_124, %c0_125] : memref<2x4x1x32xf32, #tpu.memory_space<vmem>>, vector<1x1x1x32xf32>
    %156 = vector.shape_cast %155 : vector<1x1x1x32xf32> to vector<1x32xf32>
    %157 = vector.broadcast %156 : vector<1x32xf32> to vector<8x32xf32>
    %158 = arith.addf %154, %157 : vector<8x32xf32>
    %159 = arith.truncf %144 : vector<8x32xf32> to vector<8x32xbf16>
    %160 = arith.truncf %151 : vector<8x32xf32> to vector<8x32xbf16>
    %cst_126 = arith.constant dense<0.000000e+00> : vector<8x8xf32>
    %161 = tpu.matmul %159, %160, %cst_126 {dimension_numbers = #tpu.dot_dimension_numbers<[1], [1], [0], [0], [0, 0, 1, 0], [], []>} : vector<8x32xbf16>, vector<8x32xbf16>, vector<8x8xf32> -> vector<8x8xf32>
    %cst_127 = arith.constant 0.176776692 : f32
    %162 = vector.broadcast %cst_127 : f32 to vector<8x8xf32>
    %163 = arith.mulf %161, %162 : vector<8x8xf32>
    %164 = vector.broadcast %5 : vector<1x8xf32> to vector<8x8xf32>
    %165 = arith.addf %163, %164 : vector<8x8xf32>
    %cst_128 = arith.constant dense<0xFF800000> : vector<8xf32>
    %166 = vector.multi_reduction <maximumf>, %165, %cst_128 [1] : vector<8x8xf32> to vector<8xf32>
    %167 = vector.shape_cast %166 : vector<8xf32> to vector<8x1xf32>
    %168 = vector.broadcast %167 : vector<8x1xf32> to vector<8x8xf32>
    %169 = arith.subf %165, %168 : vector<8x8xf32>
    %170 = math.exp %169 : vector<8x8xf32>
    %cst_129 = arith.constant dense<0.000000e+00> : vector<8xf32>
    %171 = vector.multi_reduction <add>, %170, %cst_129 [1] : vector<8x8xf32> to vector<8xf32>
    %172 = vector.shape_cast %171 : vector<8xf32> to vector<8x1xf32>
    %173 = tpu.reciprocal %172 {approx = true} : vector<8x1xf32> -> vector<8x1xf32>
    %174 = vector.broadcast %173 : vector<8x1xf32> to vector<8x8xf32>
    %175 = arith.mulf %170, %174 : vector<8x8xf32>
    %176 = arith.truncf %175 : vector<8x8xf32> to vector<8x8xbf16>
    %177 = arith.truncf %158 : vector<8x32xf32> to vector<8x32xbf16>
    %cst_130 = arith.constant dense<0.000000e+00> : vector<8x32xf32>
    %178 = tpu.matmul %176, %177, %cst_130 {dimension_numbers = #tpu.dot_dimension_numbers<[1], [0], [0], [1], [0, 0, 1, 1], [], []>} : vector<8x8xbf16>, vector<8x32xbf16>, vector<8x32xf32> -> vector<8x32xf32>
    %179 = arith.truncf %178 : vector<8x32xf32> to vector<8x32xbf16>
    %c0_131 = arith.constant 0 : index
    %c2_132 = arith.constant 2 : index
    %c0_133 = arith.constant 0 : index
    %c0_134 = arith.constant 0 : index
    %180 = vector.load %arg13[%c0_131, %c2_132, %c0_133, %c0_134] : memref<2x4x32x128xbf16, #tpu.memory_space<vmem>>, vector<1x1x32x128xbf16>
    %181 = vector.shape_cast %180 : vector<1x1x32x128xbf16> to vector<32x128xbf16>
    %cst_135 = arith.constant dense<0.000000e+00> : vector<8x128xf32>
    %182 = tpu.matmul %179, %181, %cst_135 {dimension_numbers = #tpu.dot_dimension_numbers<[1], [0], [0], [1], [0, 0, 1, 1], [], []>} : vector<8x32xbf16>, vector<32x128xbf16>, vector<8x128xf32> -> vector<8x128xf32>
    %183 = arith.addf %137, %182 : vector<8x128xf32>
    %c0_136 = arith.constant 0 : index
    %c3 = arith.constant 3 : index
    %c0_137 = arith.constant 0 : index
    %c0_138 = arith.constant 0 : index
    %184 = vector.load %arg7[%c0_136, %c3, %c0_137, %c0_138] : memref<2x4x128x32xbf16, #tpu.memory_space<vmem>>, vector<1x1x128x32xbf16>
    %185 = vector.shape_cast %184 : vector<1x1x128x32xbf16> to vector<128x32xbf16>
    %cst_139 = arith.constant dense<0.000000e+00> : vector<8x32xf32>
    %186 = tpu.matmul %44, %185, %cst_139 {dimension_numbers = #tpu.dot_dimension_numbers<[1], [0], [0], [1], [0, 0, 1, 1], [], []>} : vector<8x128xbf16>, vector<128x32xbf16>, vector<8x32xf32> -> vector<8x32xf32>
    %c0_140 = arith.constant 0 : index
    %c3_141 = arith.constant 3 : index
    %c0_142 = arith.constant 0 : index
    %c0_143 = arith.constant 0 : index
    %187 = vector.load %arg8[%c0_140, %c3_141, %c0_142, %c0_143] : memref<2x4x1x32xf32, #tpu.memory_space<vmem>>, vector<1x1x1x32xf32>
    %188 = vector.shape_cast %187 : vector<1x1x1x32xf32> to vector<1x32xf32>
    %189 = vector.broadcast %188 : vector<1x32xf32> to vector<8x32xf32>
    %190 = arith.addf %186, %189 : vector<8x32xf32>
    %c0_144 = arith.constant 0 : index
    %c3_145 = arith.constant 3 : index
    %c0_146 = arith.constant 0 : index
    %c0_147 = arith.constant 0 : index
    %191 = vector.load %arg9[%c0_144, %c3_145, %c0_146, %c0_147] : memref<2x4x128x32xbf16, #tpu.memory_space<vmem>>, vector<1x1x128x32xbf16>
    %192 = vector.shape_cast %191 : vector<1x1x128x32xbf16> to vector<128x32xbf16>
    %cst_148 = arith.constant dense<0.000000e+00> : vector<8x32xf32>
    %193 = tpu.matmul %44, %192, %cst_148 {dimension_numbers = #tpu.dot_dimension_numbers<[1], [0], [0], [1], [0, 0, 1, 1], [], []>} : vector<8x128xbf16>, vector<128x32xbf16>, vector<8x32xf32> -> vector<8x32xf32>
    %c0_149 = arith.constant 0 : index
    %c3_150 = arith.constant 3 : index
    %c0_151 = arith.constant 0 : index
    %c0_152 = arith.constant 0 : index
    %194 = vector.load %arg10[%c0_149, %c3_150, %c0_151, %c0_152] : memref<2x4x1x32xf32, #tpu.memory_space<vmem>>, vector<1x1x1x32xf32>
    %195 = vector.shape_cast %194 : vector<1x1x1x32xf32> to vector<1x32xf32>
    %196 = vector.broadcast %195 : vector<1x32xf32> to vector<8x32xf32>
    %197 = arith.addf %193, %196 : vector<8x32xf32>
    %c0_153 = arith.constant 0 : index
    %c3_154 = arith.constant 3 : index
    %c0_155 = arith.constant 0 : index
    %c0_156 = arith.constant 0 : index
    %198 = vector.load %arg11[%c0_153, %c3_154, %c0_155, %c0_156] : memref<2x4x128x32xbf16, #tpu.memory_space<vmem>>, vector<1x1x128x32xbf16>
    %199 = vector.shape_cast %198 : vector<1x1x128x32xbf16> to vector<128x32xbf16>
    %cst_157 = arith.constant dense<0.000000e+00> : vector<8x32xf32>
    %200 = tpu.matmul %44, %199, %cst_157 {dimension_numbers = #tpu.dot_dimension_numbers<[1], [0], [0], [1], [0, 0, 1, 1], [], []>} : vector<8x128xbf16>, vector<128x32xbf16>, vector<8x32xf32> -> vector<8x32xf32>
    %c0_158 = arith.constant 0 : index
    %c3_159 = arith.constant 3 : index
    %c0_160 = arith.constant 0 : index
    %c0_161 = arith.constant 0 : index
    %201 = vector.load %arg12[%c0_158, %c3_159, %c0_160, %c0_161] : memref<2x4x1x32xf32, #tpu.memory_space<vmem>>, vector<1x1x1x32xf32>
    %202 = vector.shape_cast %201 : vector<1x1x1x32xf32> to vector<1x32xf32>
    %203 = vector.broadcast %202 : vector<1x32xf32> to vector<8x32xf32>
    %204 = arith.addf %200, %203 : vector<8x32xf32>
    %205 = arith.truncf %190 : vector<8x32xf32> to vector<8x32xbf16>
    %206 = arith.truncf %197 : vector<8x32xf32> to vector<8x32xbf16>
    %cst_162 = arith.constant dense<0.000000e+00> : vector<8x8xf32>
    %207 = tpu.matmul %205, %206, %cst_162 {dimension_numbers = #tpu.dot_dimension_numbers<[1], [1], [0], [0], [0, 0, 1, 0], [], []>} : vector<8x32xbf16>, vector<8x32xbf16>, vector<8x8xf32> -> vector<8x8xf32>
    %cst_163 = arith.constant 0.176776692 : f32
    %208 = vector.broadcast %cst_163 : f32 to vector<8x8xf32>
    %209 = arith.mulf %207, %208 : vector<8x8xf32>
    %210 = vector.broadcast %5 : vector<1x8xf32> to vector<8x8xf32>
    %211 = arith.addf %209, %210 : vector<8x8xf32>
    %cst_164 = arith.constant dense<0xFF800000> : vector<8xf32>
    %212 = vector.multi_reduction <maximumf>, %211, %cst_164 [1] : vector<8x8xf32> to vector<8xf32>
    %213 = vector.shape_cast %212 : vector<8xf32> to vector<8x1xf32>
    %214 = vector.broadcast %213 : vector<8x1xf32> to vector<8x8xf32>
    %215 = arith.subf %211, %214 : vector<8x8xf32>
    %216 = math.exp %215 : vector<8x8xf32>
    %cst_165 = arith.constant dense<0.000000e+00> : vector<8xf32>
    %217 = vector.multi_reduction <add>, %216, %cst_165 [1] : vector<8x8xf32> to vector<8xf32>
    %218 = vector.shape_cast %217 : vector<8xf32> to vector<8x1xf32>
    %219 = tpu.reciprocal %218 {approx = true} : vector<8x1xf32> -> vector<8x1xf32>
    %220 = vector.broadcast %219 : vector<8x1xf32> to vector<8x8xf32>
    %221 = arith.mulf %216, %220 : vector<8x8xf32>
    %222 = arith.truncf %221 : vector<8x8xf32> to vector<8x8xbf16>
    %223 = arith.truncf %204 : vector<8x32xf32> to vector<8x32xbf16>
    %cst_166 = arith.constant dense<0.000000e+00> : vector<8x32xf32>
    %224 = tpu.matmul %222, %223, %cst_166 {dimension_numbers = #tpu.dot_dimension_numbers<[1], [0], [0], [1], [0, 0, 1, 1], [], []>} : vector<8x8xbf16>, vector<8x32xbf16>, vector<8x32xf32> -> vector<8x32xf32>
    %225 = arith.truncf %224 : vector<8x32xf32> to vector<8x32xbf16>
    %c0_167 = arith.constant 0 : index
    %c3_168 = arith.constant 3 : index
    %c0_169 = arith.constant 0 : index
    %c0_170 = arith.constant 0 : index
    %226 = vector.load %arg13[%c0_167, %c3_168, %c0_169, %c0_170] : memref<2x4x32x128xbf16, #tpu.memory_space<vmem>>, vector<1x1x32x128xbf16>
    %227 = vector.shape_cast %226 : vector<1x1x32x128xbf16> to vector<32x128xbf16>
    %cst_171 = arith.constant dense<0.000000e+00> : vector<8x128xf32>
    %228 = tpu.matmul %225, %227, %cst_171 {dimension_numbers = #tpu.dot_dimension_numbers<[1], [0], [0], [1], [0, 0, 1, 1], [], []>} : vector<8x32xbf16>, vector<32x128xbf16>, vector<8x128xf32> -> vector<8x128xf32>
    %229 = arith.addf %183, %228 : vector<8x128xf32>
    %230 = arith.addf %17, %229 : vector<8x128xf32>
    %c0_172 = arith.constant 0 : index
    %c0_173 = arith.constant 0 : index
    %c0_174 = arith.constant 0 : index
    %231 = vector.load %arg14[%c0_172, %c0_173, %c0_174] : memref<2x1x128xf32, #tpu.memory_space<vmem>>, vector<1x1x128xf32>
    %232 = vector.shape_cast %231 : vector<1x1x128xf32> to vector<1x128xf32>
    %233 = vector.broadcast %232 : vector<1x128xf32> to vector<8x128xf32>
    %234 = arith.addf %230, %233 : vector<8x128xf32>
    %c0_175 = arith.constant 0 : index
    %c0_176 = arith.constant 0 : index
    %c0_177 = arith.constant 0 : index
    %235 = vector.load %arg21[%c0_175, %c0_176, %c0_177] : memref<2x1x128xf32, #tpu.memory_space<vmem>>, vector<1x1x128xf32>
    %236 = vector.shape_cast %235 : vector<1x1x128xf32> to vector<1x128xf32>
    %c0_178 = arith.constant 0 : index
    %c0_179 = arith.constant 0 : index
    %c0_180 = arith.constant 0 : index
    %237 = vector.load %arg22[%c0_178, %c0_179, %c0_180] : memref<2x1x128xf32, #tpu.memory_space<vmem>>, vector<1x1x128xf32>
    %238 = vector.shape_cast %237 : vector<1x1x128xf32> to vector<1x128xf32>
    %cst_181 = arith.constant dense<0.000000e+00> : vector<8xf32>
    %239 = vector.multi_reduction <add>, %234, %cst_181 [1] : vector<8x128xf32> to vector<8xf32>
    %240 = vector.shape_cast %239 : vector<8xf32> to vector<8x1xf32>
    %cst_182 = arith.constant 1.280000e+02 : f32
    %241 = vector.broadcast %cst_182 : f32 to vector<8x1xf32>
    %242 = arith.divf %240, %241 : vector<8x1xf32>
    %243 = vector.broadcast %242 : vector<8x1xf32> to vector<8x128xf32>
    %244 = arith.subf %234, %243 : vector<8x128xf32>
    %245 = arith.mulf %244, %244 : vector<8x128xf32>
    %cst_183 = arith.constant dense<0.000000e+00> : vector<8xf32>
    %246 = vector.multi_reduction <add>, %245, %cst_183 [1] : vector<8x128xf32> to vector<8xf32>
    %247 = vector.shape_cast %246 : vector<8xf32> to vector<8x1xf32>
    %cst_184 = arith.constant 1.280000e+02 : f32
    %248 = vector.broadcast %cst_184 : f32 to vector<8x1xf32>
    %249 = arith.divf %247, %248 : vector<8x1xf32>
    %250 = vector.broadcast %242 : vector<8x1xf32> to vector<8x128xf32>
    %251 = arith.subf %234, %250 : vector<8x128xf32>
    %cst_185 = arith.constant 9.99999974E-6 : f32
    %252 = vector.broadcast %cst_185 : f32 to vector<8x1xf32>
    %253 = arith.addf %249, %252 : vector<8x1xf32>
    %254 = math.rsqrt %253 : vector<8x1xf32>
    %255 = vector.broadcast %254 : vector<8x1xf32> to vector<8x128xf32>
    %256 = arith.mulf %251, %255 : vector<8x128xf32>
    %257 = vector.broadcast %236 : vector<1x128xf32> to vector<8x128xf32>
    %258 = arith.mulf %256, %257 : vector<8x128xf32>
    %259 = vector.broadcast %238 : vector<1x128xf32> to vector<8x128xf32>
    %260 = arith.addf %258, %259 : vector<8x128xf32>
    %261 = arith.truncf %260 : vector<8x128xf32> to vector<8x128xbf16>
    %c0_186 = arith.constant 0 : index
    %c0_187 = arith.constant 0 : index
    %c0_188 = arith.constant 0 : index
    %262 = vector.load %arg17[%c0_186, %c0_187, %c0_188] : memref<2x128x256xbf16, #tpu.memory_space<vmem>>, vector<1x128x256xbf16>
    %263 = vector.shape_cast %262 : vector<1x128x256xbf16> to vector<128x256xbf16>
    %cst_189 = arith.constant dense<0.000000e+00> : vector<8x256xf32>
    %264 = tpu.matmul %261, %263, %cst_189 {dimension_numbers = #tpu.dot_dimension_numbers<[1], [0], [0], [1], [0, 0, 1, 1], [], []>} : vector<8x128xbf16>, vector<128x256xbf16>, vector<8x256xf32> -> vector<8x256xf32>
    %c0_190 = arith.constant 0 : index
    %c0_191 = arith.constant 0 : index
    %c0_192 = arith.constant 0 : index
    %265 = vector.load %arg18[%c0_190, %c0_191, %c0_192] : memref<2x1x256xf32, #tpu.memory_space<vmem>>, vector<1x1x256xf32>
    %266 = vector.shape_cast %265 : vector<1x1x256xf32> to vector<1x256xf32>
    %267 = vector.broadcast %266 : vector<1x256xf32> to vector<8x256xf32>
    %268 = arith.addf %264, %267 : vector<8x256xf32>
    %269 = arith.mulf %268, %268 : vector<8x256xf32>
    %270 = arith.mulf %268, %269 : vector<8x256xf32>
    %cst_193 = arith.constant 4.471500e-02 : f32
    %271 = vector.broadcast %cst_193 : f32 to vector<8x256xf32>
    %272 = arith.mulf %271, %270 : vector<8x256xf32>
    %273 = arith.addf %268, %272 : vector<8x256xf32>
    %cst_194 = arith.constant 0.797884583 : f32
    %274 = vector.broadcast %cst_194 : f32 to vector<8x256xf32>
    %275 = arith.mulf %274, %273 : vector<8x256xf32>
    %276 = math.tanh %275 : vector<8x256xf32>
    %cst_195 = arith.constant 1.000000e+00 : f32
    %277 = vector.broadcast %cst_195 : f32 to vector<8x256xf32>
    %278 = arith.addf %277, %276 : vector<8x256xf32>
    %cst_196 = arith.constant 5.000000e-01 : f32
    %279 = vector.broadcast %cst_196 : f32 to vector<8x256xf32>
    %280 = arith.mulf %279, %278 : vector<8x256xf32>
    %281 = arith.mulf %268, %280 : vector<8x256xf32>
    %282 = arith.truncf %281 : vector<8x256xf32> to vector<8x256xbf16>
    %c0_197 = arith.constant 0 : index
    %c0_198 = arith.constant 0 : index
    %c0_199 = arith.constant 0 : index
    %283 = vector.load %arg19[%c0_197, %c0_198, %c0_199] : memref<2x256x128xbf16, #tpu.memory_space<vmem>>, vector<1x256x128xbf16>
    %284 = vector.shape_cast %283 : vector<1x256x128xbf16> to vector<256x128xbf16>
    %cst_200 = arith.constant dense<0.000000e+00> : vector<8x128xf32>
    %285 = tpu.matmul %282, %284, %cst_200 {dimension_numbers = #tpu.dot_dimension_numbers<[1], [0], [0], [1], [0, 0, 1, 1], [], []>} : vector<8x256xbf16>, vector<256x128xbf16>, vector<8x128xf32> -> vector<8x128xf32>
    %c0_201 = arith.constant 0 : index
    %c0_202 = arith.constant 0 : index
    %c0_203 = arith.constant 0 : index
    %286 = vector.load %arg20[%c0_201, %c0_202, %c0_203] : memref<2x1x128xf32, #tpu.memory_space<vmem>>, vector<1x1x128xf32>
    %287 = vector.shape_cast %286 : vector<1x1x128xf32> to vector<1x128xf32>
    %288 = vector.broadcast %287 : vector<1x128xf32> to vector<8x128xf32>
    %289 = arith.addf %285, %288 : vector<8x128xf32>
    %290 = arith.addf %234, %289 : vector<8x128xf32>
    %c1_204 = arith.constant 1 : index
    %c0_205 = arith.constant 0 : index
    %c0_206 = arith.constant 0 : index
    %291 = vector.load %arg15[%c1_204, %c0_205, %c0_206] : memref<2x1x128xf32, #tpu.memory_space<vmem>>, vector<1x1x128xf32>
    %292 = vector.shape_cast %291 : vector<1x1x128xf32> to vector<1x128xf32>
    %c1_207 = arith.constant 1 : index
    %c0_208 = arith.constant 0 : index
    %c0_209 = arith.constant 0 : index
    %293 = vector.load %arg16[%c1_207, %c0_208, %c0_209] : memref<2x1x128xf32, #tpu.memory_space<vmem>>, vector<1x1x128xf32>
    %294 = vector.shape_cast %293 : vector<1x1x128xf32> to vector<1x128xf32>
    %cst_210 = arith.constant dense<0.000000e+00> : vector<8xf32>
    %295 = vector.multi_reduction <add>, %290, %cst_210 [1] : vector<8x128xf32> to vector<8xf32>
    %296 = vector.shape_cast %295 : vector<8xf32> to vector<8x1xf32>
    %cst_211 = arith.constant 1.280000e+02 : f32
    %297 = vector.broadcast %cst_211 : f32 to vector<8x1xf32>
    %298 = arith.divf %296, %297 : vector<8x1xf32>
    %299 = vector.broadcast %298 : vector<8x1xf32> to vector<8x128xf32>
    %300 = arith.subf %290, %299 : vector<8x128xf32>
    %301 = arith.mulf %300, %300 : vector<8x128xf32>
    %cst_212 = arith.constant dense<0.000000e+00> : vector<8xf32>
    %302 = vector.multi_reduction <add>, %301, %cst_212 [1] : vector<8x128xf32> to vector<8xf32>
    %303 = vector.shape_cast %302 : vector<8xf32> to vector<8x1xf32>
    %cst_213 = arith.constant 1.280000e+02 : f32
    %304 = vector.broadcast %cst_213 : f32 to vector<8x1xf32>
    %305 = arith.divf %303, %304 : vector<8x1xf32>
    %306 = vector.broadcast %298 : vector<8x1xf32> to vector<8x128xf32>
    %307 = arith.subf %290, %306 : vector<8x128xf32>
    %cst_214 = arith.constant 9.99999974E-6 : f32
    %308 = vector.broadcast %cst_214 : f32 to vector<8x1xf32>
    %309 = arith.addf %305, %308 : vector<8x1xf32>
    %310 = math.rsqrt %309 : vector<8x1xf32>
    %311 = vector.broadcast %310 : vector<8x1xf32> to vector<8x128xf32>
    %312 = arith.mulf %307, %311 : vector<8x128xf32>
    %313 = vector.broadcast %292 : vector<1x128xf32> to vector<8x128xf32>
    %314 = arith.mulf %312, %313 : vector<8x128xf32>
    %315 = vector.broadcast %294 : vector<1x128xf32> to vector<8x128xf32>
    %316 = arith.addf %314, %315 : vector<8x128xf32>
    %317 = arith.truncf %316 : vector<8x128xf32> to vector<8x128xbf16>
    %cst_215 = arith.constant 0.000000e+00 : f32
    %318 = vector.broadcast %cst_215 : f32 to vector<8x128xf32>
    %c1_216 = arith.constant 1 : index
    %c0_217 = arith.constant 0 : index
    %c0_218 = arith.constant 0 : index
    %c0_219 = arith.constant 0 : index
    %319 = vector.load %arg7[%c1_216, %c0_217, %c0_218, %c0_219] : memref<2x4x128x32xbf16, #tpu.memory_space<vmem>>, vector<1x1x128x32xbf16>
    %320 = vector.shape_cast %319 : vector<1x1x128x32xbf16> to vector<128x32xbf16>
    %cst_220 = arith.constant dense<0.000000e+00> : vector<8x32xf32>
    %321 = tpu.matmul %317, %320, %cst_220 {dimension_numbers = #tpu.dot_dimension_numbers<[1], [0], [0], [1], [0, 0, 1, 1], [], []>} : vector<8x128xbf16>, vector<128x32xbf16>, vector<8x32xf32> -> vector<8x32xf32>
    %c1_221 = arith.constant 1 : index
    %c0_222 = arith.constant 0 : index
    %c0_223 = arith.constant 0 : index
    %c0_224 = arith.constant 0 : index
    %322 = vector.load %arg8[%c1_221, %c0_222, %c0_223, %c0_224] : memref<2x4x1x32xf32, #tpu.memory_space<vmem>>, vector<1x1x1x32xf32>
    %323 = vector.shape_cast %322 : vector<1x1x1x32xf32> to vector<1x32xf32>
    %324 = vector.broadcast %323 : vector<1x32xf32> to vector<8x32xf32>
    %325 = arith.addf %321, %324 : vector<8x32xf32>
    %c1_225 = arith.constant 1 : index
    %c0_226 = arith.constant 0 : index
    %c0_227 = arith.constant 0 : index
    %c0_228 = arith.constant 0 : index
    %326 = vector.load %arg9[%c1_225, %c0_226, %c0_227, %c0_228] : memref<2x4x128x32xbf16, #tpu.memory_space<vmem>>, vector<1x1x128x32xbf16>
    %327 = vector.shape_cast %326 : vector<1x1x128x32xbf16> to vector<128x32xbf16>
    %cst_229 = arith.constant dense<0.000000e+00> : vector<8x32xf32>
    %328 = tpu.matmul %317, %327, %cst_229 {dimension_numbers = #tpu.dot_dimension_numbers<[1], [0], [0], [1], [0, 0, 1, 1], [], []>} : vector<8x128xbf16>, vector<128x32xbf16>, vector<8x32xf32> -> vector<8x32xf32>
    %c1_230 = arith.constant 1 : index
    %c0_231 = arith.constant 0 : index
    %c0_232 = arith.constant 0 : index
    %c0_233 = arith.constant 0 : index
    %329 = vector.load %arg10[%c1_230, %c0_231, %c0_232, %c0_233] : memref<2x4x1x32xf32, #tpu.memory_space<vmem>>, vector<1x1x1x32xf32>
    %330 = vector.shape_cast %329 : vector<1x1x1x32xf32> to vector<1x32xf32>
    %331 = vector.broadcast %330 : vector<1x32xf32> to vector<8x32xf32>
    %332 = arith.addf %328, %331 : vector<8x32xf32>
    %c1_234 = arith.constant 1 : index
    %c0_235 = arith.constant 0 : index
    %c0_236 = arith.constant 0 : index
    %c0_237 = arith.constant 0 : index
    %333 = vector.load %arg11[%c1_234, %c0_235, %c0_236, %c0_237] : memref<2x4x128x32xbf16, #tpu.memory_space<vmem>>, vector<1x1x128x32xbf16>
    %334 = vector.shape_cast %333 : vector<1x1x128x32xbf16> to vector<128x32xbf16>
    %cst_238 = arith.constant dense<0.000000e+00> : vector<8x32xf32>
    %335 = tpu.matmul %317, %334, %cst_238 {dimension_numbers = #tpu.dot_dimension_numbers<[1], [0], [0], [1], [0, 0, 1, 1], [], []>} : vector<8x128xbf16>, vector<128x32xbf16>, vector<8x32xf32> -> vector<8x32xf32>
    %c1_239 = arith.constant 1 : index
    %c0_240 = arith.constant 0 : index
    %c0_241 = arith.constant 0 : index
    %c0_242 = arith.constant 0 : index
    %336 = vector.load %arg12[%c1_239, %c0_240, %c0_241, %c0_242] : memref<2x4x1x32xf32, #tpu.memory_space<vmem>>, vector<1x1x1x32xf32>
    %337 = vector.shape_cast %336 : vector<1x1x1x32xf32> to vector<1x32xf32>
    %338 = vector.broadcast %337 : vector<1x32xf32> to vector<8x32xf32>
    %339 = arith.addf %335, %338 : vector<8x32xf32>
    %340 = arith.truncf %325 : vector<8x32xf32> to vector<8x32xbf16>
    %341 = arith.truncf %332 : vector<8x32xf32> to vector<8x32xbf16>
    %cst_243 = arith.constant dense<0.000000e+00> : vector<8x8xf32>
    %342 = tpu.matmul %340, %341, %cst_243 {dimension_numbers = #tpu.dot_dimension_numbers<[1], [1], [0], [0], [0, 0, 1, 0], [], []>} : vector<8x32xbf16>, vector<8x32xbf16>, vector<8x8xf32> -> vector<8x8xf32>
    %cst_244 = arith.constant 0.176776692 : f32
    %343 = vector.broadcast %cst_244 : f32 to vector<8x8xf32>
    %344 = arith.mulf %342, %343 : vector<8x8xf32>
    %345 = vector.broadcast %5 : vector<1x8xf32> to vector<8x8xf32>
    %346 = arith.addf %344, %345 : vector<8x8xf32>
    %cst_245 = arith.constant dense<0xFF800000> : vector<8xf32>
    %347 = vector.multi_reduction <maximumf>, %346, %cst_245 [1] : vector<8x8xf32> to vector<8xf32>
    %348 = vector.shape_cast %347 : vector<8xf32> to vector<8x1xf32>
    %349 = vector.broadcast %348 : vector<8x1xf32> to vector<8x8xf32>
    %350 = arith.subf %346, %349 : vector<8x8xf32>
    %351 = math.exp %350 : vector<8x8xf32>
    %cst_246 = arith.constant dense<0.000000e+00> : vector<8xf32>
    %352 = vector.multi_reduction <add>, %351, %cst_246 [1] : vector<8x8xf32> to vector<8xf32>
    %353 = vector.shape_cast %352 : vector<8xf32> to vector<8x1xf32>
    %354 = tpu.reciprocal %353 {approx = true} : vector<8x1xf32> -> vector<8x1xf32>
    %355 = vector.broadcast %354 : vector<8x1xf32> to vector<8x8xf32>
    %356 = arith.mulf %351, %355 : vector<8x8xf32>
    %357 = arith.truncf %356 : vector<8x8xf32> to vector<8x8xbf16>
    %358 = arith.truncf %339 : vector<8x32xf32> to vector<8x32xbf16>
    %cst_247 = arith.constant dense<0.000000e+00> : vector<8x32xf32>
    %359 = tpu.matmul %357, %358, %cst_247 {dimension_numbers = #tpu.dot_dimension_numbers<[1], [0], [0], [1], [0, 0, 1, 1], [], []>} : vector<8x8xbf16>, vector<8x32xbf16>, vector<8x32xf32> -> vector<8x32xf32>
    %360 = arith.truncf %359 : vector<8x32xf32> to vector<8x32xbf16>
    %c1_248 = arith.constant 1 : index
    %c0_249 = arith.constant 0 : index
    %c0_250 = arith.constant 0 : index
    %c0_251 = arith.constant 0 : index
    %361 = vector.load %arg13[%c1_248, %c0_249, %c0_250, %c0_251] : memref<2x4x32x128xbf16, #tpu.memory_space<vmem>>, vector<1x1x32x128xbf16>
    %362 = vector.shape_cast %361 : vector<1x1x32x128xbf16> to vector<32x128xbf16>
    %cst_252 = arith.constant dense<0.000000e+00> : vector<8x128xf32>
    %363 = tpu.matmul %360, %362, %cst_252 {dimension_numbers = #tpu.dot_dimension_numbers<[1], [0], [0], [1], [0, 0, 1, 1], [], []>} : vector<8x32xbf16>, vector<32x128xbf16>, vector<8x128xf32> -> vector<8x128xf32>
    %364 = arith.addf %318, %363 : vector<8x128xf32>
    %c1_253 = arith.constant 1 : index
    %c1_254 = arith.constant 1 : index
    %c0_255 = arith.constant 0 : index
    %c0_256 = arith.constant 0 : index
    %365 = vector.load %arg7[%c1_253, %c1_254, %c0_255, %c0_256] : memref<2x4x128x32xbf16, #tpu.memory_space<vmem>>, vector<1x1x128x32xbf16>
    %366 = vector.shape_cast %365 : vector<1x1x128x32xbf16> to vector<128x32xbf16>
    %cst_257 = arith.constant dense<0.000000e+00> : vector<8x32xf32>
    %367 = tpu.matmul %317, %366, %cst_257 {dimension_numbers = #tpu.dot_dimension_numbers<[1], [0], [0], [1], [0, 0, 1, 1], [], []>} : vector<8x128xbf16>, vector<128x32xbf16>, vector<8x32xf32> -> vector<8x32xf32>
    %c1_258 = arith.constant 1 : index
    %c1_259 = arith.constant 1 : index
    %c0_260 = arith.constant 0 : index
    %c0_261 = arith.constant 0 : index
    %368 = vector.load %arg8[%c1_258, %c1_259, %c0_260, %c0_261] : memref<2x4x1x32xf32, #tpu.memory_space<vmem>>, vector<1x1x1x32xf32>
    %369 = vector.shape_cast %368 : vector<1x1x1x32xf32> to vector<1x32xf32>
    %370 = vector.broadcast %369 : vector<1x32xf32> to vector<8x32xf32>
    %371 = arith.addf %367, %370 : vector<8x32xf32>
    %c1_262 = arith.constant 1 : index
    %c1_263 = arith.constant 1 : index
    %c0_264 = arith.constant 0 : index
    %c0_265 = arith.constant 0 : index
    %372 = vector.load %arg9[%c1_262, %c1_263, %c0_264, %c0_265] : memref<2x4x128x32xbf16, #tpu.memory_space<vmem>>, vector<1x1x128x32xbf16>
    %373 = vector.shape_cast %372 : vector<1x1x128x32xbf16> to vector<128x32xbf16>
    %cst_266 = arith.constant dense<0.000000e+00> : vector<8x32xf32>
    %374 = tpu.matmul %317, %373, %cst_266 {dimension_numbers = #tpu.dot_dimension_numbers<[1], [0], [0], [1], [0, 0, 1, 1], [], []>} : vector<8x128xbf16>, vector<128x32xbf16>, vector<8x32xf32> -> vector<8x32xf32>
    %c1_267 = arith.constant 1 : index
    %c1_268 = arith.constant 1 : index
    %c0_269 = arith.constant 0 : index
    %c0_270 = arith.constant 0 : index
    %375 = vector.load %arg10[%c1_267, %c1_268, %c0_269, %c0_270] : memref<2x4x1x32xf32, #tpu.memory_space<vmem>>, vector<1x1x1x32xf32>
    %376 = vector.shape_cast %375 : vector<1x1x1x32xf32> to vector<1x32xf32>
    %377 = vector.broadcast %376 : vector<1x32xf32> to vector<8x32xf32>
    %378 = arith.addf %374, %377 : vector<8x32xf32>
    %c1_271 = arith.constant 1 : index
    %c1_272 = arith.constant 1 : index
    %c0_273 = arith.constant 0 : index
    %c0_274 = arith.constant 0 : index
    %379 = vector.load %arg11[%c1_271, %c1_272, %c0_273, %c0_274] : memref<2x4x128x32xbf16, #tpu.memory_space<vmem>>, vector<1x1x128x32xbf16>
    %380 = vector.shape_cast %379 : vector<1x1x128x32xbf16> to vector<128x32xbf16>
    %cst_275 = arith.constant dense<0.000000e+00> : vector<8x32xf32>
    %381 = tpu.matmul %317, %380, %cst_275 {dimension_numbers = #tpu.dot_dimension_numbers<[1], [0], [0], [1], [0, 0, 1, 1], [], []>} : vector<8x128xbf16>, vector<128x32xbf16>, vector<8x32xf32> -> vector<8x32xf32>
    %c1_276 = arith.constant 1 : index
    %c1_277 = arith.constant 1 : index
    %c0_278 = arith.constant 0 : index
    %c0_279 = arith.constant 0 : index
    %382 = vector.load %arg12[%c1_276, %c1_277, %c0_278, %c0_279] : memref<2x4x1x32xf32, #tpu.memory_space<vmem>>, vector<1x1x1x32xf32>
    %383 = vector.shape_cast %382 : vector<1x1x1x32xf32> to vector<1x32xf32>
    %384 = vector.broadcast %383 : vector<1x32xf32> to vector<8x32xf32>
    %385 = arith.addf %381, %384 : vector<8x32xf32>
    %386 = arith.truncf %371 : vector<8x32xf32> to vector<8x32xbf16>
    %387 = arith.truncf %378 : vector<8x32xf32> to vector<8x32xbf16>
    %cst_280 = arith.constant dense<0.000000e+00> : vector<8x8xf32>
    %388 = tpu.matmul %386, %387, %cst_280 {dimension_numbers = #tpu.dot_dimension_numbers<[1], [1], [0], [0], [0, 0, 1, 0], [], []>} : vector<8x32xbf16>, vector<8x32xbf16>, vector<8x8xf32> -> vector<8x8xf32>
    %cst_281 = arith.constant 0.176776692 : f32
    %389 = vector.broadcast %cst_281 : f32 to vector<8x8xf32>
    %390 = arith.mulf %388, %389 : vector<8x8xf32>
    %391 = vector.broadcast %5 : vector<1x8xf32> to vector<8x8xf32>
    %392 = arith.addf %390, %391 : vector<8x8xf32>
    %cst_282 = arith.constant dense<0xFF800000> : vector<8xf32>
    %393 = vector.multi_reduction <maximumf>, %392, %cst_282 [1] : vector<8x8xf32> to vector<8xf32>
    %394 = vector.shape_cast %393 : vector<8xf32> to vector<8x1xf32>
    %395 = vector.broadcast %394 : vector<8x1xf32> to vector<8x8xf32>
    %396 = arith.subf %392, %395 : vector<8x8xf32>
    %397 = math.exp %396 : vector<8x8xf32>
    %cst_283 = arith.constant dense<0.000000e+00> : vector<8xf32>
    %398 = vector.multi_reduction <add>, %397, %cst_283 [1] : vector<8x8xf32> to vector<8xf32>
    %399 = vector.shape_cast %398 : vector<8xf32> to vector<8x1xf32>
    %400 = tpu.reciprocal %399 {approx = true} : vector<8x1xf32> -> vector<8x1xf32>
    %401 = vector.broadcast %400 : vector<8x1xf32> to vector<8x8xf32>
    %402 = arith.mulf %397, %401 : vector<8x8xf32>
    %403 = arith.truncf %402 : vector<8x8xf32> to vector<8x8xbf16>
    %404 = arith.truncf %385 : vector<8x32xf32> to vector<8x32xbf16>
    %cst_284 = arith.constant dense<0.000000e+00> : vector<8x32xf32>
    %405 = tpu.matmul %403, %404, %cst_284 {dimension_numbers = #tpu.dot_dimension_numbers<[1], [0], [0], [1], [0, 0, 1, 1], [], []>} : vector<8x8xbf16>, vector<8x32xbf16>, vector<8x32xf32> -> vector<8x32xf32>
    %406 = arith.truncf %405 : vector<8x32xf32> to vector<8x32xbf16>
    %c1_285 = arith.constant 1 : index
    %c1_286 = arith.constant 1 : index
    %c0_287 = arith.constant 0 : index
    %c0_288 = arith.constant 0 : index
    %407 = vector.load %arg13[%c1_285, %c1_286, %c0_287, %c0_288] : memref<2x4x32x128xbf16, #tpu.memory_space<vmem>>, vector<1x1x32x128xbf16>
    %408 = vector.shape_cast %407 : vector<1x1x32x128xbf16> to vector<32x128xbf16>
    %cst_289 = arith.constant dense<0.000000e+00> : vector<8x128xf32>
    %409 = tpu.matmul %406, %408, %cst_289 {dimension_numbers = #tpu.dot_dimension_numbers<[1], [0], [0], [1], [0, 0, 1, 1], [], []>} : vector<8x32xbf16>, vector<32x128xbf16>, vector<8x128xf32> -> vector<8x128xf32>
    %410 = arith.addf %364, %409 : vector<8x128xf32>
    %c1_290 = arith.constant 1 : index
    %c2_291 = arith.constant 2 : index
    %c0_292 = arith.constant 0 : index
    %c0_293 = arith.constant 0 : index
    %411 = vector.load %arg7[%c1_290, %c2_291, %c0_292, %c0_293] : memref<2x4x128x32xbf16, #tpu.memory_space<vmem>>, vector<1x1x128x32xbf16>
    %412 = vector.shape_cast %411 : vector<1x1x128x32xbf16> to vector<128x32xbf16>
    %cst_294 = arith.constant dense<0.000000e+00> : vector<8x32xf32>
    %413 = tpu.matmul %317, %412, %cst_294 {dimension_numbers = #tpu.dot_dimension_numbers<[1], [0], [0], [1], [0, 0, 1, 1], [], []>} : vector<8x128xbf16>, vector<128x32xbf16>, vector<8x32xf32> -> vector<8x32xf32>
    %c1_295 = arith.constant 1 : index
    %c2_296 = arith.constant 2 : index
    %c0_297 = arith.constant 0 : index
    %c0_298 = arith.constant 0 : index
    %414 = vector.load %arg8[%c1_295, %c2_296, %c0_297, %c0_298] : memref<2x4x1x32xf32, #tpu.memory_space<vmem>>, vector<1x1x1x32xf32>
    %415 = vector.shape_cast %414 : vector<1x1x1x32xf32> to vector<1x32xf32>
    %416 = vector.broadcast %415 : vector<1x32xf32> to vector<8x32xf32>
    %417 = arith.addf %413, %416 : vector<8x32xf32>
    %c1_299 = arith.constant 1 : index
    %c2_300 = arith.constant 2 : index
    %c0_301 = arith.constant 0 : index
    %c0_302 = arith.constant 0 : index
    %418 = vector.load %arg9[%c1_299, %c2_300, %c0_301, %c0_302] : memref<2x4x128x32xbf16, #tpu.memory_space<vmem>>, vector<1x1x128x32xbf16>
    %419 = vector.shape_cast %418 : vector<1x1x128x32xbf16> to vector<128x32xbf16>
    %cst_303 = arith.constant dense<0.000000e+00> : vector<8x32xf32>
    %420 = tpu.matmul %317, %419, %cst_303 {dimension_numbers = #tpu.dot_dimension_numbers<[1], [0], [0], [1], [0, 0, 1, 1], [], []>} : vector<8x128xbf16>, vector<128x32xbf16>, vector<8x32xf32> -> vector<8x32xf32>
    %c1_304 = arith.constant 1 : index
    %c2_305 = arith.constant 2 : index
    %c0_306 = arith.constant 0 : index
    %c0_307 = arith.constant 0 : index
    %421 = vector.load %arg10[%c1_304, %c2_305, %c0_306, %c0_307] : memref<2x4x1x32xf32, #tpu.memory_space<vmem>>, vector<1x1x1x32xf32>
    %422 = vector.shape_cast %421 : vector<1x1x1x32xf32> to vector<1x32xf32>
    %423 = vector.broadcast %422 : vector<1x32xf32> to vector<8x32xf32>
    %424 = arith.addf %420, %423 : vector<8x32xf32>
    %c1_308 = arith.constant 1 : index
    %c2_309 = arith.constant 2 : index
    %c0_310 = arith.constant 0 : index
    %c0_311 = arith.constant 0 : index
    %425 = vector.load %arg11[%c1_308, %c2_309, %c0_310, %c0_311] : memref<2x4x128x32xbf16, #tpu.memory_space<vmem>>, vector<1x1x128x32xbf16>
    %426 = vector.shape_cast %425 : vector<1x1x128x32xbf16> to vector<128x32xbf16>
    %cst_312 = arith.constant dense<0.000000e+00> : vector<8x32xf32>
    %427 = tpu.matmul %317, %426, %cst_312 {dimension_numbers = #tpu.dot_dimension_numbers<[1], [0], [0], [1], [0, 0, 1, 1], [], []>} : vector<8x128xbf16>, vector<128x32xbf16>, vector<8x32xf32> -> vector<8x32xf32>
    %c1_313 = arith.constant 1 : index
    %c2_314 = arith.constant 2 : index
    %c0_315 = arith.constant 0 : index
    %c0_316 = arith.constant 0 : index
    %428 = vector.load %arg12[%c1_313, %c2_314, %c0_315, %c0_316] : memref<2x4x1x32xf32, #tpu.memory_space<vmem>>, vector<1x1x1x32xf32>
    %429 = vector.shape_cast %428 : vector<1x1x1x32xf32> to vector<1x32xf32>
    %430 = vector.broadcast %429 : vector<1x32xf32> to vector<8x32xf32>
    %431 = arith.addf %427, %430 : vector<8x32xf32>
    %432 = arith.truncf %417 : vector<8x32xf32> to vector<8x32xbf16>
    %433 = arith.truncf %424 : vector<8x32xf32> to vector<8x32xbf16>
    %cst_317 = arith.constant dense<0.000000e+00> : vector<8x8xf32>
    %434 = tpu.matmul %432, %433, %cst_317 {dimension_numbers = #tpu.dot_dimension_numbers<[1], [1], [0], [0], [0, 0, 1, 0], [], []>} : vector<8x32xbf16>, vector<8x32xbf16>, vector<8x8xf32> -> vector<8x8xf32>
    %cst_318 = arith.constant 0.176776692 : f32
    %435 = vector.broadcast %cst_318 : f32 to vector<8x8xf32>
    %436 = arith.mulf %434, %435 : vector<8x8xf32>
    %437 = vector.broadcast %5 : vector<1x8xf32> to vector<8x8xf32>
    %438 = arith.addf %436, %437 : vector<8x8xf32>
    %cst_319 = arith.constant dense<0xFF800000> : vector<8xf32>
    %439 = vector.multi_reduction <maximumf>, %438, %cst_319 [1] : vector<8x8xf32> to vector<8xf32>
    %440 = vector.shape_cast %439 : vector<8xf32> to vector<8x1xf32>
    %441 = vector.broadcast %440 : vector<8x1xf32> to vector<8x8xf32>
    %442 = arith.subf %438, %441 : vector<8x8xf32>
    %443 = math.exp %442 : vector<8x8xf32>
    %cst_320 = arith.constant dense<0.000000e+00> : vector<8xf32>
    %444 = vector.multi_reduction <add>, %443, %cst_320 [1] : vector<8x8xf32> to vector<8xf32>
    %445 = vector.shape_cast %444 : vector<8xf32> to vector<8x1xf32>
    %446 = tpu.reciprocal %445 {approx = true} : vector<8x1xf32> -> vector<8x1xf32>
    %447 = vector.broadcast %446 : vector<8x1xf32> to vector<8x8xf32>
    %448 = arith.mulf %443, %447 : vector<8x8xf32>
    %449 = arith.truncf %448 : vector<8x8xf32> to vector<8x8xbf16>
    %450 = arith.truncf %431 : vector<8x32xf32> to vector<8x32xbf16>
    %cst_321 = arith.constant dense<0.000000e+00> : vector<8x32xf32>
    %451 = tpu.matmul %449, %450, %cst_321 {dimension_numbers = #tpu.dot_dimension_numbers<[1], [0], [0], [1], [0, 0, 1, 1], [], []>} : vector<8x8xbf16>, vector<8x32xbf16>, vector<8x32xf32> -> vector<8x32xf32>
    %452 = arith.truncf %451 : vector<8x32xf32> to vector<8x32xbf16>
    %c1_322 = arith.constant 1 : index
    %c2_323 = arith.constant 2 : index
    %c0_324 = arith.constant 0 : index
    %c0_325 = arith.constant 0 : index
    %453 = vector.load %arg13[%c1_322, %c2_323, %c0_324, %c0_325] : memref<2x4x32x128xbf16, #tpu.memory_space<vmem>>, vector<1x1x32x128xbf16>
    %454 = vector.shape_cast %453 : vector<1x1x32x128xbf16> to vector<32x128xbf16>
    %cst_326 = arith.constant dense<0.000000e+00> : vector<8x128xf32>
    %455 = tpu.matmul %452, %454, %cst_326 {dimension_numbers = #tpu.dot_dimension_numbers<[1], [0], [0], [1], [0, 0, 1, 1], [], []>} : vector<8x32xbf16>, vector<32x128xbf16>, vector<8x128xf32> -> vector<8x128xf32>
    %456 = arith.addf %410, %455 : vector<8x128xf32>
    %c1_327 = arith.constant 1 : index
    %c3_328 = arith.constant 3 : index
    %c0_329 = arith.constant 0 : index
    %c0_330 = arith.constant 0 : index
    %457 = vector.load %arg7[%c1_327, %c3_328, %c0_329, %c0_330] : memref<2x4x128x32xbf16, #tpu.memory_space<vmem>>, vector<1x1x128x32xbf16>
    %458 = vector.shape_cast %457 : vector<1x1x128x32xbf16> to vector<128x32xbf16>
    %cst_331 = arith.constant dense<0.000000e+00> : vector<8x32xf32>
    %459 = tpu.matmul %317, %458, %cst_331 {dimension_numbers = #tpu.dot_dimension_numbers<[1], [0], [0], [1], [0, 0, 1, 1], [], []>} : vector<8x128xbf16>, vector<128x32xbf16>, vector<8x32xf32> -> vector<8x32xf32>
    %c1_332 = arith.constant 1 : index
    %c3_333 = arith.constant 3 : index
    %c0_334 = arith.constant 0 : index
    %c0_335 = arith.constant 0 : index
    %460 = vector.load %arg8[%c1_332, %c3_333, %c0_334, %c0_335] : memref<2x4x1x32xf32, #tpu.memory_space<vmem>>, vector<1x1x1x32xf32>
    %461 = vector.shape_cast %460 : vector<1x1x1x32xf32> to vector<1x32xf32>
    %462 = vector.broadcast %461 : vector<1x32xf32> to vector<8x32xf32>
    %463 = arith.addf %459, %462 : vector<8x32xf32>
    %c1_336 = arith.constant 1 : index
    %c3_337 = arith.constant 3 : index
    %c0_338 = arith.constant 0 : index
    %c0_339 = arith.constant 0 : index
    %464 = vector.load %arg9[%c1_336, %c3_337, %c0_338, %c0_339] : memref<2x4x128x32xbf16, #tpu.memory_space<vmem>>, vector<1x1x128x32xbf16>
    %465 = vector.shape_cast %464 : vector<1x1x128x32xbf16> to vector<128x32xbf16>
    %cst_340 = arith.constant dense<0.000000e+00> : vector<8x32xf32>
    %466 = tpu.matmul %317, %465, %cst_340 {dimension_numbers = #tpu.dot_dimension_numbers<[1], [0], [0], [1], [0, 0, 1, 1], [], []>} : vector<8x128xbf16>, vector<128x32xbf16>, vector<8x32xf32> -> vector<8x32xf32>
    %c1_341 = arith.constant 1 : index
    %c3_342 = arith.constant 3 : index
    %c0_343 = arith.constant 0 : index
    %c0_344 = arith.constant 0 : index
    %467 = vector.load %arg10[%c1_341, %c3_342, %c0_343, %c0_344] : memref<2x4x1x32xf32, #tpu.memory_space<vmem>>, vector<1x1x1x32xf32>
    %468 = vector.shape_cast %467 : vector<1x1x1x32xf32> to vector<1x32xf32>
    %469 = vector.broadcast %468 : vector<1x32xf32> to vector<8x32xf32>
    %470 = arith.addf %466, %469 : vector<8x32xf32>
    %c1_345 = arith.constant 1 : index
    %c3_346 = arith.constant 3 : index
    %c0_347 = arith.constant 0 : index
    %c0_348 = arith.constant 0 : index
    %471 = vector.load %arg11[%c1_345, %c3_346, %c0_347, %c0_348] : memref<2x4x128x32xbf16, #tpu.memory_space<vmem>>, vector<1x1x128x32xbf16>
    %472 = vector.shape_cast %471 : vector<1x1x128x32xbf16> to vector<128x32xbf16>
    %cst_349 = arith.constant dense<0.000000e+00> : vector<8x32xf32>
    %473 = tpu.matmul %317, %472, %cst_349 {dimension_numbers = #tpu.dot_dimension_numbers<[1], [0], [0], [1], [0, 0, 1, 1], [], []>} : vector<8x128xbf16>, vector<128x32xbf16>, vector<8x32xf32> -> vector<8x32xf32>
    %c1_350 = arith.constant 1 : index
    %c3_351 = arith.constant 3 : index
    %c0_352 = arith.constant 0 : index
    %c0_353 = arith.constant 0 : index
    %474 = vector.load %arg12[%c1_350, %c3_351, %c0_352, %c0_353] : memref<2x4x1x32xf32, #tpu.memory_space<vmem>>, vector<1x1x1x32xf32>
    %475 = vector.shape_cast %474 : vector<1x1x1x32xf32> to vector<1x32xf32>
    %476 = vector.broadcast %475 : vector<1x32xf32> to vector<8x32xf32>
    %477 = arith.addf %473, %476 : vector<8x32xf32>
    %478 = arith.truncf %463 : vector<8x32xf32> to vector<8x32xbf16>
    %479 = arith.truncf %470 : vector<8x32xf32> to vector<8x32xbf16>
    %cst_354 = arith.constant dense<0.000000e+00> : vector<8x8xf32>
    %480 = tpu.matmul %478, %479, %cst_354 {dimension_numbers = #tpu.dot_dimension_numbers<[1], [1], [0], [0], [0, 0, 1, 0], [], []>} : vector<8x32xbf16>, vector<8x32xbf16>, vector<8x8xf32> -> vector<8x8xf32>
    %cst_355 = arith.constant 0.176776692 : f32
    %481 = vector.broadcast %cst_355 : f32 to vector<8x8xf32>
    %482 = arith.mulf %480, %481 : vector<8x8xf32>
    %483 = vector.broadcast %5 : vector<1x8xf32> to vector<8x8xf32>
    %484 = arith.addf %482, %483 : vector<8x8xf32>
    %cst_356 = arith.constant dense<0xFF800000> : vector<8xf32>
    %485 = vector.multi_reduction <maximumf>, %484, %cst_356 [1] : vector<8x8xf32> to vector<8xf32>
    %486 = vector.shape_cast %485 : vector<8xf32> to vector<8x1xf32>
    %487 = vector.broadcast %486 : vector<8x1xf32> to vector<8x8xf32>
    %488 = arith.subf %484, %487 : vector<8x8xf32>
    %489 = math.exp %488 : vector<8x8xf32>
    %cst_357 = arith.constant dense<0.000000e+00> : vector<8xf32>
    %490 = vector.multi_reduction <add>, %489, %cst_357 [1] : vector<8x8xf32> to vector<8xf32>
    %491 = vector.shape_cast %490 : vector<8xf32> to vector<8x1xf32>
    %492 = tpu.reciprocal %491 {approx = true} : vector<8x1xf32> -> vector<8x1xf32>
    %493 = vector.broadcast %492 : vector<8x1xf32> to vector<8x8xf32>
    %494 = arith.mulf %489, %493 : vector<8x8xf32>
    %495 = arith.truncf %494 : vector<8x8xf32> to vector<8x8xbf16>
    %496 = arith.truncf %477 : vector<8x32xf32> to vector<8x32xbf16>
    %cst_358 = arith.constant dense<0.000000e+00> : vector<8x32xf32>
    %497 = tpu.matmul %495, %496, %cst_358 {dimension_numbers = #tpu.dot_dimension_numbers<[1], [0], [0], [1], [0, 0, 1, 1], [], []>} : vector<8x8xbf16>, vector<8x32xbf16>, vector<8x32xf32> -> vector<8x32xf32>
    %498 = arith.truncf %497 : vector<8x32xf32> to vector<8x32xbf16>
    %c1_359 = arith.constant 1 : index
    %c3_360 = arith.constant 3 : index
    %c0_361 = arith.constant 0 : index
    %c0_362 = arith.constant 0 : index
    %499 = vector.load %arg13[%c1_359, %c3_360, %c0_361, %c0_362] : memref<2x4x32x128xbf16, #tpu.memory_space<vmem>>, vector<1x1x32x128xbf16>
    %500 = vector.shape_cast %499 : vector<1x1x32x128xbf16> to vector<32x128xbf16>
    %cst_363 = arith.constant dense<0.000000e+00> : vector<8x128xf32>
    %501 = tpu.matmul %498, %500, %cst_363 {dimension_numbers = #tpu.dot_dimension_numbers<[1], [0], [0], [1], [0, 0, 1, 1], [], []>} : vector<8x32xbf16>, vector<32x128xbf16>, vector<8x128xf32> -> vector<8x128xf32>
    %502 = arith.addf %456, %501 : vector<8x128xf32>
    %503 = arith.addf %290, %502 : vector<8x128xf32>
    %c1_364 = arith.constant 1 : index
    %c0_365 = arith.constant 0 : index
    %c0_366 = arith.constant 0 : index
    %504 = vector.load %arg14[%c1_364, %c0_365, %c0_366] : memref<2x1x128xf32, #tpu.memory_space<vmem>>, vector<1x1x128xf32>
    %505 = vector.shape_cast %504 : vector<1x1x128xf32> to vector<1x128xf32>
    %506 = vector.broadcast %505 : vector<1x128xf32> to vector<8x128xf32>
    %507 = arith.addf %503, %506 : vector<8x128xf32>
    %c1_367 = arith.constant 1 : index
    %c0_368 = arith.constant 0 : index
    %c0_369 = arith.constant 0 : index
    %508 = vector.load %arg21[%c1_367, %c0_368, %c0_369] : memref<2x1x128xf32, #tpu.memory_space<vmem>>, vector<1x1x128xf32>
    %509 = vector.shape_cast %508 : vector<1x1x128xf32> to vector<1x128xf32>
    %c1_370 = arith.constant 1 : index
    %c0_371 = arith.constant 0 : index
    %c0_372 = arith.constant 0 : index
    %510 = vector.load %arg22[%c1_370, %c0_371, %c0_372] : memref<2x1x128xf32, #tpu.memory_space<vmem>>, vector<1x1x128xf32>
    %511 = vector.shape_cast %510 : vector<1x1x128xf32> to vector<1x128xf32>
    %cst_373 = arith.constant dense<0.000000e+00> : vector<8xf32>
    %512 = vector.multi_reduction <add>, %507, %cst_373 [1] : vector<8x128xf32> to vector<8xf32>
    %513 = vector.shape_cast %512 : vector<8xf32> to vector<8x1xf32>
    %cst_374 = arith.constant 1.280000e+02 : f32
    %514 = vector.broadcast %cst_374 : f32 to vector<8x1xf32>
    %515 = arith.divf %513, %514 : vector<8x1xf32>
    %516 = vector.broadcast %515 : vector<8x1xf32> to vector<8x128xf32>
    %517 = arith.subf %507, %516 : vector<8x128xf32>
    %518 = arith.mulf %517, %517 : vector<8x128xf32>
    %cst_375 = arith.constant dense<0.000000e+00> : vector<8xf32>
    %519 = vector.multi_reduction <add>, %518, %cst_375 [1] : vector<8x128xf32> to vector<8xf32>
    %520 = vector.shape_cast %519 : vector<8xf32> to vector<8x1xf32>
    %cst_376 = arith.constant 1.280000e+02 : f32
    %521 = vector.broadcast %cst_376 : f32 to vector<8x1xf32>
    %522 = arith.divf %520, %521 : vector<8x1xf32>
    %523 = vector.broadcast %515 : vector<8x1xf32> to vector<8x128xf32>
    %524 = arith.subf %507, %523 : vector<8x128xf32>
    %cst_377 = arith.constant 9.99999974E-6 : f32
    %525 = vector.broadcast %cst_377 : f32 to vector<8x1xf32>
    %526 = arith.addf %522, %525 : vector<8x1xf32>
    %527 = math.rsqrt %526 : vector<8x1xf32>
    %528 = vector.broadcast %527 : vector<8x1xf32> to vector<8x128xf32>
    %529 = arith.mulf %524, %528 : vector<8x128xf32>
    %530 = vector.broadcast %509 : vector<1x128xf32> to vector<8x128xf32>
    %531 = arith.mulf %529, %530 : vector<8x128xf32>
    %532 = vector.broadcast %511 : vector<1x128xf32> to vector<8x128xf32>
    %533 = arith.addf %531, %532 : vector<8x128xf32>
    %534 = arith.truncf %533 : vector<8x128xf32> to vector<8x128xbf16>
    %c1_378 = arith.constant 1 : index
    %c0_379 = arith.constant 0 : index
    %c0_380 = arith.constant 0 : index
    %535 = vector.load %arg17[%c1_378, %c0_379, %c0_380] : memref<2x128x256xbf16, #tpu.memory_space<vmem>>, vector<1x128x256xbf16>
    %536 = vector.shape_cast %535 : vector<1x128x256xbf16> to vector<128x256xbf16>
    %cst_381 = arith.constant dense<0.000000e+00> : vector<8x256xf32>
    %537 = tpu.matmul %534, %536, %cst_381 {dimension_numbers = #tpu.dot_dimension_numbers<[1], [0], [0], [1], [0, 0, 1, 1], [], []>} : vector<8x128xbf16>, vector<128x256xbf16>, vector<8x256xf32> -> vector<8x256xf32>
    %c1_382 = arith.constant 1 : index
    %c0_383 = arith.constant 0 : index
    %c0_384 = arith.constant 0 : index
    %538 = vector.load %arg18[%c1_382, %c0_383, %c0_384] : memref<2x1x256xf32, #tpu.memory_space<vmem>>, vector<1x1x256xf32>
    %539 = vector.shape_cast %538 : vector<1x1x256xf32> to vector<1x256xf32>
    %540 = vector.broadcast %539 : vector<1x256xf32> to vector<8x256xf32>
    %541 = arith.addf %537, %540 : vector<8x256xf32>
    %542 = arith.mulf %541, %541 : vector<8x256xf32>
    %543 = arith.mulf %541, %542 : vector<8x256xf32>
    %cst_385 = arith.constant 4.471500e-02 : f32
    %544 = vector.broadcast %cst_385 : f32 to vector<8x256xf32>
    %545 = arith.mulf %544, %543 : vector<8x256xf32>
    %546 = arith.addf %541, %545 : vector<8x256xf32>
    %cst_386 = arith.constant 0.797884583 : f32
    %547 = vector.broadcast %cst_386 : f32 to vector<8x256xf32>
    %548 = arith.mulf %547, %546 : vector<8x256xf32>
    %549 = math.tanh %548 : vector<8x256xf32>
    %cst_387 = arith.constant 1.000000e+00 : f32
    %550 = vector.broadcast %cst_387 : f32 to vector<8x256xf32>
    %551 = arith.addf %550, %549 : vector<8x256xf32>
    %cst_388 = arith.constant 5.000000e-01 : f32
    %552 = vector.broadcast %cst_388 : f32 to vector<8x256xf32>
    %553 = arith.mulf %552, %551 : vector<8x256xf32>
    %554 = arith.mulf %541, %553 : vector<8x256xf32>
    %555 = arith.truncf %554 : vector<8x256xf32> to vector<8x256xbf16>
    %c1_389 = arith.constant 1 : index
    %c0_390 = arith.constant 0 : index
    %c0_391 = arith.constant 0 : index
    %556 = vector.load %arg19[%c1_389, %c0_390, %c0_391] : memref<2x256x128xbf16, #tpu.memory_space<vmem>>, vector<1x256x128xbf16>
    %557 = vector.shape_cast %556 : vector<1x256x128xbf16> to vector<256x128xbf16>
    %cst_392 = arith.constant dense<0.000000e+00> : vector<8x128xf32>
    %558 = tpu.matmul %555, %557, %cst_392 {dimension_numbers = #tpu.dot_dimension_numbers<[1], [0], [0], [1], [0, 0, 1, 1], [], []>} : vector<8x256xbf16>, vector<256x128xbf16>, vector<8x128xf32> -> vector<8x128xf32>
    %c1_393 = arith.constant 1 : index
    %c0_394 = arith.constant 0 : index
    %c0_395 = arith.constant 0 : index
    %559 = vector.load %arg20[%c1_393, %c0_394, %c0_395] : memref<2x1x128xf32, #tpu.memory_space<vmem>>, vector<1x1x128xf32>
    %560 = vector.shape_cast %559 : vector<1x1x128xf32> to vector<1x128xf32>
    %561 = vector.broadcast %560 : vector<1x128xf32> to vector<8x128xf32>
    %562 = arith.addf %558, %561 : vector<8x128xf32>
    %563 = arith.addf %507, %562 : vector<8x128xf32>
    %c0_396 = arith.constant 0 : index
    %c0_397 = arith.constant 0 : index
    %564 = vector.load %arg23[%c0_396, %c0_397] : memref<1x128xf32, #tpu.memory_space<vmem>>, vector<1x128xf32>
    %c0_398 = arith.constant 0 : index
    %c0_399 = arith.constant 0 : index
    %565 = vector.load %arg24[%c0_398, %c0_399] : memref<1x128xf32, #tpu.memory_space<vmem>>, vector<1x128xf32>
    %cst_400 = arith.constant dense<0.000000e+00> : vector<8xf32>
    %566 = vector.multi_reduction <add>, %563, %cst_400 [1] : vector<8x128xf32> to vector<8xf32>
    %567 = vector.shape_cast %566 : vector<8xf32> to vector<8x1xf32>
    %cst_401 = arith.constant 1.280000e+02 : f32
    %568 = vector.broadcast %cst_401 : f32 to vector<8x1xf32>
    %569 = arith.divf %567, %568 : vector<8x1xf32>
    %570 = vector.broadcast %569 : vector<8x1xf32> to vector<8x128xf32>
    %571 = arith.subf %563, %570 : vector<8x128xf32>
    %572 = arith.mulf %571, %571 : vector<8x128xf32>
    %cst_402 = arith.constant dense<0.000000e+00> : vector<8xf32>
    %573 = vector.multi_reduction <add>, %572, %cst_402 [1] : vector<8x128xf32> to vector<8xf32>
    %574 = vector.shape_cast %573 : vector<8xf32> to vector<8x1xf32>
    %cst_403 = arith.constant 1.280000e+02 : f32
    %575 = vector.broadcast %cst_403 : f32 to vector<8x1xf32>
    %576 = arith.divf %574, %575 : vector<8x1xf32>
    %577 = vector.broadcast %569 : vector<8x1xf32> to vector<8x128xf32>
    %578 = arith.subf %563, %577 : vector<8x128xf32>
    %cst_404 = arith.constant 9.99999974E-6 : f32
    %579 = vector.broadcast %cst_404 : f32 to vector<8x1xf32>
    %580 = arith.addf %576, %579 : vector<8x1xf32>
    %581 = math.rsqrt %580 : vector<8x1xf32>
    %582 = vector.broadcast %581 : vector<8x1xf32> to vector<8x128xf32>
    %583 = arith.mulf %578, %582 : vector<8x128xf32>
    %584 = vector.broadcast %564 : vector<1x128xf32> to vector<8x128xf32>
    %585 = arith.mulf %583, %584 : vector<8x128xf32>
    %586 = vector.broadcast %565 : vector<1x128xf32> to vector<8x128xf32>
    %587 = arith.addf %585, %586 : vector<8x128xf32>
    %c0_405 = arith.constant 0 : index
    %c0_406 = arith.constant 0 : index
    %c0_407 = arith.constant 0 : index
    %588 = vector.load %arg27[%c0_405, %c0_406, %c0_407] : memref<1x8x128xf32, #tpu.memory_space<vmem>>, vector<1x8x128xf32>
    %589 = vector.shape_cast %588 : vector<1x8x128xf32> to vector<8x128xf32>
    %590 = vector.shape_cast %587 : vector<8x128xf32> to vector<1x8x128xf32>
    tpu.vector_store %arg27[%c0_405, %c0_406, %c0_407], %590 {strides = array<i32>} : memref<1x8x128xf32, #tpu.memory_space<vmem>>, vector<1x8x128xf32>,
    %591 = arith.truncf %587 : vector<8x128xf32> to vector<8x128xbf16>
    %c0_408 = arith.constant 0 : index
    %c0_409 = arith.constant 0 : index
    %592 = vector.load %arg25[%c0_408, %c0_409] : memref<128x128xbf16, #tpu.memory_space<vmem>>, vector<128x128xbf16>
    %cst_410 = arith.constant dense<0.000000e+00> : vector<8x128xf32>
    %593 = tpu.matmul %591, %592, %cst_410 {dimension_numbers = #tpu.dot_dimension_numbers<[1], [0], [0], [1], [0, 0, 1, 1], [], []>} : vector<8x128xbf16>, vector<128x128xbf16>, vector<8x128xf32> -> vector<8x128xf32>
    %c0_411 = arith.constant 0 : index
    %c0_412 = arith.constant 0 : index
    %594 = vector.load %arg26[%c0_411, %c0_412] : memref<1x128xf32, #tpu.memory_space<vmem>>, vector<1x128xf32>
    %595 = vector.broadcast %594 : vector<1x128xf32> to vector<8x128xf32>
    %596 = arith.addf %593, %595 : vector<8x128xf32>
    %c0_413 = arith.constant 0 : index
    %c0_414 = arith.constant 0 : index
    %c0_415 = arith.constant 0 : index
    %597 = vector.load %arg28[%c0_413, %c0_414, %c0_415] : memref<1x8x128xf32, #tpu.memory_space<vmem>>, vector<1x8x128xf32>
    %598 = vector.shape_cast %597 : vector<1x8x128xf32> to vector<8x128xf32>
    %599 = vector.shape_cast %596 : vector<8x128xf32> to vector<1x8x128xf32>
    tpu.vector_store %arg28[%c0_413, %c0_414, %c0_415], %599 {strides = array<i32>} : memref<1x8x128xf32, #tpu.memory_space<vmem>>, vector<1x8x128xf32>,
    return
  }
  func.func @transform_0(%arg0: i32) -> (i32, i32, i32) {
    %c0_i32 = arith.constant 0 : i32
    %c0_i32_0 = arith.constant 0 : i32
    %c0_i32_1 = arith.constant 0 : i32
    return %arg0, %c0_i32, %c0_i32_0 : i32, i32, i32
  }
  func.func @transform_1(%arg0: i32) -> (i32, i32, i32) {
    %c0_i32 = arith.constant 0 : i32
    %c0_i32_0 = arith.constant 0 : i32
    %c0_i32_1 = arith.constant 0 : i32
    return %arg0, %c0_i32, %c0_i32_0 : i32, i32, i32
  }
  func.func @transform_2(%arg0: i32) -> (i32, i32, i32) {
    %c0_i32 = arith.constant 0 : i32
    %c0_i32_0 = arith.constant 0 : i32
    %c0_i32_1 = arith.constant 0 : i32
    return %arg0, %c0_i32, %c0_i32_0 : i32, i32, i32
  }
  func.func @transform_3(%arg0: i32) -> (i32, i32) {
    %c0_i32 = arith.constant 0 : i32
    %c0_i32_0 = arith.constant 0 : i32
    %c0_i32_1 = arith.constant 0 : i32
    return %c0_i32, %c0_i32_0 : i32, i32
  }
  func.func @transform_4(%arg0: i32) -> (i32, i32) {
    %c0_i32 = arith.constant 0 : i32
    %c0_i32_0 = arith.constant 0 : i32
    %c0_i32_1 = arith.constant 0 : i32
    return %c0_i32, %c0_i32_0 : i32, i32
  }
  func.func @transform_5(%arg0: i32) -> (i32, i32) {
    %c0_i32 = arith.constant 0 : i32
    %c0_i32_0 = arith.constant 0 : i32
    %c0_i32_1 = arith.constant 0 : i32
    return %c0_i32, %c0_i32_0 : i32, i32
  }
  func.func @transform_6(%arg0: i32) -> (i32, i32, i32, i32) {
    %c0_i32 = arith.constant 0 : i32
    %c0_i32_0 = arith.constant 0 : i32
    %c0_i32_1 = arith.constant 0 : i32
    %c0_i32_2 = arith.constant 0 : i32
    %c0_i32_3 = arith.constant 0 : i32
    return %c0_i32, %c0_i32_0, %c0_i32_1, %c0_i32_2 : i32, i32, i32, i32
  }
  func.func @transform_7(%arg0: i32) -> (i32, i32, i32, i32) {
    %c0_i32 = arith.constant 0 : i32
    %c0_i32_0 = arith.constant 0 : i32
    %c0_i32_1 = arith.constant 0 : i32
    %c0_i32_2 = arith.constant 0 : i32
    %c0_i32_3 = arith.constant 0 : i32
    return %c0_i32, %c0_i32_0, %c0_i32_1, %c0_i32_2 : i32, i32, i32, i32
  }
  func.func @transform_8(%arg0: i32) -> (i32, i32, i32, i32) {
    %c0_i32 = arith.constant 0 : i32
    %c0_i32_0 = arith.constant 0 : i32
    %c0_i32_1 = arith.constant 0 : i32
    %c0_i32_2 = arith.constant 0 : i32
    %c0_i32_3 = arith.constant 0 : i32
    return %c0_i32, %c0_i32_0, %c0_i32_1, %c0_i32_2 : i32, i32, i32, i32
  }
  func.func @transform_9(%arg0: i32) -> (i32, i32, i32, i32) {
    %c0_i32 = arith.constant 0 : i32
    %c0_i32_0 = arith.constant 0 : i32
    %c0_i32_1 = arith.constant 0 : i32
    %c0_i32_2 = arith.constant 0 : i32
    %c0_i32_3 = arith.constant 0 : i32
    return %c0_i32, %c0_i32_0, %c0_i32_1, %c0_i32_2 : i32, i32, i32, i32
  }
  func.func @transform_10(%arg0: i32) -> (i32, i32, i32, i32) {
    %c0_i32 = arith.constant 0 : i32
    %c0_i32_0 = arith.constant 0 : i32
    %c0_i32_1 = arith.constant 0 : i32
    %c0_i32_2 = arith.constant 0 : i32
    %c0_i32_3 = arith.constant 0 : i32
    return %c0_i32, %c0_i32_0, %c0_i32_1, %c0_i32_2 : i32, i32, i32, i32
  }
  func.func @transform_11(%arg0: i32) -> (i32, i32, i32, i32) {
    %c0_i32 = arith.constant 0 : i32
    %c0_i32_0 = arith.constant 0 : i32
    %c0_i32_1 = arith.constant 0 : i32
    %c0_i32_2 = arith.constant 0 : i32
    %c0_i32_3 = arith.constant 0 : i32
    return %c0_i32, %c0_i32_0, %c0_i32_1, %c0_i32_2 : i32, i32, i32, i32
  }
  func.func @transform_12(%arg0: i32) -> (i32, i32, i32, i32) {
    %c0_i32 = arith.constant 0 : i32
    %c0_i32_0 = arith.constant 0 : i32
    %c0_i32_1 = arith.constant 0 : i32
    %c0_i32_2 = arith.constant 0 : i32
    %c0_i32_3 = arith.constant 0 : i32
    return %c0_i32, %c0_i32_0, %c0_i32_1, %c0_i32_2 : i32, i32, i32, i32
  }
  func.func @transform_13(%arg0: i32) -> (i32, i32, i32) {
    %c0_i32 = arith.constant 0 : i32
    %c0_i32_0 = arith.constant 0 : i32
    %c0_i32_1 = arith.constant 0 : i32
    %c0_i32_2 = arith.constant 0 : i32
    return %c0_i32, %c0_i32_0, %c0_i32_1 : i32, i32, i32
  }
  func.func @transform_14(%arg0: i32) -> (i32, i32, i32) {
    %c0_i32 = arith.constant 0 : i32
    %c0_i32_0 = arith.constant 0 : i32
    %c0_i32_1 = arith.constant 0 : i32
    %c0_i32_2 = arith.constant 0 : i32
    return %c0_i32, %c0_i32_0, %c0_i32_1 : i32, i32, i32
  }
  func.func @transform_15(%arg0: i32) -> (i32, i32, i32) {
    %c0_i32 = arith.constant 0 : i32
    %c0_i32_0 = arith.constant 0 : i32
    %c0_i32_1 = arith.constant 0 : i32
    %c0_i32_2 = arith.constant 0 : i32
    return %c0_i32, %c0_i32_0, %c0_i32_1 : i32, i32, i32
  }
  func.func @transform_16(%arg0: i32) -> (i32, i32, i32) {
    %c0_i32 = arith.constant 0 : i32
    %c0_i32_0 = arith.constant 0 : i32
    %c0_i32_1 = arith.constant 0 : i32
    %c0_i32_2 = arith.constant 0 : i32
    return %c0_i32, %c0_i32_0, %c0_i32_1 : i32, i32, i32
  }
  func.func @transform_17(%arg0: i32) -> (i32, i32, i32) {
    %c0_i32 = arith.constant 0 : i32
    %c0_i32_0 = arith.constant 0 : i32
    %c0_i32_1 = arith.constant 0 : i32
    %c0_i32_2 = arith.constant 0 : i32
    return %c0_i32, %c0_i32_0, %c0_i32_1 : i32, i32, i32
  }
  func.func @transform_18(%arg0: i32) -> (i32, i32, i32) {
    %c0_i32 = arith.constant 0 : i32
    %c0_i32_0 = arith.constant 0 : i32
    %c0_i32_1 = arith.constant 0 : i32
    %c0_i32_2 = arith.constant 0 : i32
    return %c0_i32, %c0_i32_0, %c0_i32_1 : i32, i32, i32
  }
  func.func @transform_19(%arg0: i32) -> (i32, i32, i32) {
    %c0_i32 = arith.constant 0 : i32
    %c0_i32_0 = arith.constant 0 : i32
    %c0_i32_1 = arith.constant 0 : i32
    %c0_i32_2 = arith.constant 0 : i32
    return %c0_i32, %c0_i32_0, %c0_i32_1 : i32, i32, i32
  }
  func.func @transform_20(%arg0: i32) -> (i32, i32, i32) {
    %c0_i32 = arith.constant 0 : i32
    %c0_i32_0 = arith.constant 0 : i32
    %c0_i32_1 = arith.constant 0 : i32
    %c0_i32_2 = arith.constant 0 : i32
    return %c0_i32, %c0_i32_0, %c0_i32_1 : i32, i32, i32
  }
  func.func @transform_21(%arg0: i32) -> (i32, i32, i32) {
    %c0_i32 = arith.constant 0 : i32
    %c0_i32_0 = arith.constant 0 : i32
    %c0_i32_1 = arith.constant 0 : i32
    %c0_i32_2 = arith.constant 0 : i32
    return %c0_i32, %c0_i32_0, %c0_i32_1 : i32, i32, i32
  }
  func.func @transform_22(%arg0: i32) -> (i32, i32) {
    %c0_i32 = arith.constant 0 : i32
    %c0_i32_0 = arith.constant 0 : i32
    %c0_i32_1 = arith.constant 0 : i32
    return %c0_i32, %c0_i32_0 : i32, i32
  }
  func.func @transform_23(%arg0: i32) -> (i32, i32) {
    %c0_i32 = arith.constant 0 : i32
    %c0_i32_0 = arith.constant 0 : i32
    %c0_i32_1 = arith.constant 0 : i32
    return %c0_i32, %c0_i32_0 : i32, i32
  }
  func.func @transform_24(%arg0: i32) -> (i32, i32) {
    %c0_i32 = arith.constant 0 : i32
    %c0_i32_0 = arith.constant 0 : i32
    %c0_i32_1 = arith.constant 0 : i32
    return %c0_i32, %c0_i32_0 : i32, i32
  }
  func.func @transform_25(%arg0: i32) -> (i32, i32) {
    %c0_i32 = arith.constant 0 : i32
    %c0_i32_0 = arith.constant 0 : i32
    %c0_i32_1 = arith.constant 0 : i32
    return %c0_i32, %c0_i32_0 : i32, i32
  }
  func.func @transform_26(%arg0: i32) -> (i32, i32, i32) {
    %c0_i32 = arith.constant 0 : i32
    %c0_i32_0 = arith.constant 0 : i32
    %c0_i32_1 = arith.constant 0 : i32
    return %arg0, %c0_i32, %c0_i32_0 : i32, i32, i32
  }
  func.func @transform_27(%arg0: i32) -> (i32, i32, i32) {
    %c0_i32 = arith.constant 0 : i32
    %c0_i32_0 = arith.constant 0 : i32
    %c0_i32_1 = arith.constant 0 : i32
    return %arg0, %c0_i32, %c0_i32_0 : i32, i32, i32
  }
}

</mosaic_0001>

<bundles_post_ra>
// kernel: tpu_custom_call.1
= control target key start
LH: loop header
LB: loop body
LE: loop exit
PB: predicated region body
PF: predicated region fallthrough
CT: control target
= control target key end

     0   :  { %s8249_s0 = inlined_call_operand.vmem [shape: f32[2,8,16], index: 0, kind: input, shape index: {}]   ;;  %s8250_s1 = inlined_call_operand.vmem [shape: f32[2,8,1], index: 1, kind: input, shape index: {}]   ;;  %s8251_s2 = inlined_call_operand.vmem [shape: f32[2,1,8], index: 2, kind: input, shape index: {}]   ;;  %s8252_s3 = inlined_call_operand.vmem [shape: f32[8,128], index: 3, kind: input, shape index: {}]   ;;  %s8253_s4 = inlined_call_operand.vmem [shape: bf16[16,128], index: 4, kind: input, shape index: {}]   ;;  %s8254_s5 = inlined_call_operand.vmem [shape: f32[1,128], index: 5, kind: input, shape index: {}]   ;;  %s8255_s6 = inlined_call_operand.vmem [shape: bf16[2,4,128,32], index: 6, kind: input, shape index: {}]   ;;  %s8256_s7 = inlined_call_operand.vmem [shape: f32[2,4,1,32], index: 7, kind: input, shape index: {}]   ;;  %s8257_s8 = inlined_call_operand.vmem [shape: bf16[2,4,128,32], index: 8, kind: input, shape index: {}]   ;;  %s8258_s9 = inlined_call_operand.vmem [shape: f32[2,4,1,32], index: 9, kind: input, shape index: {}]   ;;  %s8259_s10 = inlined_call_operand.vmem [shape: bf16[2,4,128,32], index: 10, kind: input, shape index: {}]   ;;  %s8260_s11 = inlined_call_operand.vmem [shape: f32[2,4,1,32], index: 11, kind: input, shape index: {}]   ;;  %s8261_s12 = inlined_call_operand.vmem [shape: bf16[2,4,32,128], index: 12, kind: input, shape index: {}]   ;;  %s8262_s13 = inlined_call_operand.vmem [shape: f32[2,1,128], index: 13, kind: input, shape index: {}]   ;;  %s8263_s14 = inlined_call_operand.vmem [shape: f32[2,1,128], index: 14, kind: input, shape index: {}]   ;;  %s8264_s15 = inlined_call_operand.vmem [shape: f32[2,1,128], index: 15, kind: input, shape index: {}]   ;;  %s8265_s16 = inlined_call_operand.vmem [shape: bf16[2,128,256], index: 16, kind: input, shape index: {}]   ;;  %s8266_s17 = inlined_call_operand.vmem [shape: f32[2,1,256], index: 17, kind: input, shape index: {}]   ;;  %s8267_s18 = inlined_call_operand.vmem [shape: bf16[2,256,128], index: 18, kind: input, shape index: {}]   ;;  %s8268_s19 = inlined_call_operand.vmem [shape: f32[2,1,128], index: 19, kind: input, shape index: {}]   ;;  %s8269_s20 = inlined_call_operand.vmem [shape: f32[2,1,128], index: 20, kind: input, shape index: {}]   ;;  %s8270_s21 = inlined_call_operand.vmem [shape: f32[2,1,128], index: 21, kind: input, shape index: {}]   ;;  %s8271_s22 = inlined_call_operand.vmem [shape: f32[1,128], index: 22, kind: input, shape index: {}]   ;;  %s8272_s23 = inlined_call_operand.vmem [shape: f32[1,128], index: 23, kind: input, shape index: {}]   ;;  %s8273_s24 = inlined_call_operand.vmem [shape: bf16[128,128], index: 24, kind: input, shape index: {}]   ;;  %s8274_s25 = inlined_call_operand.vmem [shape: f32[1,128], index: 25, kind: input, shape index: {}]   ;;  %s8275_s26 = inlined_call_operand.hbm [shape: f32[2,8,128], index: 26, kind: output, shape index: {0}]   ;;  %s8276_s27 = inlined_call_operand.hbm [shape: f32[2,8,128], index: 27, kind: output, shape index: {1}]  }
   0x1   :  { %8296 = sst [smem:[#allocation15_spill]] %s8249_s0 }
   0x2   :  { %8297 = sst [smem:[#allocation16_spill]] %s8250_s1 }
   0x3   :  { %8298 = sst [smem:[#allocation17_spill]] %s8251_s2 }
   0x4   :  { %8299 = sst [smem:[#allocation18_spill]] %s8252_s3 }
   0x5   :  { %8300 = sst [smem:[#allocation19_spill]] %s8253_s4 }
   0x6   :  { %8301 = sst [smem:[#allocation20_spill]] %s8254_s5 }
   0x7   :  { %8302 = sst [smem:[#allocation21_spill]] %s8255_s6 }
   0x8   :  { %8303 = sst [smem:[#allocation22_spill]] %s8256_s7 }
   0x9   :  { %8304 = sst [smem:[#allocation23_spill]] %s8257_s8 }
   0xa   :  { %8305 = sst [smem:[#allocation24_spill]] %s8258_s9 }
   0xb   :  { %8306 = sst [smem:[#allocation25_spill]] %s8259_s10 }
   0xc   :  { %8307 = sst [smem:[#allocation26_spill]] %s8260_s11 }
   0xd   :  { %8308 = sst [smem:[#allocation27_spill]] %s8261_s12 }
   0xe   :  { %8309 = sst [smem:[#allocation28_spill]] %s8262_s13 }
   0xf   :  { %8310 = sst [smem:[#allocation29_spill]] %s8263_s14 }
  0x10   :  { %8311 = sst [smem:[#allocation30_spill]] %s8264_s15 }
  0x11   :  { %8312 = sst [smem:[#allocation31_spill]] %s8265_s16 }
  0x12   :  { %8313 = sst [smem:[#allocation32_spill]] %s8271_s22 }
  0x13   :  { %8314 = sst [smem:[#allocation33_spill]] %s8272_s23 }
  0x14   :  { %8315 = sst [smem:[#allocation34_spill]] %s8274_s25 }
  0x15   :  { %8316 = sst [smem:[#allocation35_spill]] %s8275_s26 }
  0x16   :  { %8317 = sst [smem:[#allocation36_spill]] %s8276_s27 }
  0x17   :  { %33 = vsyncpa [#allocation3], 0 }
  0x18   :  { %35 = vsyncpa [#allocation3 + $0x1], 0 }
  0x19   :  { %36 = vsyncpa [#allocation5], 0 }
  0x1a   :  { %38 = vsyncpa [#allocation5 + $0x1], 0  ;;  %s6898_s7 = smov 0   ;;  %s6900_s4 = smov 0  }
  0x1b   :  { %s6902_s8 = smov 0   ;;  %s6904_s30 = smov 0  }
  0x1c LB: > { %8318 = sst [smem:[#allocation8_spill]] %s6742_s7  ;;  %s6919_s9 = sadd.s32 4294967295, %s6754_s30   ;;  %s6754_s30 = sphi %s6904_s30, %s8355_s30   ;;  %s6750_s8 = sphi %s6902_s8, %s8357_s8   ;;  %s6746_s4 = sphi %s6900_s4, %s8359_s4   ;;  %s6742_s7 = sphi %s6898_s7, %s8358_s7  }
  0x1d   : > { %8319 = sst [smem:[#allocation9_spill]] %s6750_s8  ;;  %s4635_s5 = sadd.s32 4294967294, %s6754_s30  }
  0x1e   : > { %8320 = sst [smem:[#allocation10_spill]] %s6754_s30  ;;  %s6923_s28 = sadd.s32 1, %s6754_s30  }
  0x1f   : > { %8321 = sst [smem:[#allocation11_spill]] %s6923_s28  ;;  %s612_s0 = sadd.s32 1, %s6750_s8 }
  0x20   : > { %s609_s10 = ssub.s32 %s6754_s30, %s6923_s28  ;;  %p622_p0 = scmp.ne.s32.totalorder %s6750_s8, %s6746_s4 }
  0x21   : > { %p610_p1 = scmp.eq.s32.totalorder %s609_s10, 0  ;;  %p623_p2 = scmp.eq.s32.totalorder %s6919_s9, 1 }
  0x22   : > { %p628_p3 = scmp.ne.s32.totalorder %s6746_s4, %s6742_s7  ;;  %p629_p4 = scmp.eq.s32.totalorder %s4635_s5, 1 }
  0x23   : > { %s6934_s29 = scalar_select %p610_p1, %s6750_s8, %s612_s0  }
  0x24   : > { %p6936_p5 = por %p623_p2, %p622_p0  ;;  %p6940_p6 = por %p629_p4, %p628_p3 }
  0x25   : > { %8322 = sst [smem:[#allocation12_spill]] %s6934_s29  ;;  %p4638_p7 = scmp.ge.s32.totalorder %s6754_s30, 1 }
  0x26   : > { %s8323_s1 = scalar_select %p6936_p5, 1, 0 }
  0x27   : > { %s8325_s6 = scalar_select %p6940_p6, 1, 0 }
  0x28   : > { %8324 = sst [smem:[#allocation13_spill]] %s8323_s1  ;;  %p762_p8 = scmp.lt.s32.totalorder %s6754_s30, 3 }
  0x29   : > { %8326 = sst [smem:[#allocation14_spill]] %s8325_s6 }
  0x2a   : > { %p763_p9 = pnand %p4638_p7, %p762_p8 }
  0x2b   : > { %s8327_s3 = sld [smem:[#allocation19_spill]] (!%p763_p9)  ;;  %p845_p10 = scmp.lt.s32.totalorder (!%p763_p9), %s6919_s9, 1 }
  0x2c   : > { %766 = sbr.rel (%p763_p9) target bundleno = 6824 (0x1aa8), region = 124  ;;  %s8328_s8 = sld [smem:[#allocation17_spill]] (!%p763_p9) }
  0x2d   : > { %s8329_s30 = sld [smem:[#allocation15_spill]] (!%p763_p9)  ;;  %s6234_s22 = sshll.u32 (!%p763_p9), %s6919_s9, 3 }
  0x2e   : > { %s8330_s2 = sld [smem:[#allocation16_spill]] (!%p763_p9) }
  0x2f   : > { %s8331_s23 = sld [smem:[#allocation20_spill]] (!%p763_p9) }
  0x30   : > { %s8332_s7 = sld [smem:[#allocation18_spill]] (!%p763_p9) }
  0x31   : > { %v6238_v0 = vld [vmem:[%s8327_s3] sm:$0xff]  ;;  %v6756_v1 = vmov 0   ;;  %s846_s5 = scalar_select %p845_p10, %s6919_s9, 1  ;;  %vm869_vm0 = vcmask 130048   ;;  %v6757_v14 = vmov 128.0   ;;  %vm1183_vm5 = vcmask 261120  }
  0x32   : > { %6565 = vset.pattern.permute.xlu0 %v6756_v1  ;;  %880 = vmatpush.bf16.msra.mxu0 %v6238_v0  ;;  %6607 = vrcp.f32 %v6757_v14  ;;  %s8333_s27 = sld [smem:[#allocation21_spill]]  ;;  %vm1225_vm6 = vcmask 1043456   ;;  %vm1208_vm7 = vcmask 64512  }
  0x33   : > { %s4641_s0 = sshll.u32 %s846_s5, 3  ;;  %s6954_s28 = scalar_lea.vmem %s8328_s8, %s846_s5 }
  0x34   : > { %s848_s25 = scalar_lea.vmem %s8329_s30, %s4641_s0  ;;  %s852_s26 = scalar_lea.vmem %s8330_s2, %s4641_s0 }
  0x35   : > { %v857_v2 = vld [vmem:[%s848_s25] sm:$0xff]  ;;  %s8334_s1 = sld [smem:[#allocation25_spill]] }
  0x36   : > { %v858_v3 = vld [vmem:[%s852_s26] sm:$0xff]  ;;  %v860_v4 = vpack.c.bf16 %v857_v2, %v857_v2  ;;  %s8335_s3 = sld [smem:[#allocation23_spill]] }
  0x37   : > { %896 = vperm.xlu0 %6565, %v858_v3   ;;  %v6567_v5 = vld [vmem:[%s8331_s23] ss:$0 sm:$0xff]  ;;  %s8336_s14 = sld [smem:[#allocation29_spill]]  ;;  %s8191_s23 = sand.u32 1, %s6746_s4  }
  0x38   : > { %4647 = vmatmul.msk.bf16.vlgmr.msra.gmra.mxu0 %vm869_vm0, %v860_v4  ;;  %v892_v8 = vld [vmem:[%s8332_s7] sm:$0xff]  ;;  %v6246_v15 = vld [vmem:[%s8333_s27 + $0x38] sm:$0xff]  ;;  %v6245_v17 = vld [vmem:[%s8333_s27 + $0x30] sm:$0xff]  ;;  %v6608_v20 = vpop.eup %6607  ;;  %s8337_s15 = sld [smem:[#allocation30_spill]] }
  0x39   : > { %1006 = vmatpush.bf16.msra.mxu1 %v6246_v15  ;;  %v6244_v22 = vld [vmem:[%s8333_s27 + $0x28] sm:$0xff]  ;;  %v905_v24 = vmul.f32 128.0, %v6608_v20  ;;  %v6243_v26 = vld [vmem:[%s8333_s27 + $0x20] sm:$0xff]  ;;  %v6242_v30 = vld [vmem:[%s8333_s27 + $0x18] sm:$0xff]  ;;  %vm909_vm1 = vweird.f32 %v6608_v20  ;;  %s8338_s10 = sld [smem:[#allocation24_spill]] }
  0x3a   : > { %v6241_v33 = vld [vmem:[%s8333_s27 + $0x10] sm:$0xff]  ;;  %v6240_v36 = vld [vmem:[%s8333_s27 + $0x8] sm:$0xff]  ;;  %v6239_v43 = vld [vmem:[%s8333_s27] sm:$0xff]  ;;  %s8339_s8 = sld [smem:[#allocation26_spill]] }
  0x3b   : > { %v6262_v16 = vld [vmem:[%s8334_s1 + $0x38] sm:$0xff]  ;;  %v6261_v18 = vld [vmem:[%s8334_s1 + $0x30] sm:$0xff]  ;;  %v6260_v23 = vld [vmem:[%s8334_s1 + $0x28] sm:$0xff]  ;;  %v906_v28 = vsub.f32 1.0, %v905_v24  ;;  %s8341_s26 = sld [smem:[#allocation22_spill]] }
  0x3c   : > { %1168 = vmatpush.bf16.msra.mxu3 %v6262_v16  ;;  %v6254_v19 = vld [vmem:[%s8335_s3 + $0x38] sm:$0xff]  ;;  %v6253_v21 = vld [vmem:[%s8335_s3 + $0x30] sm:$0xff]  ;;  %v6252_v25 = vld [vmem:[%s8335_s3 + $0x28] sm:$0xff]  ;;  %s8342_s12 = sld [smem:[#allocation27_spill]] }
  0x3d   : > { %1087 = vmatpush.bf16.msra.mxu2 %v6254_v19  ;;  %1007 = vmatpush.bf16.msra.mxu1 %v6245_v17  ;;  %v6259_v27 = vld [vmem:[%s8334_s1 + $0x20] sm:$0xff]  ;;  %v6258_v31 = vld [vmem:[%s8334_s1 + $0x18] sm:$0xff]  ;;  %v907_v32 = vmul.f32 %v6608_v20, %v906_v28  ;;  %v6257_v34 = vld [vmem:[%s8334_s1 + $0x10] sm:$0xff]  ;;  %s8343_s13 = sld [smem:[#allocation28_spill]] }
  0x3e   : > { %v6251_v29 = vld [vmem:[%s8335_s3 + $0x20] sm:$0xff]  ;;  %v6256_v37 = vld [vmem:[%s8334_s1 + $0x8] sm:$0xff]  ;;  %v6272_v45 = vld [vmem:[%s8333_s27 + $0x78] sm:$0xff]  ;;  %s8344_s16 = sld [smem:[#allocation31_spill]] }
  0x3f   : > { %v908_v35 = vadd.f32 %v6608_v20, %v907_v32  ;;  %v6255_v44 = vld [vmem:[%s8334_s1] sm:$0xff]  ;;  %v6250_v46 = vld [vmem:[%s8335_s3 + $0x18] sm:$0xff]  ;;  %v6271_v48 = vld [vmem:[%s8333_s27 + $0x70] sm:$0xff]  ;;  %s8345_s5 = sld [smem:[#allocation32_spill]] }
  0x40   : > { %1169 = vmatpush.bf16.msra.mxu3 %v6261_v18  ;;  %v6288_v47 = vld [vmem:[%s8334_s1 + $0x78] sm:$0xff]  ;;  %v6249_v49 = vld [vmem:[%s8335_s3 + $0x10] sm:$0xff]  ;;  %v6270_v51 = vld [vmem:[%s8333_s27 + $0x68] sm:$0xff]  ;;  %s8340_s29 = smov %s8339_s8  ;;  %s8346_s2 = sld [smem:[#allocation33_spill]] }
  0x41   : > { %1088 = vmatpush.bf16.msra.mxu2 %v6253_v21  ;;  %1008 = vmatpush.bf16.msra.mxu1 %v6244_v22  ;;  %v7025_v38 = vsel %vm909_vm1, %v6608_v20, %v908_v35  ;;  %v6287_v50 = vld [vmem:[%s8334_s1 + $0x70] sm:$0xff]  ;;  %v6248_v52 = vld [vmem:[%s8335_s3 + $0x8] sm:$0xff]  ;;  %v6269_v54 = vld [vmem:[%s8333_s27 + $0x60] sm:$0xff]  ;;  %s8348_s30 = sld [smem:[#allocation35_spill]] }
  0x42   : > { %v6286_v53 = vld [vmem:[%s8334_s1 + $0x68] sm:$0xff]  ;;  %v6247_v55 = vld [vmem:[%s8335_s3] sm:$0xff]  ;;  %v6280_v57 = vld [vmem:[%s8335_s3 + $0x78] sm:$0xff] }
  0x43   : > { %v6285_v56 = vld [vmem:[%s8334_s1 + $0x60] sm:$0xff]  ;;  %v6268_v58 = vld [vmem:[%s8333_s27 + $0x58] sm:$0xff]  ;;  %v6279_v60 = vld [vmem:[%s8335_s3 + $0x70] sm:$0xff] }
  0x44   : > { %1170 = vmatpush.bf16.msra.mxu3 %v6260_v23  ;;  %v6284_v59 = vld [vmem:[%s8334_s1 + $0x58] sm:$0xff]  ;;  %v6267_v61 = vld [vmem:[%s8333_s27 + $0x50] sm:$0xff]  ;;  %v6278_v63 = vld [vmem:[%s8335_s3 + $0x68] sm:$0xff] }
  0x45   : > { %1089 = vmatpush.bf16.msra.mxu2 %v6252_v25  ;;  %1009 = vmatpush.bf16.msra.mxu1 %v6243_v26  ;;  %v6283_v62 = vld [vmem:[%s8334_s1 + $0x50] sm:$0xff]  ;;  %v6266_v0 = vld [vmem:[%s8333_s27 + $0x48] sm:$0xff]  ;;  %v6277_v2 = vld [vmem:[%s8335_s3 + $0x60] sm:$0xff] }
  0x46   : > { %v6282_v1 = vld [vmem:[%s8334_s1 + $0x48] sm:$0xff]  ;;  %v6265_v3 = vld [vmem:[%s8333_s27 + $0x40] sm:$0xff]  ;;  %v6314_v25 = vld [vmem:[%s8334_s1 + $0xb8] sm:$0xff] }
  0x47   : > { %v6281_v4 = vld [vmem:[%s8334_s1 + $0x40] sm:$0xff]  ;;  %v6313_v28 = vld [vmem:[%s8334_s1 + $0xb0] sm:$0xff]  ;;  %v6294_v35 = vld [vmem:[%s8333_s27 + $0x98] sm:$0xff]  ;;  %s8349_s6 = smov %s8348_s30 }
  0x48   : > { %1171 = vmatpush.bf16.msra.mxu3 %v6259_v27  ;;  %v6568_v19 = vld [vmem:[%s8336_s14] ss:$0 sm:$0xff]  ;;  %v6298_v27 = vld [vmem:[%s8333_s27 + $0xb8] sm:$0xff]  ;;  %s6680_s9 = scalar_lea.hbm %s8349_s6, 16 }
  0x49   : > { %1090 = vmatpush.bf16.msra.mxu2 %v6251_v29  ;;  %1010 = vmatpush.bf16.msra.mxu1 %v6242_v30  ;;  %v6569_v21 = vld [vmem:[%s8337_s15] ss:$0 sm:$0xff]  ;;  %v6297_v29 = vld [vmem:[%s8333_s27 + $0xb0] sm:$0xff]  ;;  %v6312_v30 = vld [vmem:[%s8334_s1 + $0xa8] sm:$0xff] }
  0x4a   : > { %v6311_v32 = vld [vmem:[%s8334_s1 + $0xa0] sm:$0xff] }
  0x4c   : > { %1172 = vmatpush.bf16.msra.mxu3 %v6258_v31  ;;  %v6296_v31 = vld [vmem:[%s8333_s27 + $0xa8] sm:$0xff] }
  0x4d   : > { %1011 = vmatpush.bf16.msra.mxu1 %v6241_v33  ;;  %1091 = vmatpush.bf16.msra.mxu2 %v6250_v46  ;;  %v6295_v33 = vld [vmem:[%s8333_s27 + $0xa0] sm:$0xff] }
  0x4e   : > { %v6329_v46 = vld [vmem:[%s8335_s3 + $0xe0] sm:$0xff] }
  0x50   : > { %1173 = vmatpush.bf16.msra.mxu3 %v6257_v34  ;;  %v6310_v34 = vld [vmem:[%s8334_s1 + $0x98] sm:$0xff] }
  0x51   : > { %1012 = vmatpush.bf16.msra.mxu1 %v6240_v36  ;;  %1092 = vmatpush.bf16.msra.mxu2 %v6249_v49  ;;  %v6309_v36 = vld [vmem:[%s8334_s1 + $0x90] sm:$0xff]  ;;  %v6326_v49 = vld [vmem:[%s8335_s3 + $0xc8] sm:$0xff] }
  0x54   : > { %1174 = vmatpush.bf16.msra.mxu3 %v6256_v37  ;;  %v6293_v37 = vld [vmem:[%s8333_s27 + $0x90] sm:$0xff] }
  0x55   : > { %1013 = vmatpush.bf16.msra.mxu1 %v6239_v43  ;;  %1093 = vmatpush.bf16.msra.mxu2 %v6248_v52  ;;  %v6332_v43 = vld [vmem:[%s8335_s3 + $0xf8] sm:$0xff]  ;;  %v6571_v52 = vld [vmem:[%s8338_s10] ss:$0 sm:$0xff] }
  0x58   : > { %1175 = vmatpush.bf16.msra.mxu3 %v6255_v44  ;;  %v6331_v44 = vld [vmem:[%s8335_s3 + $0xf0] sm:$0xff] }
  0x59   : > { %1317 = vmatpush.bf16.msrb.mxu1 %v6272_v45  ;;  %1094 = vmatpush.bf16.msra.mxu2 %v6247_v55  ;;  %v6330_v45 = vld [vmem:[%s8335_s3 + $0xe8] sm:$0xff] }
  0x5c   : > { %1483 = vmatpush.bf16.msrb.mxu3 %v6288_v47  ;;  %v6328_v47 = vld [vmem:[%s8335_s3 + $0xd8] sm:$0xff] }
  0x5d   : > { %1318 = vmatpush.bf16.msrb.mxu1 %v6271_v48  ;;  %1400 = vmatpush.bf16.msrb.mxu2 %v6280_v57  ;;  %v6327_v48 = vld [vmem:[%s8335_s3 + $0xd0] sm:$0xff] }
  0x60   : > { %1484 = vmatpush.bf16.msrb.mxu3 %v6287_v50  ;;  %v6325_v50 = vld [vmem:[%s8335_s3 + $0xc0] sm:$0xff] }
  0x61   : > { %1319 = vmatpush.bf16.msrb.mxu1 %v6270_v51  ;;  %1401 = vmatpush.bf16.msrb.mxu2 %v6279_v60 }
  0x64   : > { %1485 = vmatpush.bf16.msrb.mxu3 %v6286_v53  ;;  %v6572_v53 = vld [vmem:[%s8339_s8] ss:$0 sm:$0xff]  ;;  %s4639_s8 = sshll.u32 %s8191_s23, 3 }
  0x65   : > { %1320 = vmatpush.bf16.msrb.mxu1 %v6269_v54  ;;  %1402 = vmatpush.bf16.msrb.mxu2 %v6278_v63  ;;  %s837_s7 = scalar_lea.vmem [#allocation2], %s4639_s8 }
  0x68   : > { %1486 = vmatpush.bf16.msrb.mxu3 %v6285_v56 }
  0x69   : > { %1321 = vmatpush.bf16.msrb.mxu1 %v6268_v58  ;;  %1403 = vmatpush.bf16.msrb.mxu2 %v6277_v2 }
  0x6c   : > { %1487 = vmatpush.bf16.msrb.mxu3 %v6284_v59  ;;  %v6570_v59 = vld [vmem:[%s8341_s26] ss:$0 sm:$0xff] }
  0x6d   : > { %1322 = vmatpush.bf16.msrb.mxu1 %v6267_v61 }
  0x70   : > { %1488 = vmatpush.bf16.msrb.mxu3 %v6283_v62 }
  0x71   : > { %1323 = vmatpush.bf16.msrb.mxu1 %v6266_v0 }
  0x74   : > { %1489 = vmatpush.bf16.msrb.mxu3 %v6282_v1 }
  0x75   : > { %1324 = vmatpush.bf16.msrb.mxu1 %v6265_v3 }
  0x78   : > { %1490 = vmatpush.bf16.msrb.mxu3 %v6281_v4 }
  0xa9   : > { %v897_v10 = vpop.permute.xlu0 %896 }
  0xb5   : > { %v882_v6 = vpop.f32.mrf.mxu0 }
  0xb6   : > { %v886_v7 = vmul.f32 11.313708, %v882_v6 }
  0xb8   : > { %v891_v9 = vadd.f32 %v6567_v5, %v886_v7  ;;  %v6276_v5 = vld [vmem:[%s8335_s3 + $0x58] sm:$0xff] }
  0xb9   : > { %1404 = vmatpush.bf16.msrb.mxu2 %v6276_v5  ;;  %v6574_v5 = vld [vmem:[%s8338_s10 + $0x1] ss:$0 sm:$0xff] }
  0xba   : > { %v893_v11 = vadd.f32 %v892_v8, %v891_v9  ;;  %v6275_v9 = vld [vmem:[%s8335_s3 + $0x50] sm:$0xff] }
  0xbc   : > { %v6968_v12 = vmul.f32 %v897_v10, %v893_v11  ;;  %v6274_v10 = vld [vmem:[%s8335_s3 + $0x48] sm:$0xff] }
  0xbd   : > { %v884_v13 = vpop.f32.mrf.mxu0  ;;  %1405 = vmatpush.bf16.msrb.mxu2 %v6275_v9 }
  0xbe   : > { %902 = vadd.xlane.f32.xlu0 %v6968_v12  ;;  %v6273_v13 = vld [vmem:[%s8335_s3 + $0x40] sm:$0xff] }
  0xc1   : > { %1406 = vmatpush.bf16.msrb.mxu2 %v6274_v10 }
  0xc5   : > { %1407 = vmatpush.bf16.msrb.mxu2 %v6273_v13  ;;  %v6316_v13 = vld [vmem:[%s8342_s12 + $0x28] sm:$0xff] }
 0x131   : > { %v903_v39 = vpop.xlane.xlu0 %902 }
 0x132   : > { %v911_v40 = vmul.f32 %v7025_v38, %v903_v39  ;;  %v6308_v39 = vld [vmem:[%s8334_s1 + $0x88] sm:$0xff] }
 0x134   : > { %v7029_v41 = vsub.f32 %v6968_v12, %v911_v40  ;;  %v6292_v40 = vld [vmem:[%s8333_s27 + $0x88] sm:$0xff] }
 0x136   : > { %v913_v42 = vmul.f32 %v7029_v41, %v7029_v41 }
 0x138   : > { %914 = vadd.xlane.f32.xlu1 %v913_v42  ;;  %v6291_v42 = vld [vmem:[%s8333_s27 + $0x80] sm:$0xff] }
 0x1ab   : > { %v915_v6 = vpop.xlane.xlu1 %914 }
 0x1ac   : > { %v916_v7 = vmul.f32 %v915_v6, %v7025_v38 }
 0x1ae   : > { %v917_v8 = vadd.f32 1e-05, %v916_v7 }
 0x1b0   : > { %6609 = vrsqrt.f32 %v917_v8  ;;  %vm924_vm3 = vweird.f32 %v917_v8 }
 0x1b6   : > { %v6610_v11 = vpop.eup %6609 }
 0x1b7   : > { %v919_v14 = vmul.f32 %v6610_v11, %v917_v8  ;;  %vm925_vm2 = vweird.f32 %v6610_v11 }
 0x1b8   : > { %vm926_vm4 = vmor %vm924_vm3, %vm925_vm2 }
 0x1b9   : > { %v920_v15 = vmul.f32 %v6610_v11, %v919_v14 }
 0x1bb   : > { %v921_v16 = vmul.f32 0.5, %v920_v15 }
 0x1bd   : > { %v922_v17 = vsub.f32 1.5, %v921_v16 }
 0x1bf   : > { %v923_v18 = vmul.f32 %v6610_v11, %v922_v17  ;;  %v6315_v17 = vld [vmem:[%s8342_s12 + $0x20] sm:$0xff] }
 0x1c1   : > { %v927_v20 = vsel %vm926_vm4, %v6610_v11, %v923_v18 }
 0x1c2   : > { %v928_v22 = vmul.f32 %v927_v20, %v7029_v41  ;;  %v6307_v41 = vld [vmem:[%s8334_s1 + $0x80] sm:$0xff] }
 0x1c4   : > { %v932_v23 = vmul.f32 %v6568_v19, %v928_v22 }
 0x1c6   : > { %v936_v24 = vadd.f32 %v6569_v21, %v932_v23  ;;  %v6578_v21 = vld [vmem:[%s8338_s10 + $0x3] ss:$0 sm:$0xff] }
 0x1c8   : > { %v7134_v26 = vpack.c.bf16 %v936_v24, %v936_v24 }
 0x1ca   : > { %1014 = vmatmul.bf16.vlgmr.msra.gmra.mxu1 %v7134_v26  ;;  %1095 = vmatmul.bf16.vlgmr.msra.gmra.mxu2 %v7134_v26 }
 0x1cb   : > { %1176 = vmatmul.bf16.vlgmr.msra.gmra.mxu3 %v7134_v26  ;;  %1849 = vmatpush.bf16.msra.mxu1 %v6314_v25 }
 0x1cc   : > { %1683 = vmatpush.bf16.msra.mxu3 %v6298_v27 }
 0x1cf   : > { %1850 = vmatpush.bf16.msra.mxu1 %v6313_v28  ;;  %v7245_v28 = vld [vmem:[%s6954_s28] ss:$0 sm:$0xff] }
 0x1d0   : > { %1684 = vmatpush.bf16.msra.mxu3 %v6297_v29 }
 0x1d3   : > { %1851 = vmatpush.bf16.msra.mxu1 %v6312_v30 }
 0x1d4   : > { %1685 = vmatpush.bf16.msra.mxu3 %v6296_v31 }
 0x1d7   : > { %1852 = vmatpush.bf16.msra.mxu1 %v6311_v32 }
 0x1d8   : > { %1686 = vmatpush.bf16.msra.mxu3 %v6295_v33 }
 0x1da   : > { %1325 = vmatmul.bf16.vlgmr.msrb.gmra.mxu1 %v7134_v26  ;;  %1408 = vmatmul.bf16.vlgmr.msrb.gmra.mxu2 %v7134_v26 }
 0x1db   : > { %1491 = vmatmul.bf16.vlgmr.msrb.gmra.mxu3 %v7134_v26  ;;  %1853 = vmatpush.bf16.msra.mxu1 %v6310_v34 }
 0x1dc   : > { %1687 = vmatpush.bf16.msra.mxu3 %v6294_v35 }
 0x1df   : > { %1854 = vmatpush.bf16.msra.mxu1 %v6309_v36 }
 0x1e0   : > { %1688 = vmatpush.bf16.msra.mxu3 %v6293_v37 }
 0x1e3   : > { %1855 = vmatpush.bf16.msra.mxu1 %v6308_v39 }
 0x1e4   : > { %1689 = vmatpush.bf16.msra.mxu3 %v6292_v40  ;;  %v6575_v40 = vld [vmem:[%s8340_s29 + $0x1] ss:$0 sm:$0xff] }
 0x1e7   : > { %1856 = vmatpush.bf16.msra.mxu1 %v6307_v41 }
 0x1e8   : > { %1690 = vmatpush.bf16.msra.mxu3 %v6291_v42 }
 0x1ea   : > { %1857 = vmatmul.bf16.vlgmr.msra.gmra.mxu1 %v7134_v26 }
 0x1eb   : > { %2105 = vmatpush.bf16.msrb.mxu1 %v6332_v43  ;;  %1691 = vmatmul.bf16.vlgmr.msra.gmra.mxu3 %v7134_v26 }
 0x1ec   : > { %1944 = vmatpush.bf16.msrb.mxu3 %v6316_v13  ;;  %v6290_v13 = vld [vmem:[%s8342_s12 + $0x18] sm:$0xff] }
 0x1ed   : > { %1578 = vmatpush.bf16.msra.mxu2 %v6290_v13  ;;  %v6580_v13 = vld [vmem:[%s8341_s26 + $0x3] ss:$0 sm:$0xff] }
 0x1ef   : > { %2106 = vmatpush.bf16.msrb.mxu1 %v6331_v44 }
 0x1f0   : > { %1945 = vmatpush.bf16.msrb.mxu3 %v6315_v17  ;;  %v6321_v17 = vld [vmem:[%s8333_s27 + $0xe0] sm:$0xff] }
 0x1f3   : > { %2107 = vmatpush.bf16.msrb.mxu1 %v6330_v45 }
 0x1f7   : > { %2108 = vmatpush.bf16.msrb.mxu1 %v6329_v46 }
 0x1fb   : > { %2109 = vmatpush.bf16.msrb.mxu1 %v6328_v47 }
 0x1ff   : > { %2110 = vmatpush.bf16.msrb.mxu1 %v6327_v48  ;;  %v6573_v48 = vld [vmem:[%s8341_s26 + $0x1] ss:$0 sm:$0xff] }
 0x203   : > { %2111 = vmatpush.bf16.msrb.mxu1 %v6326_v49 }
 0x207   : > { %2112 = vmatpush.bf16.msrb.mxu1 %v6325_v50 }
 0x20a   : > { %2113 = vmatmul.bf16.vlgmr.msrb.gmra.mxu1 %v7134_v26 }
 0x247   : > { %v1015_v51 = vpop.f32.mrf.mxu1 }
 0x248   : > { %v1016_v0 = vadd.f32 %v6570_v59, %v1015_v51  ;;  %v6305_v59 = vld [vmem:[%s8335_s3 + $0xb0] sm:$0xff] }
 0x24a   : > { %v1181_v4 = vpack.c.bf16 %v1016_v0, %v1016_v0 }
 0x24d   : > { %v1096_v54 = vpop.f32.mrf.mxu2 }
 0x24e   : > { %v1097_v55 = vadd.f32 %v6571_v52, %v1096_v54  ;;  %v1177_v56 = vpop.f32.mrf.mxu3 }
 0x24f   : > { %v1178_v57 = vadd.f32 %v6572_v53, %v1177_v56  ;;  %v1017_v58 = vpop.f32.mrf.mxu1 }
 0x250   : > { %v1182_v60 = vpack.c.bf16 %v1097_v55, %v1097_v55  ;;  %v6306_v58 = vld [vmem:[%s8335_s3 + $0xb8] sm:$0xff] }
 0x251   : > { %v1221_v61 = vpack.c.bf16 %v1178_v57, %v1178_v57 }
 0x252   : > { %v1188_v62 = vsel %vm1183_vm5, %v1182_v60, 0  ;;  %v6304_v60 = vld [vmem:[%s8335_s3 + $0xa8] sm:$0xff] }
 0x253   : > { %v1227_v63 = vsel %vm1225_vm6, %v1221_v61, 0  ;;  %1197 = vmatpush.bf16.xpose.msrb.mxu0 %v1188_v62  ;;  %v6303_v61 = vld [vmem:[%s8335_s3 + $0xa0] sm:$0xff]  ;;  %v6302_v62 = vld [vmem:[%s8335_s3 + $0x98] sm:$0xff] }
 0x255   : > { %v1098_v1 = vpop.f32.mrf.mxu2 }
 0x256   : > { %v1179_v2 = vpop.f32.mrf.mxu3 }
 0x257   : > { %v1326_v3 = vpop.f32.mrf.mxu1 }
 0x258   : > { %v1327_v49 = vadd.f32 %v6573_v48, %v1326_v3 }
 0x25a   : > { %4744 = vmatmul.msk.bf16.vlgmr.msrb.gmra.mxu0 %vm1183_vm5, %v1181_v4  ;;  %v1496_v50 = vpack.c.bf16 %v1327_v49, %v1327_v49  ;;  %v6301_v4 = vld [vmem:[%s8335_s3 + $0x90] sm:$0xff] }
 0x25b   : > { %1236 = vmatpush.bf16.msra.mxu0 %v1227_v63 }
 0x25d   : > { %v1409_v6 = vpop.f32.mrf.mxu2 }
 0x25e   : > { %v1410_v7 = vadd.f32 %v6574_v5, %v1409_v6  ;;  %v1492_v8 = vpop.f32.mrf.mxu3  ;;  %v6300_v5 = vld [vmem:[%s8335_s3 + $0x88] sm:$0xff]  ;;  %v6299_v6 = vld [vmem:[%s8335_s3 + $0x80] sm:$0xff] }
 0x25f   : > { %v1328_v9 = vpop.f32.mrf.mxu1  ;;  %v1493_v42 = vadd.f32 %v6575_v40, %v1492_v8 }
 0x260   : > { %v1497_v10 = vpack.c.bf16 %v1410_v7, %v1410_v7 }
 0x261   : > { %v1531_v44 = vpack.c.bf16 %v1493_v42, %v1493_v42 }
 0x262   : > { %v1502_v11 = vsel %vm1183_vm5, %v1497_v10, 0  ;;  %v6324_v10 = vld [vmem:[%s8333_s27 + $0xf8] sm:$0xff] }
 0x263   : > { %1511 = vmatpush.bf16.xpose.msrb.mxu0 %v1502_v11  ;;  %v1536_v47 = vsel %vm1225_vm6, %v1531_v44, 0 }
 0x265   : > { %v1411_v14 = vpop.f32.mrf.mxu2 }
 0x266   : > { %v1494_v15 = vpop.f32.mrf.mxu3  ;;  %v6323_v14 = vld [vmem:[%s8333_s27 + $0xf0] sm:$0xff] }
 0x267   : > { %v7233_v16 = vpop.f32.mrf.mxu1  ;;  %v6322_v15 = vld [vmem:[%s8333_s27 + $0xe8] sm:$0xff] }
 0x26e   : > { %v7238_v18 = vpop.f32.mrf.mxu3 }
 0x26f   : > { %v1860_v19 = vpop.f32.mrf.mxu1 }
 0x270   : > { %v6320_v19 = vld [vmem:[%s8333_s27 + $0xd8] sm:$0xff] }
 0x276   : > { %v1694_v20 = vpop.f32.mrf.mxu3 }
 0x277   : > { %v6319_v20 = vld [vmem:[%s8333_s27 + $0xd0] sm:$0xff] }
 0x287   : > { %v2114_v22 = vpop.f32.mrf.mxu1 }
 0x288   : > { %v2115_v23 = vadd.f32 %v6578_v21, %v2114_v22  ;;  %v6318_v21 = vld [vmem:[%s8333_s27 + $0xc8] sm:$0xff]  ;;  %v6317_v22 = vld [vmem:[%s8333_s27 + $0xc0] sm:$0xff] }
 0x28a   : > { %v2202_v24 = vpack.c.bf16 %v2115_v23, %v2115_v23  ;;  %v6289_v23 = vld [vmem:[%s8342_s12 + $0x10] sm:$0xff] }
 0x28b   : > { %1579 = vmatpush.bf16.msra.mxu2 %v6289_v23 }
 0x28c   : > { %v2207_v25 = vsel %vm1183_vm5, %v2202_v24, 0  ;;  %v6264_v24 = vld [vmem:[%s8342_s12 + $0x8] sm:$0xff] }
 0x28d   : > { %2216 = vmatpush.bf16.xpose.msra.mxu3 %v2207_v25  ;;  %v6263_v25 = vld [vmem:[%s8342_s12] sm:$0xff] }
 0x28f   : > { %v2116_v27 = vpop.f32.mrf.mxu1  ;;  %1606 = vmatpush.bf16.msrb.mxu2 %v6264_v24 }
 0x293   : > { %1607 = vmatpush.bf16.msrb.mxu2 %v6263_v25 }
 0x2d7   : > { %v1199_v29 = vpop.f32.mrf.mxu0 }
 0x2d8   : > { %v1203_v30 = vmul.f32 0.17677669, %v1199_v29 }
 0x2da   : > { %v1207_v31 = vadd.f32 %v7245_v28, %v1203_v30 }
 0x2dc   : > { %v1209_v32 = vsel %vm1208_vm7, %v1207_v31, -inf }
 0x2dd   : > { %1210 = vmax.xlane.f32.xlu1 %v1209_v32  ;;  %v6579_v32 = vld [vmem:[%s8338_s10 + $0x2] ss:$0 sm:$0xff] }
 0x2df   : > { %v1201_v33 = vpop.f32.mrf.mxu0 }
 0x350   : > { %v1211_v34 = vpop.xlane.xlu1 %1210 }
 0x351   : > { %v1212_v35 = vsub.f32 %v1207_v31, %v1211_v34  ;;  %v6576_v31 = vld [vmem:[%s8340_s29 + $0x2] ss:$0 sm:$0xff] }
 0x352   : > { %v1859_v33 = vadd.f32 %v6576_v31, %v7233_v16  ;;  %v6577_v16 = vld [vmem:[%s8341_s26 + $0x2] ss:$0 sm:$0xff] }
 0x353   : > { %v1213_v36 = vmul.f32 1.442695, %v1212_v35 }
 0x355   : > { %6611 = vpow2.f32 %v1213_v36 }
 0x35b   : > { %v6612_v37 = vpop.eup %6611 }
 0x35c   : > { %v1215_v39 = vsel %vm1208_vm7, %v6612_v37, 0.0 }
 0x35d   : > { %1216 = vadd.xlane.f32.xlu2 %v1215_v39 }
 0x3d0   : > { %v1217_v41 = vpop.xlane.xlu2 %1216 }
 0x3d1   : > { %6613 = vrcp.f32 %v1217_v41 }
 0x3d7   : > { %v6614_v43 = vpop.eup %6613 }
 0x3d8   : > { %v1219_v45 = vmul.f32 %v6614_v43, %v6612_v37  ;;  %v1897_v37 = vpack.c.bf16 %v1859_v33, %v1859_v33  ;;  %v1693_v43 = vadd.f32 %v6577_v16, %v7238_v18  ;;  %v6340_v18 = vld [vmem:[%s8334_s1 + $0xf8] sm:$0xff]  ;;  %v6341_v16 = vld [vmem:[%s8342_s12 + $0x30] sm:$0xff] }
 0x3da   : > { %v1220_v46 = vpack.c.bf16 %v1219_v45, %v1219_v45  ;;  %v1902_v41 = vsel %vm1225_vm6, %v1897_v37, 0  ;;  %v1862_v45 = vpack.c.bf16 %v1693_v43, %v1693_v43 }
 0x3dc   : > { %4745 = vmatmul.msk.bf16.vlgmr.msra.gmra.mxu0 %vm1208_vm7, %v1220_v46 }
 0x3dd   : > { %1545 = vmatpush.bf16.msra.mxu0 %v1536_v47 }
 0x3ec   : > { %4893 = vmatmul.msk.bf16.vlgmr.msrb.gmra.mxu0 %vm1183_vm5, %v1496_v50 }
 0x3ed   : > { %1766 = vmatpush.bf16.msrb.mxu0 %v6306_v58 }
 0x3f1   : > { %1767 = vmatpush.bf16.msrb.mxu0 %v6305_v59 }
 0x3f5   : > { %1768 = vmatpush.bf16.msrb.mxu0 %v6304_v60 }
 0x3f9   : > { %1769 = vmatpush.bf16.msrb.mxu0 %v6303_v61 }
 0x3fd   : > { %1770 = vmatpush.bf16.msrb.mxu0 %v6302_v62  ;;  %v6339_v62 = vld [vmem:[%s8334_s1 + $0xf0] sm:$0xff] }
 0x401   : > { %1771 = vmatpush.bf16.msrb.mxu0 %v6301_v4  ;;  %v6333_v4 = vld [vmem:[%s8334_s1 + $0xc0] sm:$0xff] }
 0x405   : > { %1772 = vmatpush.bf16.msrb.mxu0 %v6300_v5 }
 0x409   : > { %1773 = vmatpush.bf16.msrb.mxu0 %v6299_v6 }
 0x459   : > { %v7259_v51 = vpop.f32.mrf.mxu0 }
 0x45a   : > { %v1242_v35 = vpack.c.bf16 %v7259_v51, %v7259_v51 }
 0x461   : > { %v1240_v52 = vpop.f32.mrf.mxu0 }
 0x469   : > { %v1513_v53 = vpop.f32.mrf.mxu0 }
 0x46a   : > { %v1517_v54 = vmul.f32 0.17677669, %v1513_v53 }
 0x46c   : > { %v1518_v55 = vadd.f32 %v7245_v28, %v1517_v54 }
 0x46e   : > { %v1519_v56 = vsel %vm1208_vm7, %v1518_v55, -inf }
 0x46f   : > { %1520 = vmax.xlane.f32.xlu2 %v1519_v56 }
 0x471   : > { %v1515_v57 = vpop.f32.mrf.mxu0 }
 0x4e2   : > { %v1521_v63 = vpop.xlane.xlu2 %1520 }
 0x4e3   : > { %v1522_v0 = vsub.f32 %v1518_v55, %v1521_v63  ;;  %v6338_v63 = vld [vmem:[%s8334_s1 + $0xe8] sm:$0xff] }
 0x4e5   : > { %v1523_v1 = vmul.f32 1.442695, %v1522_v0  ;;  %v6337_v0 = vld [vmem:[%s8334_s1 + $0xe0] sm:$0xff] }
 0x4e7   : > { %6615 = vpow2.f32 %v1523_v1  ;;  %v6336_v1 = vld [vmem:[%s8334_s1 + $0xd8] sm:$0xff] }
 0x4ed   : > { %v6616_v2 = vpop.eup %6615 }
 0x4ee   : > { %v1525_v3 = vsel %vm1208_vm7, %v6616_v2, 0.0 }
 0x4ef   : > { %1526 = vadd.xlane.f32.xlu1 %v1525_v3  ;;  %v6334_v3 = vld [vmem:[%s8334_s1 + $0xc8] sm:$0xff] }
 0x562   : > { %v1527_v7 = vpop.xlane.xlu1 %1526 }
 0x563   : > { %6617 = vrcp.f32 %v1527_v7 }
 0x569   : > { %v6618_v8 = vpop.eup %6617 }
 0x56a   : > { %v1529_v9 = vmul.f32 %v6618_v8, %v6616_v2  ;;  %v6335_v2 = vld [vmem:[%s8334_s1 + $0xd0] sm:$0xff] }
 0x56c   : > { %v1530_v11 = vpack.c.bf16 %v1529_v9, %v1529_v9 }
 0x56e   : > { %4894 = vmatmul.msk.bf16.vlgmr.msra.gmra.mxu0 %vm1208_vm7, %v1530_v11 }
 0x56f   : > { %2022 = vmatpush.bf16.msra.mxu0 %v6324_v10 }
 0x573   : > { %2023 = vmatpush.bf16.msra.mxu0 %v6323_v14 }
 0x577   : > { %2024 = vmatpush.bf16.msra.mxu0 %v6322_v15  ;;  %v6581_v15 = vld [vmem:[%s8340_s29 + $0x3] ss:$0 sm:$0xff] }
 0x57b   : > { %2025 = vmatpush.bf16.msra.mxu0 %v6321_v17 }
 0x57e   : > { %1774 = vmatmul.bf16.vlgmr.msrb.gmra.mxu0 %v7134_v26 }
 0x57f   : > { %2026 = vmatpush.bf16.msra.mxu0 %v6320_v19 }
 0x583   : > { %2027 = vmatpush.bf16.msra.mxu0 %v6319_v20 }
 0x587   : > { %2028 = vmatpush.bf16.msra.mxu0 %v6318_v21 }
 0x58b   : > { %2029 = vmatpush.bf16.msra.mxu0 %v6317_v22 }
 0x58e   : > { %2030 = vmatmul.bf16.vlgmr.msra.gmra.mxu0 %v7134_v26 }
 0x5eb   : > { %v1547_v27 = vpop.f32.mrf.mxu0 }
 0x5ec   : > { %v1551_v29 = vpack.c.bf16 %v1547_v27, %v1547_v27 }
 0x5ee   : > { %4907 = vmatmul.msk.bf16.vlgmr.msra.gmra.mxu2 %vm1183_vm5, %v1551_v29 }
 0x5f3   : > { %v1549_v30 = vpop.f32.mrf.mxu0 }
 0x5fb   : > { %v1775_v34 = vpop.f32.mrf.mxu0 }
 0x5fc   : > { %v1776_v36 = vadd.f32 %v6579_v32, %v1775_v34 }
 0x5fe   : > { %v1863_v39 = vpack.c.bf16 %v1776_v36, %v1776_v36  ;;  %4916 = vmatmul.msk.bf16.vlgmr.msrb.gmra.mxu2 %vm1183_vm5, %v1242_v35 }
 0x600   : > { %v1868_v40 = vsel %vm1183_vm5, %v1863_v39, 0  ;;  %v6342_v39 = vld [vmem:[%s8342_s12 + $0x38] sm:$0xff] }
 0x601   : > { %1877 = vmatpush.bf16.xpose.msra.mxu2 %v1868_v40  ;;  %2283 = vmatpush.bf16.msrb.mxu0 %v6342_v39  ;;  %v6343_v39 = vld [vmem:[%s8344_s16 + $0x4] sm:$0xf] }
 0x603   : > { %v1777_v42 = vpop.f32.mrf.mxu0 }
 0x605   : > { %2284 = vmatpush.bf16.msrb.mxu0 %v6341_v16 }
 0x609   : > { %1911 = vmatpush.bf16.msrb.mxu2 %v1902_v41 }
 0x60b   : > { %v2031_v44 = vpop.f32.mrf.mxu0 }
 0x60c   : > { %v2032_v14 = vadd.f32 %v6580_v13, %v2031_v44  ;;  %v5277_v13 = vld [vmem:[%s8344_s16 + $0x48] sm:$0xf0] }
 0x60e   : > { %5064 = vmatmul.msk.bf16.vlgmr.msra.gmra.mxu2 %vm1183_vm5, %v1862_v45  ;;  %v2201_v19 = vpack.c.bf16 %v2032_v14, %v2032_v14 }
 0x60f   : > { %2188 = vmatpush.bf16.msra.mxu2 %v6340_v18 }
 0x613   : > { %v2033_v46 = vpop.f32.mrf.mxu0  ;;  %2189 = vmatpush.bf16.msra.mxu2 %v6339_v62  ;;  %v6355_v62 = vld [vmem:[%s8344_s16 + $0x64] sm:$0xf] }
 0x617   : > { %2190 = vmatpush.bf16.msra.mxu2 %v6338_v63 }
 0x61b   : > { %2191 = vmatpush.bf16.msra.mxu2 %v6337_v0  ;;  %v5293_v0 = vld [vmem:[%s8344_s16 + $0x68] sm:$0xf0] }
 0x61f   : > { %2192 = vmatpush.bf16.msra.mxu2 %v6336_v1  ;;  %v5296_v1 = vor.u32 %v6355_v62, %v5293_v0  ;;  %v6372_v62 = vld [vmem:[%s8267_s18 + $0x68] sm:$0xff]  ;;  %v6371_v0 = vld [vmem:[%s8267_s18 + $0x60] sm:$0xff] }
 0x623   : > { %2193 = vmatpush.bf16.msra.mxu2 %v6335_v2  ;;  %v5283_v2 = vld [vmem:[%s8344_s16 + $0x50] sm:$0xf] }
 0x627   : > { %2194 = vmatpush.bf16.msra.mxu2 %v6334_v3  ;;  %v6354_v3 = vld [vmem:[%s8344_s16 + $0x54] sm:$0xf0] }
 0x62b   : > { %2195 = vmatpush.bf16.msra.mxu2 %v6333_v4  ;;  %v6353_v4 = vld [vmem:[%s8344_s16 + $0x54] sm:$0xf] }
 0x671   : > { %v1581_v47 = vpop.f32.mrf.mxu2 }
 0x679   : > { %v1583_v48 = vpop.f32.mrf.mxu2 }
 0x67a   : > { %v6582_v48 = vld [vmem:[%s8343_s13] ss:$0 sm:$0xff] }
 0x681   : > { %v1609_v49 = vpop.f32.mrf.mxu2 }
 0x682   : > { %v1610_v50 = vadd.f32 %v1609_v49, %v1581_v47 }
 0x689   : > { %v1611_v51 = vpop.f32.mrf.mxu2 }
 0x691   : > { %v1879_v52 = vpop.f32.mrf.mxu2 }
 0x692   : > { %v1883_v53 = vmul.f32 0.17677669, %v1879_v52  ;;  %v5299_v52 = vld [vmem:[%s8344_s16 + $0x70] sm:$0xf] }
 0x694   : > { %v1884_v54 = vadd.f32 %v7245_v28, %v1883_v53  ;;  %v6358_v53 = vld [vmem:[%s8344_s16 + $0x74] sm:$0xf0] }
 0x696   : > { %v1885_v55 = vsel %vm1208_vm7, %v1884_v54, -inf }
 0x697   : > { %1886 = vmax.xlane.f32.xlu2 %v1885_v55  ;;  %v5300_v55 = vor.u32 %v6358_v53, %v5299_v52  ;;  %v6583_v52 = vld [vmem:[%s8269_s20] ss:$0 sm:$0xff] }
 0x699   : > { %v1881_v56 = vpop.f32.mrf.mxu2  ;;  %2430 = vmatpush.bf16.msra.mxu1 %v5300_v55  ;;  %v6584_v55 = vld [vmem:[%s8270_s21] ss:$0 sm:$0xff] }
 0x70a   : > { %v1887_v57 = vpop.xlane.xlu2 %1886 }
 0x70b   : > { %v1888_v58 = vsub.f32 %v1884_v54, %v1887_v57  ;;  %v6357_v54 = vld [vmem:[%s8344_s16 + $0x74] sm:$0xf] }
 0x70d   : > { %v1889_v59 = vmul.f32 1.442695, %v1888_v58 }
 0x70f   : > { %6619 = vpow2.f32 %v1889_v59 }
 0x715   : > { %v6620_v60 = vpop.eup %6619 }
 0x716   : > { %v1891_v61 = vsel %vm1208_vm7, %v6620_v60, 0.0 }
 0x717   : > { %1892 = vadd.xlane.f32.xlu1 %v1891_v61  ;;  %v6356_v61 = vld [vmem:[%s8344_s16 + $0x64] sm:$0xf0] }
 0x78a   : > { %v1893_v5 = vpop.xlane.xlu1 %1892 }
 0x78b   : > { %6621 = vrcp.f32 %v1893_v5  ;;  %v5284_v5 = vor.u32 %v6354_v3, %v5283_v2  ;;  %v6370_v2 = vld [vmem:[%s8267_s18 + $0x58] sm:$0xff]  ;;  %v6360_v3 = vld [vmem:[%s8267_s18 + $0x8] sm:$0xff] }
 0x791   : > { %v6622_v6 = vpop.eup %6621 }
 0x792   : > { %v1895_v7 = vmul.f32 %v6622_v6, %v6620_v60  ;;  %v5291_v60 = vld [vmem:[%s8344_s16 + $0x60] sm:$0xf]  ;;  %v5285_v6 = vld [vmem:[%s8344_s16 + $0x58] sm:$0xf0] }
 0x793   : > { %v5292_v63 = vor.u32 %v6356_v61, %v5291_v60  ;;  %v6373_v60 = vld [vmem:[%s8267_s18 + $0x70] sm:$0xff]  ;;  %v6363_v61 = vld [vmem:[%s8267_s18 + $0x20] sm:$0xff] }
 0x794   : > { %v1896_v8 = vpack.c.bf16 %v1895_v7, %v1895_v7  ;;  %v5288_v7 = vor.u32 %v6353_v4, %v5285_v6  ;;  %v6369_v4 = vld [vmem:[%s8267_s18 + $0x50] sm:$0xff]  ;;  %v6368_v6 = vld [vmem:[%s8267_s18 + $0x48] sm:$0xff] }
 0x795   : > { %2431 = vmatpush.bf16.msra.mxu1 %v5292_v63  ;;  %v6362_v63 = vld [vmem:[%s8267_s18 + $0x18] sm:$0xff] }
 0x796   : > { %5065 = vmatmul.msk.bf16.vlgmr.msrb.gmra.mxu2 %vm1208_vm7, %v1896_v8  ;;  %v5275_v8 = vld [vmem:[%s8344_s16 + $0x40] sm:$0xf] }
 0x799   : > { %2432 = vmatpush.bf16.msra.mxu1 %v5284_v5  ;;  %v6359_v5 = vld [vmem:[%s8267_s18] sm:$0xff] }
 0x7a6   : > { %2196 = vmatmul.bf16.vlgmr.msra.gmra.mxu2 %v7134_v26 }
 0x819   : > { %v1913_v9 = vpop.f32.mrf.mxu2 }
 0x81a   : > { %v1917_v10 = vpack.c.bf16 %v1913_v9, %v1913_v9  ;;  %v6352_v9 = vld [vmem:[%s8344_s16 + $0x44] sm:$0xf0] }
 0x81c   : > { %5078 = vmatmul.msk.bf16.vlgmr.msrb.gmra.mxu3 %vm1183_vm5, %v1917_v10  ;;  %v6351_v10 = vld [vmem:[%s8344_s16 + $0x44] sm:$0xf] }
 0x81d   : > { %v5280_v14 = vor.u32 %v6351_v10, %v5277_v13 }
 0x821   : > { %v1915_v11 = vpop.f32.mrf.mxu2 }
 0x822   : > { %v5276_v11 = vor.u32 %v6352_v9, %v5275_v8  ;;  %v6367_v8 = vld [vmem:[%s8267_s18 + $0x40] sm:$0xff] }
 0x824   : > { %2433 = vmatpush.bf16.msra.mxu1 %v5276_v11 }
 0x829   : > { %v2197_v17 = vpop.f32.mrf.mxu2 }
 0x82a   : > { %v2198_v20 = vadd.f32 %v6581_v15, %v2197_v17  ;;  %v5267_v15 = vld [vmem:[%s8344_s16 + $0x30] sm:$0xf]  ;;  %v6350_v17 = vld [vmem:[%s8344_s16 + $0x34] sm:$0xf0] }
 0x82c   : > { %v2236_v21 = vpack.c.bf16 %v2198_v20, %v2198_v20  ;;  %5226 = vmatmul.msk.bf16.vlgmr.msra.gmra.mxu3 %vm1183_vm5, %v2201_v19  ;;  %v6349_v19 = vld [vmem:[%s8344_s16 + $0x34] sm:$0xf]  ;;  %v5268_v20 = vor.u32 %v6350_v17, %v5267_v15 }
 0x82e   : > { %v2241_v26 = vsel %vm1225_vm6, %v2236_v21, 0  ;;  %v5269_v21 = vld [vmem:[%s8344_s16 + $0x38] sm:$0xf0]  ;;  %2434 = vmatpush.bf16.msra.mxu1 %v5268_v20 }
 0x82f   : > { %2250 = vmatpush.bf16.msrb.mxu3 %v2241_v26  ;;  %v5272_v26 = vor.u32 %v6349_v19, %v5269_v21 }
 0x831   : > { %v2199_v22 = vpop.f32.mrf.mxu2 }
 0x832   : > { %v5259_v22 = vld [vmem:[%s8344_s16 + $0x20] sm:$0xf] }
 0x89f   : > { %v1947_v23 = vpop.f32.mrf.mxu3 }
 0x8a0   : > { %v1951_v24 = vadd.f32 %v1947_v23, %v1610_v50  ;;  %v6348_v23 = vld [vmem:[%s8344_s16 + $0x24] sm:$0xf0] }
 0x8a7   : > { %v1949_v25 = vpop.f32.mrf.mxu3 }
 0x8a8   : > { %v5260_v25 = vor.u32 %v6348_v23, %v5259_v22 }
 0x8aa   : > { %2435 = vmatpush.bf16.msra.mxu1 %v5260_v25 }
 0x8af   : > { %v2218_v27 = vpop.f32.mrf.mxu3 }
 0x8b0   : > { %v2222_v29 = vmul.f32 0.17677669, %v2218_v27  ;;  %v5261_v27 = vld [vmem:[%s8344_s16 + $0x28] sm:$0xf0] }
 0x8b2   : > { %v2223_v30 = vadd.f32 %v7245_v28, %v2222_v29 }
 0x8b4   : > { %v2224_v31 = vsel %vm1208_vm7, %v2223_v30, -inf }
 0x8b5   : > { %2225 = vmax.xlane.f32.xlu2 %v2224_v31  ;;  %v6346_v31 = vld [vmem:[%s8344_s16 + $0x14] sm:$0xf0] }
 0x8b7   : > { %v2220_v32 = vpop.f32.mrf.mxu3 }
 0x8b8   : > { %v6345_v32 = vld [vmem:[%s8344_s16 + $0x14] sm:$0xf] }
 0x928   : > { %v2226_v33 = vpop.xlane.xlu2 %2225 }
 0x929   : > { %v2227_v34 = vsub.f32 %v2223_v30, %v2226_v33  ;;  %v5251_v30 = vld [vmem:[%s8344_s16 + $0x10] sm:$0xf] }
 0x92a   : > { %v5252_v33 = vor.u32 %v6346_v31, %v5251_v30 }
 0x92b   : > { %v2228_v35 = vmul.f32 1.442695, %v2227_v34  ;;  %v5253_v34 = vld [vmem:[%s8344_s16 + $0x18] sm:$0xf0] }
 0x92c   : > { %2436 = vmatpush.bf16.msra.mxu1 %v5252_v33 }
 0x92d   : > { %6623 = vpow2.f32 %v2228_v35  ;;  %v5243_v35 = vld [vmem:[%s8344_s16] sm:$0xf] }
 0x933   : > { %v6624_v36 = vpop.eup %6623 }
 0x934   : > { %v2230_v37 = vsel %vm1208_vm7, %v6624_v36, 0.0 }
 0x935   : > { %2231 = vadd.xlane.f32.xlu1 %v2230_v37  ;;  %v5256_v37 = vor.u32 %v6345_v32, %v5253_v34 }
 0x9a8   : > { %v2232_v40 = vpop.xlane.xlu1 %2231 }
 0x9a9   : > { %6625 = vrcp.f32 %v2232_v40  ;;  %v5245_v40 = vld [vmem:[%s8344_s16 + $0x8] sm:$0xf0] }
 0x9af   : > { %v6626_v28 = vpop.eup %6625 }
 0x9b0   : > { %v2234_v41 = vmul.f32 %v6626_v28, %v6624_v36  ;;  %v6344_v36 = vld [vmem:[%s8344_s16 + $0x4] sm:$0xf0] }
 0x9b1   : > { %v5244_v28 = vor.u32 %v6344_v36, %v5243_v35 }
 0x9b2   : > { %v2235_v42 = vpack.c.bf16 %v2234_v41, %v2234_v41  ;;  %v5248_v41 = vor.u32 %v6343_v39, %v5245_v40 }
 0x9b3   : > { %2437 = vmatpush.bf16.msra.mxu1 %v5244_v28 }
 0x9b4   : > { %5227 = vmatmul.msk.bf16.vlgmr.msrb.gmra.mxu3 %vm1208_vm7, %v2235_v42  ;;  %v6366_v42 = vld [vmem:[%s8267_s18 + $0x38] sm:$0xff] }
 0x9b5   : > { %2608 = vmatpush.bf16.msra.mxu3 %v6366_v42 }
 0xa37   : > { %v2252_v43 = vpop.f32.mrf.mxu3 }
 0xa38   : > { %v2256_v44 = vpack.c.bf16 %v2252_v43, %v2252_v43 }
 0xa3a   : > { %5240 = vmatmul.msk.bf16.vlgmr.msrb.gmra.mxu0 %vm1183_vm5, %v2256_v44 }
 0xa3f   : > { %v2254_v45 = vpop.f32.mrf.mxu3 }
 0xab7   : > { %v2286_v46 = vpop.f32.mrf.mxu0 }
 0xab8   : > { %v2290_v47 = vadd.f32 %v2286_v46, %v1951_v24  ;;  %v6347_v24 = vld [vmem:[%s8344_s16 + $0x24] sm:$0xf] }
 0xab9   : > { %v5264_v29 = vor.u32 %v6347_v24, %v5261_v27 }
 0xaba   : > { %v2291_v49 = vadd.f32 %v2290_v47, %v6968_v12  ;;  %v5301_v12 = vld [vmem:[%s8344_s16 + $0x78] sm:$0xf0] }
 0xabb   : > { %v5304_v56 = vor.u32 %v6357_v54, %v5301_v12 }
 0xabc   : > { %v7398_v50 = vadd.f32 %v6582_v48, %v2291_v49 }
 0xabd   : > { %2443 = vmatpush.bf16.msrb.mxu2 %v5304_v56 }
 0xabe   : > { %2299 = vadd.xlane.f32.xlu2 %v7398_v50 }
 0xabf   : > { %v2288_v51 = vpop.f32.mrf.mxu0 }
 0xac1   : > { %2444 = vmatpush.bf16.msrb.mxu2 %v5296_v1  ;;  %v6361_v1 = vld [vmem:[%s8267_s18 + $0x10] sm:$0xff] }
 0xac5   : > { %2445 = vmatpush.bf16.msrb.mxu2 %v5288_v7  ;;  %v2344_v7 = vld [vmem:[%s8266_s17] sm:$0x3] }
 0xac6   : > { %v2346_v9 = vperm.slane %v2344_v7, 0 }
 0xac9   : > { %2446 = vmatpush.bf16.msrb.mxu2 %v5280_v14  ;;  %v2347_v14 = vperm.slane %v2344_v7, 1  ;;  %v6423_v7 = vld [vmem:[%s8334_s1 + $0x170] sm:$0xff] }
 0xacd   : > { %2447 = vmatpush.bf16.msrb.mxu2 %v5272_v26 }
 0xad1   : > { %2448 = vmatpush.bf16.msrb.mxu2 %v5264_v29 }
 0xad5   : > { %2449 = vmatpush.bf16.msrb.mxu2 %v5256_v37 }
 0xad9   : > { %2450 = vmatpush.bf16.msrb.mxu2 %v5248_v41  ;;  %v6585_v41 = vld [vmem:[%s8268_s19] ss:$0 sm:$0xff] }
 0xb31   : > { %v2300_v18 = vpop.xlane.xlu2 %2299 }
 0xb32   : > { %v2301_v57 = vmul.f32 %v2300_v18, %v7025_v38 }
 0xb34   : > { %v7415_v58 = vsub.f32 %v7398_v50, %v2301_v57  ;;  %v6365_v57 = vld [vmem:[%s8267_s18 + $0x30] sm:$0xff] }
 0xb35   : > { %2609 = vmatpush.bf16.msra.mxu3 %v6365_v57  ;;  %v6387_v57 = vld [vmem:[%s8335_s3 + $0x120] sm:$0xff] }
 0xb36   : > { %v2303_v59 = vmul.f32 %v7415_v58, %v7415_v58 }
 0xb38   : > { %2304 = vadd.xlane.f32.xlu1 %v2303_v59  ;;  %v6374_v59 = vld [vmem:[%s8267_s18 + $0x78] sm:$0xff] }
 0xb39   : > { %2621 = vmatpush.bf16.msra.mxu0 %v6374_v59  ;;  %v6394_v59 = vld [vmem:[%s8334_s1 + $0x118] sm:$0xff] }
 0xb3d   : > { %2622 = vmatpush.bf16.msra.mxu0 %v6373_v60  ;;  %v6392_v60 = vld [vmem:[%s8334_s1 + $0x108] sm:$0xff] }
 0xb41   : > { %2623 = vmatpush.bf16.msra.mxu0 %v6372_v62 }
 0xb45   : > { %2624 = vmatpush.bf16.msra.mxu0 %v6371_v0 }
 0xb49   : > { %2625 = vmatpush.bf16.msra.mxu0 %v6370_v2  ;;  %v6378_v2 = vld [vmem:[%s8333_s27 + $0x118] sm:$0xff] }
 0xb4d   : > { %2626 = vmatpush.bf16.msra.mxu0 %v6369_v4  ;;  %v6424_v4 = vld [vmem:[%s8334_s1 + $0x178] sm:$0xff] }
 0xb51   : > { %2627 = vmatpush.bf16.msra.mxu0 %v6368_v6  ;;  %v6385_v6 = vld [vmem:[%s8335_s3 + $0x110] sm:$0xff] }
 0xb55   : > { %2628 = vmatpush.bf16.msra.mxu0 %v6367_v8  ;;  %v6376_v8 = vld [vmem:[%s8333_s27 + $0x108] sm:$0xff] }
 0xbab   : > { %v2305_v16 = vpop.xlane.xlu1 %2304 }
 0xbac   : > { %v2306_v43 = vmul.f32 %v2305_v16, %v7025_v38 }
 0xbae   : > { %v2307_v44 = vadd.f32 1e-05, %v2306_v43 }
 0xbb0   : > { %6627 = vrsqrt.f32 %v2307_v44  ;;  %vm2314_vm9 = vweird.f32 %v2307_v44 }
 0xbb6   : > { %v6628_v45 = vpop.eup %6627 }
 0xbb7   : > { %v2309_v46 = vmul.f32 %v6628_v45, %v2307_v44  ;;  %vm2315_vm8 = vweird.f32 %v6628_v45 }
 0xbb8   : > { %vm2316_vm10 = vmor %vm2314_vm9, %vm2315_vm8 }
 0xbb9   : > { %v2310_v47 = vmul.f32 %v6628_v45, %v2309_v46 }
 0xbbb   : > { %v2311_v48 = vmul.f32 0.5, %v2310_v47 }
 0xbbd   : > { %v2312_v49 = vsub.f32 1.5, %v2311_v48  ;;  %v6398_v48 = vld [vmem:[%s8334_s1 + $0x138] sm:$0xff] }
 0xbbf   : > { %v2313_v51 = vmul.f32 %v6628_v45, %v2312_v49  ;;  %v6382_v49 = vld [vmem:[%s8333_s27 + $0x138] sm:$0xff] }
 0xbc0   : > { %2738 = vmatpush.bf16.msrb.mxu1 %v6382_v49  ;;  %v6587_v49 = vld [vmem:[%s8337_s15 + $0x1] ss:$0 sm:$0xff] }
 0xbc1   : > { %v2317_v53 = vsel %vm2316_vm10, %v6628_v45, %v2313_v51  ;;  %v6390_v51 = vld [vmem:[%s8335_s3 + $0x138] sm:$0xff] }
 0xbc2   : > { %v2318_v54 = vmul.f32 %v2317_v53, %v7415_v58  ;;  %v6364_v58 = vld [vmem:[%s8267_s18 + $0x28] sm:$0xff]  ;;  %2821 = vmatpush.bf16.msra.mxu2 %v6390_v51  ;;  %v6389_v53 = vld [vmem:[%s8335_s3 + $0x130] sm:$0xff] }
 0xbc3   : > { %2610 = vmatpush.bf16.msra.mxu3 %v6364_v58  ;;  %v6393_v58 = vld [vmem:[%s8334_s1 + $0x110] sm:$0xff] }
 0xbc4   : > { %v2322_v12 = vmul.f32 %v6583_v52, %v2318_v54  ;;  %v6381_v52 = vld [vmem:[%s8333_s27 + $0x130] sm:$0xff]  ;;  %v6396_v54 = vld [vmem:[%s8334_s1 + $0x128] sm:$0xff] }
 0xbc5   : > { %2739 = vmatpush.bf16.msrb.mxu1 %v6381_v52 }
 0xbc6   : > { %v2326_v56 = vadd.f32 %v6584_v55, %v2322_v12  ;;  %2822 = vmatpush.bf16.msra.mxu2 %v6389_v53  ;;  %v6380_v55 = vld [vmem:[%s8333_s27 + $0x128] sm:$0xff] }
 0xbc7   : > { %2611 = vmatpush.bf16.msra.mxu3 %v6363_v61  ;;  %v6388_v12 = vld [vmem:[%s8335_s3 + $0x128] sm:$0xff] }
 0xbc8   : > { %v2327_v18 = vpack.c.bf16 %v2326_v56, %v2326_v56  ;;  %v6395_v56 = vld [vmem:[%s8334_s1 + $0x120] sm:$0xff] }
 0xbc9   : > { %2740 = vmatpush.bf16.msrb.mxu1 %v6380_v55  ;;  %v6433_v55 = vld [vmem:[%s8333_s27 + $0x1b0] sm:$0xff] }
 0xbca   : > { %2438 = vmatmul.bf16.vlgmr.msra.gmra.mxu1 %v2327_v18  ;;  %2451 = vmatmul.bf16.vlgmr.msrb.gmra.mxu2 %v2327_v18  ;;  %v6379_v18 = vld [vmem:[%s8333_s27 + $0x120] sm:$0xff] }
 0xbcb   : > { %2612 = vmatpush.bf16.msra.mxu3 %v6362_v63  ;;  %2823 = vmatpush.bf16.msra.mxu2 %v6388_v12  ;;  %v6432_v12 = vld [vmem:[%s8333_s27 + $0x1a8] sm:$0xff] }
 0xbcd   : > { %2741 = vmatpush.bf16.msrb.mxu1 %v6379_v18  ;;  %v6430_v18 = vld [vmem:[%s8333_s27 + $0x198] sm:$0xff] }
 0xbcf   : > { %2613 = vmatpush.bf16.msra.mxu3 %v6361_v1  ;;  %2824 = vmatpush.bf16.msra.mxu2 %v6387_v57  ;;  %v6391_v1 = vld [vmem:[%s8334_s1 + $0x100] sm:$0xff]  ;;  %v6429_v57 = vld [vmem:[%s8333_s27 + $0x190] sm:$0xff] }
 0xbd1   : > { %2742 = vmatpush.bf16.msrb.mxu1 %v6378_v2 }
 0xbd3   : > { %2614 = vmatpush.bf16.msra.mxu3 %v6360_v3  ;;  %v6386_v3 = vld [vmem:[%s8335_s3 + $0x118] sm:$0xff] }
 0xbd4   : > { %2825 = vmatpush.bf16.msra.mxu2 %v6386_v3 }
 0xbd7   : > { %2615 = vmatpush.bf16.msra.mxu3 %v6359_v5  ;;  %v6377_v5 = vld [vmem:[%s8333_s27 + $0x110] sm:$0xff] }
 0xbd8   : > { %2743 = vmatpush.bf16.msrb.mxu1 %v6377_v5  ;;  %2826 = vmatpush.bf16.msra.mxu2 %v6385_v6 }
 0xbdb   : > { %2904 = vmatpush.bf16.msrb.mxu3 %v6398_v48 }
 0xbdc   : > { %2744 = vmatpush.bf16.msrb.mxu1 %v6376_v8 }
 0xc47   : > { %v2439_v10 = vpop.f32.mrf.mxu1 }
 0xc48   : > { %v2440_v11 = vadd.f32 %v2439_v10, %v2346_v9  ;;  %v6384_v9 = vld [vmem:[%s8335_s3 + $0x108] sm:$0xff] }
 0xc49   : > { %v6422_v10 = vld [vmem:[%s8334_s1 + $0x168] sm:$0xff]  ;;  %2827 = vmatpush.bf16.msra.mxu2 %v6384_v9 }
 0xc4a   : > { %v2456_v13 = vmul.f32 %v2440_v11, %v2440_v11 }
 0xc4c   : > { %v2458_v15 = vmul.f32 %v2456_v13, %v2440_v11  ;;  %v6383_v13 = vld [vmem:[%s8335_s3 + $0x100] sm:$0xff] }
 0xc4d   : > { %v2452_v17 = vpop.f32.mrf.mxu2  ;;  %2828 = vmatpush.bf16.msra.mxu2 %v6383_v13 }
 0xc4e   : > { %v2460_v19 = vmul.f32 0.044715, %v2458_v15  ;;  %v2453_v20 = vadd.f32 %v2452_v17, %v2347_v14  ;;  %v6421_v14 = vld [vmem:[%s8334_s1 + $0x160] sm:$0xff]  ;;  %v6408_v15 = vld [vmem:[%s8333_s27 + $0x178] sm:$0xff] }
 0xc4f   : > { %v2441_v21 = vpop.f32.mrf.mxu1  ;;  %v6416_v17 = vld [vmem:[%s8335_s3 + $0x178] sm:$0xff] }
 0xc50   : > { %v2462_v26 = vadd.f32 %v2460_v19, %v2440_v11  ;;  %v2457_v22 = vmul.f32 %v2453_v20, %v2453_v20  ;;  %v6420_v19 = vld [vmem:[%s8334_s1 + $0x158] sm:$0xff]  ;;  %v6415_v21 = vld [vmem:[%s8335_s3 + $0x170] sm:$0xff] }
 0xc51   : > { %3131 = vmatpush.bf16.msrb.mxu2 %v6416_v17 }
 0xc52   : > { %v2464_v23 = vmul.f32 0.7978846, %v2462_v26  ;;  %v2459_v24 = vmul.f32 %v2457_v22, %v2453_v20  ;;  %v6419_v26 = vld [vmem:[%s8334_s1 + $0x150] sm:$0xff]  ;;  %v6406_v22 = vld [vmem:[%s8333_s27 + $0x168] sm:$0xff] }
 0xc54   : > { %6629 = vtanh.f32 %v2464_v23  ;;  %v2461_v25 = vmul.f32 0.044715, %v2459_v24  ;;  %v6414_v23 = vld [vmem:[%s8335_s3 + $0x168] sm:$0xff] }
 0xc55   : > { %v2454_v27 = vpop.f32.mrf.mxu2  ;;  %3132 = vmatpush.bf16.msrb.mxu2 %v6415_v21  ;;  %v6418_v24 = vld [vmem:[%s8334_s1 + $0x148] sm:$0xff] }
 0xc56   : > { %v2463_v29 = vadd.f32 %v2461_v25, %v2453_v20  ;;  %v6405_v25 = vld [vmem:[%s8333_s27 + $0x160] sm:$0xff] }
 0xc57   : > { %v6413_v27 = vld [vmem:[%s8335_s3 + $0x160] sm:$0xff] }
 0xc58   : > { %v2465_v30 = vmul.f32 0.7978846, %v2463_v29  ;;  %v6417_v29 = vld [vmem:[%s8334_s1 + $0x140] sm:$0xff] }
 0xc59   : > { %3133 = vmatpush.bf16.msrb.mxu2 %v6414_v23 }
 0xc5a   : > { %v6630_v31 = vpop.eup %6629  ;;  %6631 = vtanh.f32 %v2465_v30  ;;  %v6404_v30 = vld [vmem:[%s8333_s27 + $0x158] sm:$0xff] }
 0xc5b   : > { %v2468_v32 = vadd.f32 1.0, %v6630_v31  ;;  %v6412_v31 = vld [vmem:[%s8335_s3 + $0x158] sm:$0xff] }
 0xc5d   : > { %v2470_v33 = vmul.f32 0.5, %v2468_v32  ;;  %3134 = vmatpush.bf16.msrb.mxu2 %v6413_v27 }
 0xc5f   : > { %v2472_v34 = vmul.f32 %v2470_v33, %v2440_v11  ;;  %v6375_v11 = vld [vmem:[%s8333_s27 + $0x100] sm:$0xff] }
 0xc60   : > { %v6632_v35 = vpop.eup %6631  ;;  %2745 = vmatpush.bf16.msrb.mxu1 %v6375_v11 }
 0xc61   : > { %v2474_v36 = vpack.c.bf16 %v2472_v34, %v2472_v34  ;;  %v2469_v37 = vadd.f32 1.0, %v6632_v35  ;;  %v6403_v34 = vld [vmem:[%s8333_s27 + $0x150] sm:$0xff]  ;;  %3135 = vmatpush.bf16.msrb.mxu2 %v6412_v31  ;;  %v7779_v31 = vld [vmem:[%s6954_s28] ss:$0 sm:$0xff] }
 0xc62   : > { %v6411_v35 = vld [vmem:[%s8335_s3 + $0x150] sm:$0xff] }
 0xc63   : > { %2616 = vmatmul.bf16.vlgmr.msra.gmra.mxu3 %v2474_v36  ;;  %v2471_v39 = vmul.f32 0.5, %v2469_v37  ;;  %v6402_v37 = vld [vmem:[%s8333_s27 + $0x148] sm:$0xff] }
 0xc64   : > { %3048 = vmatpush.bf16.msra.mxu1 %v6408_v15  ;;  %v6592_v15 = vld [vmem:[%s8338_s10 + $0x5] ss:$0 sm:$0xff] }
 0xc65   : > { %v2473_v40 = vmul.f32 %v2471_v39, %v2453_v20  ;;  %v6407_v20 = vld [vmem:[%s8333_s27 + $0x170] sm:$0xff]  ;;  %3136 = vmatpush.bf16.msrb.mxu2 %v6411_v35  ;;  %v6410_v39 = vld [vmem:[%s8335_s3 + $0x148] sm:$0xff] }
 0xc67   : > { %v2475_v28 = vpack.c.bf16 %v2473_v40, %v2473_v40  ;;  %v6401_v40 = vld [vmem:[%s8333_s27 + $0x140] sm:$0xff] }
 0xc68   : > { %3049 = vmatpush.bf16.msra.mxu1 %v6407_v20 }
 0xc69   : > { %2629 = vmatmul.bf16.vlgmr.msra.gmra.mxu0 %v2475_v28  ;;  %3137 = vmatpush.bf16.msrb.mxu2 %v6410_v39  ;;  %v6409_v28 = vld [vmem:[%s8335_s3 + $0x140] sm:$0xff] }
 0xc6c   : > { %3050 = vmatpush.bf16.msra.mxu1 %v6406_v22 }
 0xc6d   : > { %3138 = vmatpush.bf16.msrb.mxu2 %v6409_v28  ;;  %v6400_v28 = vld [vmem:[%s8342_s12 + $0x48] sm:$0xff] }
 0xc70   : > { %3051 = vmatpush.bf16.msra.mxu1 %v6405_v25 }
 0xc74   : > { %3052 = vmatpush.bf16.msra.mxu1 %v6404_v30 }
 0xc78   : > { %3053 = vmatpush.bf16.msra.mxu1 %v6403_v34 }
 0xc7c   : > { %3054 = vmatpush.bf16.msra.mxu1 %v6402_v37 }
 0xc80   : > { %3055 = vmatpush.bf16.msra.mxu1 %v6401_v40 }
 0xce6   : > { %v2617_v42 = vpop.f32.mrf.mxu3  ;;  %v2630_v16 = vpop.f32.mrf.mxu0 }
 0xce7   : > { %v2618_v43 = vadd.f32 %v6585_v41, %v2617_v42 }
 0xce9   : > { %v2631_v44 = vadd.f32 %v2630_v16, %v2618_v43 }
 0xceb   : > { %v7566_v45 = vadd.f32 %v2631_v44, %v7398_v50  ;;  %v6397_v50 = vld [vmem:[%s8334_s1 + $0x130] sm:$0xff] }
 0xcec   : > { %2905 = vmatpush.bf16.msrb.mxu3 %v6397_v50 }
 0xced   : > { %2639 = vadd.xlane.f32.xlu2 %v7566_v45 }
 0xcee   : > { %v2619_v46 = vpop.f32.mrf.mxu3  ;;  %v2632_v47 = vpop.f32.mrf.mxu0 }
 0xcef   : > { %v6586_v47 = vld [vmem:[%s8336_s14 + $0x1] ss:$0 sm:$0xff] }
 0xcf0   : > { %2906 = vmatpush.bf16.msrb.mxu3 %v6396_v54  ;;  %v6434_v54 = vld [vmem:[%s8333_s27 + $0x1b8] sm:$0xff] }
 0xcf4   : > { %2907 = vmatpush.bf16.msrb.mxu3 %v6395_v56  ;;  %v6431_v56 = vld [vmem:[%s8333_s27 + $0x1a0] sm:$0xff] }
 0xcf8   : > { %2908 = vmatpush.bf16.msrb.mxu3 %v6394_v59  ;;  %v6428_v59 = vld [vmem:[%s8333_s27 + $0x188] sm:$0xff] }
 0xcfc   : > { %2909 = vmatpush.bf16.msrb.mxu3 %v6393_v58  ;;  %v6427_v58 = vld [vmem:[%s8333_s27 + $0x180] sm:$0xff] }
 0xd00   : > { %2910 = vmatpush.bf16.msrb.mxu3 %v6392_v60 }
 0xd04   : > { %2911 = vmatpush.bf16.msrb.mxu3 %v6391_v1 }
 0xd08   : > { %3214 = vmatpush.bf16.msra.mxu3 %v6424_v4  ;;  %v6588_v4 = vld [vmem:[%s8341_s26 + $0x4] ss:$0 sm:$0xff] }
 0xd0c   : > { %3215 = vmatpush.bf16.msra.mxu3 %v6423_v7 }
 0xd10   : > { %3216 = vmatpush.bf16.msra.mxu3 %v6422_v10 }
 0xd14   : > { %3217 = vmatpush.bf16.msra.mxu3 %v6421_v14 }
 0xd18   : > { %3218 = vmatpush.bf16.msra.mxu3 %v6420_v19 }
 0xd1c   : > { %3219 = vmatpush.bf16.msra.mxu3 %v6419_v26 }
 0xd20   : > { %3220 = vmatpush.bf16.msra.mxu3 %v6418_v24 }
 0xd24   : > { %3221 = vmatpush.bf16.msra.mxu3 %v6417_v29 }
 0xd60   : > { %v2640_v61 = vpop.xlane.xlu2 %2639 }
 0xd61   : > { %v2641_v62 = vmul.f32 %v2640_v61, %v7025_v38  ;;  %v6589_v61 = vld [vmem:[%s8338_s10 + $0x4] ss:$0 sm:$0xff] }
 0xd63   : > { %v7616_v63 = vsub.f32 %v7566_v45, %v2641_v62  ;;  %v6590_v62 = vld [vmem:[%s8340_s29 + $0x4] ss:$0 sm:$0xff] }
 0xd65   : > { %v2643_v0 = vmul.f32 %v7616_v63, %v7616_v63 }
 0xd67   : > { %2644 = vadd.xlane.f32.xlu1 %v2643_v0 }
 0xdda   : > { %v2645_v32 = vpop.xlane.xlu1 %2644 }
 0xddb   : > { %v2646_v33 = vmul.f32 %v2645_v32, %v7025_v38 }
 0xddd   : > { %v2647_v36 = vadd.f32 1e-05, %v2646_v33 }
 0xddf   : > { %6633 = vrsqrt.f32 %v2647_v36  ;;  %vm2654_vm12 = vweird.f32 %v2647_v36 }
 0xde5   : > { %v6634_v41 = vpop.eup %6633 }
 0xde6   : > { %v2649_v42 = vmul.f32 %v6634_v41, %v2647_v36  ;;  %vm2655_vm11 = vweird.f32 %v6634_v41 }
 0xde7   : > { %vm2656_vm13 = vmor %vm2654_vm12, %vm2655_vm11 }
 0xde8   : > { %v2650_v16 = vmul.f32 %v6634_v41, %v2649_v42 }
 0xdea   : > { %v2651_v43 = vmul.f32 0.5, %v2650_v16 }
 0xdec   : > { %v2652_v44 = vsub.f32 1.5, %v2651_v43 }
 0xdee   : > { %v2653_v46 = vmul.f32 %v6634_v41, %v2652_v44 }
 0xdf0   : > { %v2657_v48 = vsel %vm2656_vm13, %v6634_v41, %v2653_v46  ;;  %v6593_v41 = vld [vmem:[%s8340_s29 + $0x5] ss:$0 sm:$0xff] }
 0xdf1   : > { %v2658_v51 = vmul.f32 %v2657_v48, %v7616_v63 }
 0xdf3   : > { %v2662_v50 = vmul.f32 %v6586_v47, %v2658_v51 }
 0xdf5   : > { %v2666_v52 = vadd.f32 %v6587_v49, %v2662_v50  ;;  %v6591_v49 = vld [vmem:[%s8341_s26 + $0x5] ss:$0 sm:$0xff] }
 0xdf7   : > { %v7727_v53 = vpack.c.bf16 %v2666_v52, %v2666_v52  ;;  %v6399_v52 = vld [vmem:[%s8342_s12 + $0x40] sm:$0xff] }
 0xdf9   : > { %2746 = vmatmul.bf16.vlgmr.msrb.gmra.mxu1 %v7727_v53  ;;  %2829 = vmatmul.bf16.vlgmr.msra.gmra.mxu2 %v7727_v53 }
 0xdfa   : > { %2912 = vmatmul.bf16.vlgmr.msrb.gmra.mxu3 %v7727_v53  ;;  %3337 = vmatpush.bf16.msra.mxu2 %v6400_v28  ;;  %v6468_v28 = vld [vmem:[%s8335_s3 + $0x1f8] sm:$0xff] }
 0xdfb   : > { %3414 = vmatpush.bf16.msrb.mxu3 %v6434_v54 }
 0xdfe   : > { %3338 = vmatpush.bf16.msra.mxu2 %v6399_v52  ;;  %v6463_v52 = vld [vmem:[%s8335_s3 + $0x1d0] sm:$0xff] }
 0xdff   : > { %3415 = vmatpush.bf16.msrb.mxu3 %v6433_v55 }
 0xe03   : > { %3416 = vmatpush.bf16.msrb.mxu3 %v6432_v12 }
 0xe07   : > { %3417 = vmatpush.bf16.msrb.mxu3 %v6431_v56 }
 0xe09   : > { %3056 = vmatmul.bf16.vlgmr.msra.gmra.mxu1 %v7727_v53  ;;  %3139 = vmatmul.bf16.vlgmr.msrb.gmra.mxu2 %v7727_v53 }
 0xe0a   : > { %3222 = vmatmul.bf16.vlgmr.msra.gmra.mxu3 %v7727_v53 }
 0xe0b   : > { %3418 = vmatpush.bf16.msrb.mxu3 %v6430_v18 }
 0xe0f   : > { %3419 = vmatpush.bf16.msrb.mxu3 %v6429_v57 }
 0xe13   : > { %3420 = vmatpush.bf16.msrb.mxu3 %v6428_v59 }
 0xe17   : > { %3421 = vmatpush.bf16.msrb.mxu3 %v6427_v58 }
 0xe1a   : > { %3422 = vmatmul.bf16.vlgmr.msrb.gmra.mxu3 %v7727_v53 }
 0xe76   : > { %v2747_v60 = vpop.f32.mrf.mxu1 }
 0xe77   : > { %v2748_v9 = vadd.f32 %v6588_v4, %v2747_v60  ;;  %v6442_v60 = vld [vmem:[%s8335_s3 + $0x1b8] sm:$0xff] }
 0xe79   : > { %v2917_v14 = vpack.c.bf16 %v2748_v9, %v2748_v9  ;;  %v6436_v9 = vld [vmem:[%s8335_s3 + $0x188] sm:$0xff] }
 0xe7c   : > { %v2830_v63 = vpop.f32.mrf.mxu2 }
 0xe7d   : > { %v2831_v0 = vadd.f32 %v6589_v61, %v2830_v63  ;;  %v2913_v1 = vpop.f32.mrf.mxu3  ;;  %v6441_v61 = vld [vmem:[%s8335_s3 + $0x1b0] sm:$0xff]  ;;  %v6439_v63 = vld [vmem:[%s8335_s3 + $0x1a0] sm:$0xff] }
 0xe7e   : > { %v2914_v2 = vadd.f32 %v6590_v62, %v2913_v1  ;;  %v2749_v3 = vpop.f32.mrf.mxu1  ;;  %v6440_v62 = vld [vmem:[%s8335_s3 + $0x1a8] sm:$0xff] }
 0xe7f   : > { %v2918_v5 = vpack.c.bf16 %v2831_v0, %v2831_v0  ;;  %v6438_v0 = vld [vmem:[%s8335_s3 + $0x198] sm:$0xff] }
 0xe80   : > { %v2952_v6 = vpack.c.bf16 %v2914_v2, %v2914_v2 }
 0xe81   : > { %v2923_v7 = vsel %vm1183_vm5, %v2918_v5, 0 }
 0xe82   : > { %v2957_v8 = vsel %vm1225_vm6, %v2952_v6, 0  ;;  %2932 = vmatpush.bf16.xpose.msrb.mxu0 %v2923_v7 }
 0xe84   : > { %v2832_v10 = vpop.f32.mrf.mxu2 }
 0xe85   : > { %v2915_v11 = vpop.f32.mrf.mxu3  ;;  %v6435_v10 = vld [vmem:[%s8335_s3 + $0x180] sm:$0xff] }
 0xe86   : > { %v3057_v13 = vpop.f32.mrf.mxu1 }
 0xe87   : > { %v3058_v51 = vadd.f32 %v6591_v49, %v3057_v13 }
 0xe89   : > { %5518 = vmatmul.msk.bf16.vlgmr.msrb.gmra.mxu0 %vm1183_vm5, %v2917_v14  ;;  %v3227_v50 = vpack.c.bf16 %v3058_v51, %v3058_v51  ;;  %v6594_v51 = vld [vmem:[%s8341_s26 + $0x6] ss:$0 sm:$0xff] }
 0xe8a   : > { %2966 = vmatpush.bf16.msra.mxu0 %v2957_v8  ;;  %v6437_v8 = vld [vmem:[%s8335_s3 + $0x190] sm:$0xff] }
 0xe8c   : > { %v3140_v17 = vpop.f32.mrf.mxu2 }
 0xe8d   : > { %v3141_v19 = vadd.f32 %v6592_v15, %v3140_v17  ;;  %v3223_v20 = vpop.f32.mrf.mxu3  ;;  %v6460_v15 = vld [vmem:[%s8333_s27 + $0x1f8] sm:$0xff] }
 0xe8e   : > { %v3059_v21 = vpop.f32.mrf.mxu1  ;;  %v3224_v16 = vadd.f32 %v6593_v41, %v3223_v20  ;;  %v6459_v20 = vld [vmem:[%s8333_s27 + $0x1f0] sm:$0xff] }
 0xe8f   : > { %v3228_v26 = vpack.c.bf16 %v3141_v19, %v3141_v19  ;;  %v6426_v19 = vld [vmem:[%s8342_s12 + $0x58] sm:$0xff]  ;;  %v6425_v21 = vld [vmem:[%s8342_s12 + $0x50] sm:$0xff] }
 0xe90   : > { %v3262_v44 = vpack.c.bf16 %v3224_v16, %v3224_v16  ;;  %3309 = vmatpush.bf16.msrb.mxu1 %v6426_v19 }
 0xe91   : > { %v3233_v22 = vsel %vm1183_vm5, %v3228_v26, 0  ;;  %v6450_v26 = vld [vmem:[%s8334_s1 + $0x1b8] sm:$0xff] }
 0xe92   : > { %3242 = vmatpush.bf16.xpose.msrb.mxu0 %v3233_v22  ;;  %v3267_v48 = vsel %vm1225_vm6, %v3262_v44, 0  ;;  %v6458_v22 = vld [vmem:[%s8333_s27 + $0x1e8] sm:$0xff]  ;;  %v6465_v44 = vld [vmem:[%s8335_s3 + $0x1e0] sm:$0xff] }
 0xe94   : > { %v3142_v23 = vpop.f32.mrf.mxu2  ;;  %3310 = vmatpush.bf16.msrb.mxu1 %v6425_v21 }
 0xe95   : > { %v3225_v24 = vpop.f32.mrf.mxu3  ;;  %v6449_v23 = vld [vmem:[%s8334_s1 + $0x1b0] sm:$0xff] }
 0xe96   : > { %v6457_v24 = vld [vmem:[%s8333_s27 + $0x1e0] sm:$0xff] }
 0xe98   : > { %3580 = vmatpush.bf16.msra.mxu1 %v6450_v26 }
 0xe9c   : > { %3581 = vmatpush.bf16.msra.mxu1 %v6449_v23 }
 0xe9d   : > { %v7776_v25 = vpop.f32.mrf.mxu3 }
 0xea5   : > { %v3425_v27 = vpop.f32.mrf.mxu3 }
 0xea6   : > { %v6448_v27 = vld [vmem:[%s8334_s1 + $0x1a8] sm:$0xff] }
 0xea7   : > { %3582 = vmatpush.bf16.msra.mxu1 %v6448_v27  ;;  %v6475_v27 = vld [vmem:[%s8334_s1 + $0x1f0] sm:$0xff] }
 0xf06   : > { %v2934_v29 = vpop.f32.mrf.mxu0 }
 0xf07   : > { %v2938_v30 = vmul.f32 0.17677669, %v2934_v29  ;;  %v6456_v29 = vld [vmem:[%s8333_s27 + $0x1d8] sm:$0xff] }
 0xf09   : > { %v2939_v32 = vadd.f32 %v7779_v31, %v2938_v30  ;;  %v6447_v30 = vld [vmem:[%s8334_s1 + $0x1a0] sm:$0xff] }
 0xf0a   : > { %3583 = vmatpush.bf16.msra.mxu1 %v6447_v30  ;;  %v6473_v30 = vld [vmem:[%s8334_s1 + $0x1e0] sm:$0xff] }
 0xf0b   : > { %v2940_v33 = vsel %vm1208_vm7, %v2939_v32, -inf }
 0xf0c   : > { %2941 = vmax.xlane.f32.xlu2 %v2940_v33  ;;  %v6446_v33 = vld [vmem:[%s8334_s1 + $0x198] sm:$0xff] }
 0xf0e   : > { %v2936_v34 = vpop.f32.mrf.mxu0  ;;  %3584 = vmatpush.bf16.msra.mxu1 %v6446_v33  ;;  %v6471_v33 = vld [vmem:[%s8334_s1 + $0x1d0] sm:$0xff] }
 0xf0f   : > { %v6454_v34 = vld [vmem:[%s8333_s27 + $0x1c8] sm:$0xff] }
 0xf7f   : > { %v2942_v35 = vpop.xlane.xlu2 %2941 }
 0xf80   : > { %v2943_v36 = vsub.f32 %v2939_v32, %v2942_v35  ;;  %v6455_v32 = vld [vmem:[%s8333_s27 + $0x1d0] sm:$0xff] }
 0xf81   : > { %v6445_v35 = vld [vmem:[%s8334_s1 + $0x190] sm:$0xff] }
 0xf82   : > { %v2944_v37 = vmul.f32 1.442695, %v2943_v36  ;;  %v6453_v36 = vld [vmem:[%s8333_s27 + $0x1c0] sm:$0xff]  ;;  %3585 = vmatpush.bf16.msra.mxu1 %v6445_v35 }
 0xf83   : > { %v6469_v35 = vld [vmem:[%s8334_s1 + $0x1c0] sm:$0xff] }
 0xf84   : > { %6635 = vpow2.f32 %v2944_v37  ;;  %v6444_v37 = vld [vmem:[%s8334_s1 + $0x188] sm:$0xff] }
 0xf86   : > { %3586 = vmatpush.bf16.msra.mxu1 %v6444_v37 }
 0xf8a   : > { %v6636_v39 = vpop.eup %6635 }
 0xf8b   : > { %v2946_v40 = vsel %vm1208_vm7, %v6636_v39, 0.0 }
 0xf8c   : > { %2947 = vadd.xlane.f32.xlu0 %v2946_v40 }
 0xfff   : > { %v2948_v42 = vpop.xlane.xlu0 %2947 }
0x1000   : > { %6637 = vrcp.f32 %v2948_v42  ;;  %v6467_v42 = vld [vmem:[%s8335_s3 + $0x1f0] sm:$0xff] }
0x1006   : > { %v6638_v43 = vpop.eup %6637 }
0x1007   : > { %v2950_v46 = vmul.f32 %v6638_v43, %v6636_v39  ;;  %v6443_v39 = vld [vmem:[%s8334_s1 + $0x180] sm:$0xff]  ;;  %v6466_v43 = vld [vmem:[%s8335_s3 + $0x1e8] sm:$0xff] }
0x1008   : > { %3587 = vmatpush.bf16.msra.mxu1 %v6443_v39 }
0x1009   : > { %v2951_v47 = vpack.c.bf16 %v2950_v46, %v2950_v46  ;;  %v6595_v46 = vld [vmem:[%s8338_s10 + $0x6] ss:$0 sm:$0xff] }
0x100b   : > { %5519 = vmatmul.msk.bf16.vlgmr.msra.gmra.mxu0 %vm1208_vm7, %v2951_v47 }
0x100c   : > { %3276 = vmatpush.bf16.msra.mxu0 %v3267_v48  ;;  %v6464_v48 = vld [vmem:[%s8335_s3 + $0x1d8] sm:$0xff] }
0x101b   : > { %5671 = vmatmul.msk.bf16.vlgmr.msrb.gmra.mxu0 %vm1183_vm5, %v3227_v50 }
0x101c   : > { %3497 = vmatpush.bf16.msrb.mxu0 %v6442_v60  ;;  %v6452_v60 = vld [vmem:[%s8342_s12 + $0x68] sm:$0xff] }
0x101d   : > { %3675 = vmatpush.bf16.msra.mxu3 %v6452_v60 }
0x1020   : > { %3498 = vmatpush.bf16.msrb.mxu0 %v6441_v61  ;;  %v6451_v61 = vld [vmem:[%s8342_s12 + $0x60] sm:$0xff] }
0x1021   : > { %3676 = vmatpush.bf16.msra.mxu3 %v6451_v61 }
0x1024   : > { %3499 = vmatpush.bf16.msrb.mxu0 %v6440_v62 }
0x1028   : > { %3500 = vmatpush.bf16.msrb.mxu0 %v6439_v63  ;;  %v6597_v63 = vld [vmem:[%s8340_s29 + $0x6] ss:$0 sm:$0xff] }
0x102c   : > { %3501 = vmatpush.bf16.msrb.mxu0 %v6438_v0 }
0x1030   : > { %3502 = vmatpush.bf16.msrb.mxu0 %v6437_v8 }
0x1034   : > { %3503 = vmatpush.bf16.msrb.mxu0 %v6436_v9 }
0x1038   : > { %3504 = vmatpush.bf16.msrb.mxu0 %v6435_v10 }
0x1088   : > { %v2968_v54 = vpop.f32.mrf.mxu0 }
0x1089   : > { %v2972_v55 = vpack.c.bf16 %v2968_v54, %v2968_v54 }
0x108b   : > { %5694 = vmatmul.msk.bf16.vlgmr.msra.gmra.mxu2 %vm1183_vm5, %v2972_v55  ;;  %v3424_v55 = vadd.f32 %v6594_v51, %v7776_v25 }
0x1090   : > { %v2970_v12 = vpop.f32.mrf.mxu0 }
0x1098   : > { %v3244_v56 = vpop.f32.mrf.mxu0 }
0x1099   : > { %v3248_v18 = vmul.f32 0.17677669, %v3244_v56  ;;  %v6462_v56 = vld [vmem:[%s8335_s3 + $0x1c8] sm:$0xff] }
0x109b   : > { %v3249_v57 = vadd.f32 %v7779_v31, %v3248_v18  ;;  %v3593_v18 = vpack.c.bf16 %v3424_v55, %v3424_v55 }
0x109d   : > { %v3250_v59 = vsel %vm1208_vm7, %v3249_v57, -inf }
0x109e   : > { %3251 = vmax.xlane.f32.xlu1 %v3250_v59 }
0x10a0   : > { %v3246_v58 = vpop.f32.mrf.mxu0 }
0x110e   : > { %v7817_v1 = vpop.f32.mrf.mxu2 }
0x1111   : > { %v3252_v2 = vpop.xlane.xlu1 %3251 }
0x1112   : > { %v3253_v3 = vsub.f32 %v3249_v57, %v3252_v2  ;;  %v6461_v57 = vld [vmem:[%s8335_s3 + $0x1c0] sm:$0xff]  ;;  %s4505_s3 = sshll.u32 %s837_s7, 4  ;;  %s4506_s3 = int_to_ptr.vmem [resolvable:$true] %s4505_s3 }
0x1114   : > { %v3254_v4 = vmul.f32 1.442695, %v3253_v3 }
0x1116   : > { %6639 = vpow2.f32 %v3254_v4  ;;  %v3342_v5 = vpop.f32.mrf.mxu2 }
0x111c   : > { %v6640_v6 = vpop.eup %6639 }
0x111d   : > { %v3256_v7 = vsel %vm1208_vm7, %v6640_v6, 0.0 }
0x111e   : > { %3257 = vadd.xlane.f32.xlu2 %v3256_v7 }
0x1191   : > { %v3258_v11 = vpop.xlane.xlu2 %3257 }
0x1192   : > { %6641 = vrcp.f32 %v3258_v11 }
0x1198   : > { %v6642_v13 = vpop.eup %6641 }
0x1199   : > { %v3260_v14 = vmul.f32 %v6642_v13, %v6640_v6  ;;  %v6598_v6 = vld [vmem:[%s8338_s10 + $0x7] ss:$0 sm:$0xff] }
0x119b   : > { %v3261_v17 = vpack.c.bf16 %v3260_v14, %v3260_v14 }
0x119d   : > { %5672 = vmatmul.msk.bf16.vlgmr.msra.gmra.mxu0 %vm1208_vm7, %v3261_v17 }
0x119e   : > { %3753 = vmatpush.bf16.msra.mxu0 %v6460_v15 }
0x11a2   : > { %3754 = vmatpush.bf16.msra.mxu0 %v6459_v20  ;;  %v6476_v20 = vld [vmem:[%s8334_s1 + $0x1f8] sm:$0xff] }
0x11a6   : > { %3755 = vmatpush.bf16.msra.mxu0 %v6458_v22 }
0x11aa   : > { %3756 = vmatpush.bf16.msra.mxu0 %v6457_v24 }
0x11ad   : > { %3505 = vmatmul.bf16.vlgmr.msrb.gmra.mxu0 %v7727_v53 }
0x11ae   : > { %3757 = vmatpush.bf16.msra.mxu0 %v6456_v29  ;;  %v6474_v29 = vld [vmem:[%s8334_s1 + $0x1e8] sm:$0xff] }
0x11b2   : > { %3758 = vmatpush.bf16.msra.mxu0 %v6455_v32  ;;  %v6472_v32 = vld [vmem:[%s8334_s1 + $0x1d8] sm:$0xff] }
0x11b6   : > { %3759 = vmatpush.bf16.msra.mxu0 %v6454_v34  ;;  %v6470_v34 = vld [vmem:[%s8334_s1 + $0x1c8] sm:$0xff] }
0x11ba   : > { %3760 = vmatpush.bf16.msra.mxu0 %v6453_v36 }
0x11bd   : > { %3761 = vmatmul.bf16.vlgmr.msra.gmra.mxu0 %v7727_v53 }
0x121a   : > { %v3278_v40 = vpop.f32.mrf.mxu0 }
0x121b   : > { %v3282_v41 = vpack.c.bf16 %v3278_v40, %v3278_v40 }
0x121d   : > { %5685 = vmatmul.msk.bf16.vlgmr.msrb.gmra.mxu1 %vm1183_vm5, %v3282_v41 }
0x121e   : > { %3836 = vmatpush.bf16.msrb.mxu1 %v6468_v28 }
0x1222   : > { %v3280_v16 = vpop.f32.mrf.mxu0  ;;  %3837 = vmatpush.bf16.msrb.mxu1 %v6467_v42 }
0x1223   : > { %v6596_v16 = vld [vmem:[%s8341_s26 + $0x7] ss:$0 sm:$0xff] }
0x1226   : > { %3838 = vmatpush.bf16.msrb.mxu1 %v6466_v43 }
0x122a   : > { %v3506_v47 = vpop.f32.mrf.mxu0  ;;  %3839 = vmatpush.bf16.msrb.mxu1 %v6465_v44  ;;  %v6599_v44 = vld [vmem:[%s8340_s29 + $0x7] ss:$0 sm:$0xff] }
0x122b   : > { %v3507_v49 = vadd.f32 %v6595_v46, %v3506_v47 }
0x122d   : > { %v3594_v50 = vpack.c.bf16 %v3507_v49, %v3507_v49  ;;  %3588 = vmatmul.bf16.vlgmr.msra.gmra.mxu1 %v7727_v53 }
0x122e   : > { %3840 = vmatpush.bf16.msrb.mxu1 %v6464_v48 }
0x122f   : > { %v3599_v54 = vsel %vm1183_vm5, %v3594_v50, 0 }
0x1230   : > { %3608 = vmatpush.bf16.xpose.msrb.mxu2 %v3599_v54 }
0x1232   : > { %v3508_v12 = vpop.f32.mrf.mxu0  ;;  %3841 = vmatpush.bf16.msrb.mxu1 %v6463_v52 }
0x1236   : > { %3842 = vmatpush.bf16.msrb.mxu1 %v6462_v56 }
0x1237   : > { %5842 = vmatmul.msk.bf16.vlgmr.msrb.gmra.mxu2 %vm1183_vm5, %v3593_v18 }
0x123a   : > { %v7921_v59 = vpop.f32.mrf.mxu0  ;;  %3843 = vmatpush.bf16.msrb.mxu1 %v6461_v57 }
0x123b   : > { %v3763_v43 = vadd.f32 %v6596_v16, %v7921_v59 }
0x123d   : > { %3844 = vmatmul.bf16.vlgmr.msrb.gmra.mxu1 %v7727_v53  ;;  %v3932_v47 = vpack.c.bf16 %v3763_v43, %v3763_v43  ;;  %v6075_v43 = vld [vmem:[%s8344_s16 + $0xc8] sm:$0xf0] }
0x1242   : > { %v3764_v25 = vpop.f32.mrf.mxu0 }
0x129a   : > { %v7924_v58 = vpop.f32.mrf.mxu1 }
0x129b   : > { %v3341_v50 = vadd.f32 %v7817_v1, %v7924_v58  ;;  %v6478_v1 = vld [vmem:[%s8342_s12 + $0x78] sm:$0xff] }
0x129c   : > { %4014 = vmatpush.bf16.msrb.mxu0 %v6478_v1  ;;  %v6479_v1 = vld [vmem:[%s8344_s16 + $0x84] sm:$0xf] }
0x12a2   : > { %v3314_v62 = vpop.f32.mrf.mxu1 }
0x12aa   : > { %v3589_v0 = vpop.f32.mrf.mxu1 }
0x12ab   : > { %v3590_v2 = vadd.f32 %v6597_v63, %v3589_v0 }
0x12ad   : > { %v3628_v3 = vpack.c.bf16 %v3590_v2, %v3590_v2 }
0x12af   : > { %v3633_v4 = vsel %vm1225_vm6, %v3628_v3, 0  ;;  %v6477_v3 = vld [vmem:[%s8342_s12 + $0x70] sm:$0xff]  ;;  %s4488_s12 = scalar_lea.sflag [#allocation3], %s8191_s23 }
0x12b0   : > { %3642 = vmatpush.bf16.msra.mxu2 %v3633_v4  ;;  %4015 = vmatpush.bf16.msrb.mxu0 %v6477_v3 }
0x12b2   : > { %v3591_v5 = vpop.f32.mrf.mxu1 }
0x12b4   : > { %3919 = vmatpush.bf16.msrb.mxu2 %v6476_v20 }
0x12b8   : > { %3920 = vmatpush.bf16.msrb.mxu2 %v6475_v27  ;;  %v6492_v27 = vld [vmem:[%s8344_s16 + $0xe4] sm:$0xf0] }
0x12ba   : > { %v3610_v7 = vpop.f32.mrf.mxu2  ;;  %v3845_v8 = vpop.f32.mrf.mxu1 }
0x12bb   : > { %v3614_v9 = vmul.f32 0.17677669, %v3610_v7  ;;  %v3846_v10 = vadd.f32 %v6598_v6, %v3845_v8 }
0x12bc   : > { %3921 = vmatpush.bf16.msrb.mxu2 %v6474_v29  ;;  %v6491_v29 = vld [vmem:[%s8344_s16 + $0xe4] sm:$0xf] }
0x12bd   : > { %v3933_v11 = vpack.c.bf16 %v3846_v10, %v3846_v10  ;;  %v3615_v13 = vadd.f32 %v7779_v31, %v3614_v9  ;;  %v6600_v9 = vld [vmem:[%s8343_s13 + $0x1] ss:$0 sm:$0xff] }
0x12bf   : > { %v3938_v14 = vsel %vm1183_vm5, %v3933_v11, 0  ;;  %v3616_v15 = vsel %vm1208_vm7, %v3615_v13, -inf }
0x12c0   : > { %3947 = vmatpush.bf16.xpose.msrb.mxu3 %v3938_v14  ;;  %3617 = vmax.xlane.f32.xlu0 %v3616_v15  ;;  %v6097_v14 = vld [vmem:[%s8344_s16 + $0xf0] sm:$0xf]  ;;  %v6494_v15 = vld [vmem:[%s8344_s16 + $0xf4] sm:$0xf0] }
0x12c1   : > { %3922 = vmatpush.bf16.msrb.mxu2 %v6473_v30 }
0x12c2   : > { %v3612_v17 = vpop.f32.mrf.mxu2  ;;  %v3847_v19 = vpop.f32.mrf.mxu1 }
0x12c3   : > { %v6493_v17 = vld [vmem:[%s8344_s16 + $0xf4] sm:$0xf]  ;;  %v6098_v19 = vor.u32 %v6494_v15, %v6097_v14  ;;  %v6601_v14 = vld [vmem:[%s8269_s20 + $0x1] ss:$0 sm:$0xff] }
0x12c5   : > { %3923 = vmatpush.bf16.msrb.mxu2 %v6472_v32  ;;  %4166 = vmatpush.bf16.msra.mxu1 %v6098_v19  ;;  %v6091_v32 = vld [vmem:[%s8344_s16 + $0xe8] sm:$0xf0]  ;;  %v6602_v19 = vld [vmem:[%s8270_s21 + $0x1] ss:$0 sm:$0xff] }
0x12c9   : > { %3924 = vmatpush.bf16.msrb.mxu2 %v6471_v33  ;;  %v6094_v33 = vor.u32 %v6491_v29, %v6091_v32  ;;  %v6508_v29 = vld [vmem:[%s8267_s18 + $0xe8] sm:$0xff]  ;;  %v6507_v32 = vld [vmem:[%s8267_s18 + $0xe0] sm:$0xff] }
0x12cd   : > { %3925 = vmatpush.bf16.msrb.mxu2 %v6470_v34  ;;  %v6081_v34 = vld [vmem:[%s8344_s16 + $0xd0] sm:$0xf] }
0x12d1   : > { %3926 = vmatpush.bf16.msrb.mxu2 %v6469_v35  ;;  %v6490_v35 = vld [vmem:[%s8344_s16 + $0xd4] sm:$0xf0] }
0x1333   : > { %v3618_v21 = vpop.xlane.xlu0 %3617 }
0x1334   : > { %v3619_v26 = vsub.f32 %v3615_v13, %v3618_v21 }
0x1336   : > { %v3620_v22 = vmul.f32 1.442695, %v3619_v26 }
0x1338   : > { %6643 = vpow2.f32 %v3620_v22 }
0x133e   : > { %v6644_v23 = vpop.eup %6643 }
0x133f   : > { %v3622_v24 = vsel %vm1208_vm7, %v6644_v23, 0.0 }
0x1340   : > { %3623 = vadd.xlane.f32.xlu1 %v3622_v24  ;;  %v6089_v24 = vld [vmem:[%s8344_s16 + $0xe0] sm:$0xf] }
0x1341   : > { %v6090_v30 = vor.u32 %v6492_v27, %v6089_v24  ;;  %v6509_v24 = vld [vmem:[%s8267_s18 + $0xf0] sm:$0xff]  ;;  %v6499_v27 = vld [vmem:[%s8267_s18 + $0xa0] sm:$0xff] }
0x1343   : > { %4167 = vmatpush.bf16.msra.mxu1 %v6090_v30  ;;  %v6498_v30 = vld [vmem:[%s8267_s18 + $0x98] sm:$0xff] }
0x13b3   : > { %v3624_v36 = vpop.xlane.xlu1 %3623 }
0x13b4   : > { %6645 = vrcp.f32 %v3624_v36  ;;  %v6489_v36 = vld [vmem:[%s8344_s16 + $0xd4] sm:$0xf] }
0x13ba   : > { %v6646_v37 = vpop.eup %6645 }
0x13bb   : > { %v3626_v39 = vmul.f32 %v6646_v37, %v6644_v23  ;;  %v6082_v37 = vor.u32 %v6490_v35, %v6081_v34  ;;  %v6506_v34 = vld [vmem:[%s8267_s18 + $0xd8] sm:$0xff]  ;;  %v6496_v35 = vld [vmem:[%s8267_s18 + $0x88] sm:$0xff] }
0x13bd   : > { %v3627_v40 = vpack.c.bf16 %v3626_v39, %v3626_v39  ;;  %v6083_v39 = vld [vmem:[%s8344_s16 + $0xd8] sm:$0xf0]  ;;  %4168 = vmatpush.bf16.msra.mxu1 %v6082_v37  ;;  %v6495_v37 = vld [vmem:[%s8267_s18 + $0x80] sm:$0xff] }
0x13bf   : > { %5843 = vmatmul.msk.bf16.vlgmr.msra.gmra.mxu2 %vm1208_vm7, %v3627_v40  ;;  %v6086_v40 = vor.u32 %v6489_v36, %v6083_v39  ;;  %v6505_v36 = vld [vmem:[%s8267_s18 + $0xd0] sm:$0xff]  ;;  %v6038_v39 = vld [vmem:[%s8266_s17 + $0x2] sm:$0x3] }
0x13cf   : > { %3927 = vmatmul.bf16.vlgmr.msrb.gmra.mxu2 %v7727_v53 }
0x1442   : > { %v3644_v28 = vpop.f32.mrf.mxu2 }
0x1443   : > { %v3648_v41 = vpack.c.bf16 %v3644_v28, %v3644_v28  ;;  %v6073_v28 = vld [vmem:[%s8344_s16 + $0xc0] sm:$0xf] }
0x1445   : > { %5856 = vmatmul.msk.bf16.vlgmr.msra.gmra.mxu3 %vm1183_vm5, %v3648_v41  ;;  %v6488_v41 = vld [vmem:[%s8344_s16 + $0xc4] sm:$0xf0] }
0x1446   : > { %v6074_v16 = vor.u32 %v6488_v41, %v6073_v28  ;;  %v4082_v28 = vperm.slane %v6038_v39, 0  ;;  %v6503_v41 = vld [vmem:[%s8267_s18 + $0xc0] sm:$0xff] }
0x1448   : > { %4169 = vmatpush.bf16.msra.mxu1 %v6074_v16 }
0x144a   : > { %v3646_v42 = vpop.f32.mrf.mxu2 }
0x144b   : > { %v6487_v42 = vld [vmem:[%s8344_s16 + $0xc4] sm:$0xf] }
0x1452   : > { %v3928_v46 = vpop.f32.mrf.mxu2 }
0x1453   : > { %v3929_v48 = vadd.f32 %v6599_v44, %v3928_v46  ;;  %v6078_v44 = vor.u32 %v6487_v42, %v6075_v43  ;;  %v6065_v46 = vld [vmem:[%s8344_s16 + $0xb0] sm:$0xf] }
0x1455   : > { %v3967_v49 = vpack.c.bf16 %v3929_v48, %v3929_v48  ;;  %6004 = vmatmul.msk.bf16.vlgmr.msrb.gmra.mxu3 %vm1183_vm5, %v3932_v47  ;;  %v6486_v47 = vld [vmem:[%s8344_s16 + $0xb4] sm:$0xf0]  ;;  %v6485_v48 = vld [vmem:[%s8344_s16 + $0xb4] sm:$0xf] }
0x1457   : > { %v3972_v53 = vsel %vm1225_vm6, %v3967_v49, 0  ;;  %v6066_v49 = vor.u32 %v6486_v47, %v6065_v46 }
0x1458   : > { %3981 = vmatpush.bf16.msra.mxu3 %v3972_v53  ;;  %v6067_v53 = vld [vmem:[%s8344_s16 + $0xb8] sm:$0xf0] }
0x1459   : > { %4170 = vmatpush.bf16.msra.mxu1 %v6066_v49 }
0x145a   : > { %v3930_v51 = vpop.f32.mrf.mxu2 }
0x145b   : > { %v6070_v51 = vor.u32 %v6485_v48, %v6067_v53 }
0x14c8   : > { %v3678_v52 = vpop.f32.mrf.mxu3 }
0x14c9   : > { %v3682_v54 = vadd.f32 %v3678_v52, %v3341_v50  ;;  %v6057_v50 = vld [vmem:[%s8344_s16 + $0xa0] sm:$0xf]  ;;  %v6484_v52 = vld [vmem:[%s8344_s16 + $0xa4] sm:$0xf0] }
0x14d0   : > { %v3680_v55 = vpop.f32.mrf.mxu3 }
0x14d1   : > { %v6058_v55 = vor.u32 %v6484_v52, %v6057_v50 }
0x14d3   : > { %4171 = vmatpush.bf16.msra.mxu1 %v6058_v55 }
0x14d8   : > { %v3949_v12 = vpop.f32.mrf.mxu3 }
0x14d9   : > { %v3953_v56 = vmul.f32 0.17677669, %v3949_v12  ;;  %v6059_v12 = vld [vmem:[%s8344_s16 + $0xa8] sm:$0xf0] }
0x14db   : > { %v3954_v18 = vadd.f32 %v7779_v31, %v3953_v56 }
0x14dd   : > { %v3955_v57 = vsel %vm1208_vm7, %v3954_v18, -inf }
0x14de   : > { %3956 = vmax.xlane.f32.xlu2 %v3955_v57  ;;  %v6482_v57 = vld [vmem:[%s8344_s16 + $0x94] sm:$0xf0] }
0x14e0   : > { %v3951_v59 = vpop.f32.mrf.mxu3 }
0x14e1   : > { %v6481_v59 = vld [vmem:[%s8344_s16 + $0x94] sm:$0xf] }
0x1551   : > { %v3957_v25 = vpop.xlane.xlu2 %3956 }
0x1552   : > { %v3958_v60 = vsub.f32 %v3954_v18, %v3957_v25  ;;  %v6049_v18 = vld [vmem:[%s8344_s16 + $0x90] sm:$0xf] }
0x1553   : > { %v6050_v25 = vor.u32 %v6482_v57, %v6049_v18 }
0x1554   : > { %v3959_v61 = vmul.f32 1.442695, %v3958_v60  ;;  %v6051_v60 = vld [vmem:[%s8344_s16 + $0x98] sm:$0xf0] }
0x1555   : > { %4172 = vmatpush.bf16.msra.mxu1 %v6050_v25 }
0x1556   : > { %6647 = vpow2.f32 %v3959_v61  ;;  %v6041_v61 = vld [vmem:[%s8344_s16 + $0x80] sm:$0xf] }
0x155c   : > { %v6648_v62 = vpop.eup %6647 }
0x155d   : > { %v3961_v63 = vsel %vm1208_vm7, %v6648_v62, 0.0 }
0x155e   : > { %3962 = vadd.xlane.f32.xlu0 %v3961_v63  ;;  %v6054_v63 = vor.u32 %v6481_v59, %v6051_v60 }
0x15d1   : > { %v3963_v58 = vpop.xlane.xlu0 %3962 }
0x15d2   : > { %6649 = vrcp.f32 %v3963_v58  ;;  %v6043_v58 = vld [vmem:[%s8344_s16 + $0x88] sm:$0xf0] }
0x15d8   : > { %v6650_v31 = vpop.eup %6649 }
0x15d9   : > { %v3965_v0 = vmul.f32 %v6650_v31, %v6648_v62  ;;  %v6480_v62 = vld [vmem:[%s8344_s16 + $0x84] sm:$0xf0] }
0x15da   : > { %v6042_v31 = vor.u32 %v6480_v62, %v6041_v61 }
0x15db   : > { %v3966_v2 = vpack.c.bf16 %v3965_v0, %v3965_v0  ;;  %v6046_v0 = vor.u32 %v6479_v1, %v6043_v58 }
0x15dc   : > { %4173 = vmatpush.bf16.msra.mxu1 %v6042_v31 }
0x15dd   : > { %6005 = vmatmul.msk.bf16.vlgmr.msra.gmra.mxu3 %vm1208_vm7, %v3966_v2  ;;  %v6502_v2 = vld [vmem:[%s8267_s18 + $0xb8] sm:$0xff] }
0x15de   : > { %4346 = vmatpush.bf16.msrb.mxu3 %v6502_v2 }
0x1660   : > { %v3983_v4 = vpop.f32.mrf.mxu3 }
0x1661   : > { %v3987_v5 = vpack.c.bf16 %v3983_v4, %v3983_v4 }
0x1663   : > { %6018 = vmatmul.msk.bf16.vlgmr.msrb.gmra.mxu0 %vm1183_vm5, %v3987_v5 }
0x1668   : > { %v3985_v6 = vpop.f32.mrf.mxu3 }
0x16e0   : > { %v4017_v7 = vpop.f32.mrf.mxu0 }
0x16e1   : > { %v4021_v8 = vadd.f32 %v4017_v7, %v3682_v54  ;;  %v6483_v54 = vld [vmem:[%s8344_s16 + $0xa4] sm:$0xf] }
0x16e2   : > { %v6062_v56 = vor.u32 %v6483_v54, %v6059_v12 }
0x16e3   : > { %v4022_v10 = vadd.f32 %v4021_v8, %v7566_v45  ;;  %v6099_v45 = vld [vmem:[%s8344_s16 + $0xf8] sm:$0xf0] }
0x16e4   : > { %v6102_v20 = vor.u32 %v6493_v17, %v6099_v45 }
0x16e5   : > { %v7996_v11 = vadd.f32 %v6600_v9, %v4022_v10 }
0x16e6   : > { %4179 = vmatpush.bf16.msra.mxu2 %v6102_v20 }
0x16e7   : > { %4033 = vadd.xlane.f32.xlu1 %v7996_v11 }
0x16e8   : > { %v4019_v13 = vpop.f32.mrf.mxu0 }
0x16ea   : > { %4180 = vmatpush.bf16.msra.mxu2 %v6094_v33  ;;  %v6497_v33 = vld [vmem:[%s8267_s18 + $0x90] sm:$0xff] }
0x16ee   : > { %4181 = vmatpush.bf16.msra.mxu2 %v6086_v40  ;;  %v6504_v40 = vld [vmem:[%s8267_s18 + $0xc8] sm:$0xff] }
0x16f2   : > { %4182 = vmatpush.bf16.msra.mxu2 %v6078_v44  ;;  %v4083_v44 = vperm.slane %v6038_v39, 1 }
0x16f6   : > { %4183 = vmatpush.bf16.msra.mxu2 %v6070_v51 }
0x16fa   : > { %4184 = vmatpush.bf16.msra.mxu2 %v6062_v56 }
0x16fe   : > { %4185 = vmatpush.bf16.msra.mxu2 %v6054_v63 }
0x1702   : > { %4186 = vmatpush.bf16.msra.mxu2 %v6046_v0  ;;  %v6603_v0 = vld [vmem:[%s8268_s19 + $0x1] ss:$0 sm:$0xff] }
0x175a   : > { %v4034_v21 = vpop.xlane.xlu1 %4033 }
0x175b   : > { %v4035_v26 = vmul.f32 %v4034_v21, %v7025_v38 }
0x175d   : > { %v8013_v22 = vsub.f32 %v7996_v11, %v4035_v26  ;;  %v6501_v26 = vld [vmem:[%s8267_s18 + $0xb0] sm:$0xff] }
0x175e   : > { %4347 = vmatpush.bf16.msrb.mxu3 %v6501_v26  ;;  %v6511_v26 = vld [vmem:[%s8273_s24] sm:$0xff] }
0x175f   : > { %v4037_v23 = vmul.f32 %v8013_v22, %v8013_v22 }
0x1761   : > { %4038 = vadd.xlane.f32.xlu2 %v4037_v23  ;;  %v6510_v23 = vld [vmem:[%s8267_s18 + $0xf8] sm:$0xff] }
0x1762   : > { %4359 = vmatpush.bf16.msra.mxu0 %v6510_v23 }
0x1766   : > { %4360 = vmatpush.bf16.msra.mxu0 %v6509_v24 }
0x176a   : > { %4361 = vmatpush.bf16.msra.mxu0 %v6508_v29 }
0x176e   : > { %4362 = vmatpush.bf16.msra.mxu0 %v6507_v32 }
0x1772   : > { %4363 = vmatpush.bf16.msra.mxu0 %v6506_v34 }
0x1776   : > { %4364 = vmatpush.bf16.msra.mxu0 %v6505_v36 }
0x177a   : > { %4365 = vmatpush.bf16.msra.mxu0 %v6504_v40 }
0x177e   : > { %4366 = vmatpush.bf16.msra.mxu0 %v6503_v41 }
0x17d4   : > { %v4039_v3 = vpop.xlane.xlu2 %4038 }
0x17d5   : > { %v4040_v4 = vmul.f32 %v4039_v3, %v7025_v38 }
0x17d7   : > { %v4041_v5 = vadd.f32 1e-05, %v4040_v4 }
0x17d9   : > { %6651 = vrsqrt.f32 %v4041_v5  ;;  %vm4048_vm15 = vweird.f32 %v4041_v5 }
0x17df   : > { %v6652_v6 = vpop.eup %6651 }
0x17e0   : > { %v4043_v7 = vmul.f32 %v6652_v6, %v4041_v5  ;;  %vm4049_vm14 = vweird.f32 %v6652_v6 }
0x17e1   : > { %vm4050_vm0 = vmor %vm4048_vm15, %vm4049_vm14 }
0x17e2   : > { %v4044_v8 = vmul.f32 %v6652_v6, %v4043_v7 }
0x17e4   : > { %v4045_v9 = vmul.f32 0.5, %v4044_v8 }
0x17e6   : > { %v4046_v10 = vsub.f32 1.5, %v4045_v9  ;;  %v6518_v9 = vld [vmem:[%s8273_s24 + $0x38] sm:$0xff] }
0x17e7   : > { %4473 = vmatpush.bf16.msrb.mxu1 %v6518_v9 }
0x17e8   : > { %v4047_v13 = vmul.f32 %v6652_v6, %v4046_v10 }
0x17ea   : > { %v4051_v15 = vsel %vm4050_vm0, %v6652_v6, %v4047_v13 }
0x17eb   : > { %v4052_v17 = vmul.f32 %v4051_v15, %v8013_v22  ;;  %v6500_v22 = vld [vmem:[%s8267_s18 + $0xa8] sm:$0xff] }
0x17ec   : > { %4348 = vmatpush.bf16.msrb.mxu3 %v6500_v22 }
0x17ed   : > { %v4056_v45 = vmul.f32 %v6601_v14, %v4052_v17  ;;  %v6517_v17 = vld [vmem:[%s8273_s24 + $0x30] sm:$0xff] }
0x17ee   : > { %4474 = vmatpush.bf16.msrb.mxu1 %v6517_v17 }
0x17ef   : > { %v4060_v20 = vadd.f32 %v6602_v19, %v4056_v45  ;;  %v6515_v19 = vld [vmem:[%s8273_s24 + $0x20] sm:$0xff]  ;;  %v6514_v45 = vld [vmem:[%s8273_s24 + $0x18] sm:$0xff] }
0x17f0   : > { %4349 = vmatpush.bf16.msrb.mxu3 %v6499_v27 }
0x17f1   : > { %v4061_v21 = vpack.c.bf16 %v4060_v20, %v4060_v20  ;;  %v6513_v20 = vld [vmem:[%s8273_s24 + $0x10] sm:$0xff] }
0x17f3   : > { %4174 = vmatmul.bf16.vlgmr.msra.gmra.mxu1 %v4061_v21  ;;  %4187 = vmatmul.bf16.vlgmr.msra.gmra.mxu2 %v4061_v21  ;;  %v6512_v21 = vld [vmem:[%s8273_s24 + $0x8] sm:$0xff] }
0x17f4   : > { %4350 = vmatpush.bf16.msrb.mxu3 %v6498_v30 }
0x17f8   : > { %4351 = vmatpush.bf16.msrb.mxu3 %v6497_v33 }
0x17fc   : > { %4352 = vmatpush.bf16.msrb.mxu3 %v6496_v35  ;;  %v6604_v35 = vld [vmem:[%s8345_s5] ss:$0 sm:$0xff]  ;;  %s4503_s5 = scalar_lea.hbm %s8348_s30, %s6234_s22 }
0x17fd   : > { %s4507_s10 = sshll.u32 %s4503_s5, 4  ;;  %s4508_s10 = int_to_ptr.hbm [resolvable:$true] %s4507_s10 }
0x17fe   : > { %s6674_s0 = sshra.s32 %s4508_s10, 4  ;;  %s6675_s0 = int_to_ptr.hbm [resolvable:$true] %s6674_s0 }
0x17ff   : > { %s6676_s11 = scalar_lea.hbm %s6675_s0, 8  ;;  %p6681_p0 = scmp.lt.s32.totalorder %s6675_s0, %s8349_s6 }
0x1800   : > { %4353 = vmatpush.bf16.msrb.mxu3 %v6495_v37  ;;  %v6605_v37 = vld [vmem:[%s8346_s2] ss:$0 sm:$0xff]  ;;  %p6677_p11 = scmp.ne.s32.totalorder %s6675_s0, %s6676_s11  ;;  %p6682_p1 = scmp.lt.s32.totalorder %s6680_s9, %s6676_s11 }
0x1802   : > { %p6678_p12 = pnand %p6677_p11, %p6936_p5  ;;  %p6683_p2 = por %p6682_p1, %p6681_p0 }
0x1804   : > { %p6679_p13 = pneg %p6678_p12 }
0x1806   : > { %p6684_p3 = pnand %p6683_p2, %p6679_p13 }
0x1870   : > { %v4175_v42 = vpop.f32.mrf.mxu1 }
0x1871   : > { %v4176_v16 = vadd.f32 %v4175_v42, %v4082_v28 }
0x1873   : > { %v4192_v43 = vmul.f32 %v4176_v16, %v4176_v16 }
0x1875   : > { %v4194_v46 = vmul.f32 %v4192_v43, %v4176_v16 }
0x1876   : > { %v4188_v47 = vpop.f32.mrf.mxu2 }
0x1877   : > { %v4196_v48 = vmul.f32 0.044715, %v4194_v46  ;;  %v4189_v49 = vadd.f32 %v4188_v47, %v4083_v44 }
0x1878   : > { %v4177_v53 = vpop.f32.mrf.mxu1 }
0x1879   : > { %v4198_v51 = vadd.f32 %v4196_v48, %v4176_v16  ;;  %v4193_v50 = vmul.f32 %v4189_v49, %v4189_v49 }
0x187b   : > { %v4200_v52 = vmul.f32 0.7978846, %v4198_v51  ;;  %v4195_v54 = vmul.f32 %v4193_v50, %v4189_v49 }
0x187d   : > { %6653 = vtanh.f32 %v4200_v52  ;;  %v4197_v55 = vmul.f32 0.044715, %v4195_v54 }
0x187e   : > { %v4190_v12 = vpop.f32.mrf.mxu2 }
0x187f   : > { %v4199_v56 = vadd.f32 %v4197_v55, %v4189_v49 }
0x1881   : > { %v4201_v18 = vmul.f32 0.7978846, %v4199_v56 }
0x1883   : > { %v6654_v57 = vpop.eup %6653  ;;  %6655 = vtanh.f32 %v4201_v18 }
0x1884   : > { %v4204_v59 = vadd.f32 1.0, %v6654_v57 }
0x1886   : > { %v4206_v25 = vmul.f32 0.5, %v4204_v59 }
0x1888   : > { %v4208_v60 = vmul.f32 %v4206_v25, %v4176_v16 }
0x1889   : > { %v6656_v61 = vpop.eup %6655 }
0x188a   : > { %v4210_v62 = vpack.c.bf16 %v4208_v60, %v4208_v60  ;;  %v4205_v63 = vadd.f32 1.0, %v6656_v61 }
0x188c   : > { %v4207_v1 = vmul.f32 0.5, %v4205_v63  ;;  %4354 = vmatmul.bf16.vlgmr.msrb.gmra.mxu3 %v4210_v62 }
0x188e   : > { %v4209_v58 = vmul.f32 %v4207_v1, %v4189_v49 }
0x1890   : > { %v4211_v31 = vpack.c.bf16 %v4209_v58, %v4209_v58 }
0x1892   : > { %4367 = vmatmul.bf16.vlgmr.msra.gmra.mxu0 %v4211_v31 }
0x190f   : > { %v4355_v2 = vpop.f32.mrf.mxu3  ;;  %v4368_v3 = vpop.f32.mrf.mxu0 }
0x1910   : > { %v4356_v4 = vadd.f32 %v6603_v0, %v4355_v2 }
0x1912   : > { %v4369_v5 = vadd.f32 %v4368_v3, %v4356_v4 }
0x1914   : > { %v4372_v6 = vadd.f32 %v4369_v5, %v7996_v11  ;;  %v6516_v11 = vld [vmem:[%s8273_s24 + $0x28] sm:$0xff] }
0x1915   : > { %4475 = vmatpush.bf16.msrb.mxu1 %v6516_v11 }
0x1916   : > { %4375 = vadd.xlane.f32.xlu0 %v4372_v6 }
0x1917   : > { %v4357_v7 = vpop.f32.mrf.mxu3  ;;  %v4370_v8 = vpop.f32.mrf.mxu0 }
0x1919   : > { %4476 = vmatpush.bf16.msrb.mxu1 %v6515_v19 }
0x191d   : > { %4477 = vmatpush.bf16.msrb.mxu1 %v6514_v45 }
0x1921   : > { %4478 = vmatpush.bf16.msrb.mxu1 %v6513_v20 }
0x1925   : > { %4479 = vmatpush.bf16.msrb.mxu1 %v6512_v21 }
0x1929   : > { %4480 = vmatpush.bf16.msrb.mxu1 %v6511_v26 }
0x1989   : > { %v4376_v10 = vpop.xlane.xlu0 %4375 }
0x198a   : > { %v4377_v13 = vmul.f32 %v4376_v10, %v7025_v38 }
0x198c   : > { %v4378_v14 = vsub.f32 %v4372_v6, %v4377_v13 }
0x198e   : > { %v4379_v15 = vmul.f32 %v4378_v14, %v4378_v14 }
0x1990   : > { %4380 = vadd.xlane.f32.xlu1 %v4379_v15 }
0x1a03   : > { %v4381_v23 = vpop.xlane.xlu1 %4380 }
0x1a04   : > { %v4382_v22 = vmul.f32 %v4381_v23, %v7025_v38 }
0x1a06   : > { %v4383_v24 = vadd.f32 1e-05, %v4382_v22 }
0x1a08   : > { %6657 = vrsqrt.f32 %v4383_v24  ;;  %vm4390_vm2 = vweird.f32 %v4383_v24 }
0x1a0e   : > { %v6658_v27 = vpop.eup %6657 }
0x1a0f   : > { %v4385_v29 = vmul.f32 %v6658_v27, %v4383_v24  ;;  %vm4391_vm1 = vweird.f32 %v6658_v27 }
0x1a10   : > { %vm4392_vm3 = vmor %vm4390_vm2, %vm4391_vm1 }
0x1a11   : > { %v4386_v30 = vmul.f32 %v6658_v27, %v4385_v29 }
0x1a13   : > { %v4387_v32 = vmul.f32 0.5, %v4386_v30 }
0x1a15   : > { %v4388_v33 = vsub.f32 1.5, %v4387_v32 }
0x1a17   : > { %v4389_v34 = vmul.f32 %v6658_v27, %v4388_v33 }
0x1a19   : > { %v4393_v38 = vsel %vm4392_vm3, %v6658_v27, %v4389_v34 }
0x1a1a   : > { %v4394_v36 = vmul.f32 %v4393_v38, %v4378_v14 }
0x1a1c   : > { %v4398_v39 = vmul.f32 %v6604_v35, %v4394_v36 }
0x1a1e   : > { %v4402_v40 = vadd.f32 %v6605_v37, %v4398_v39 }
0x1a20   : > { %v4404_v28 = vpack.c.bf16 %v4402_v40, %v4402_v40  ;;  %4403 = vst [vmem:[%s837_s7] sm:$0xff] %v4402_v40 }
0x1a22   : > { %4481 = vmatmul.bf16.vlgmr.msrb.gmra.mxu1 %v4404_v28 }
0x1a23   : > { %6687 = shalt.err (!%p6684_p3)
}
0x1a24   : > { %6519 = dma.vmem_to_hbm [thread:$0]  (%p6936_p5), %s4506_s3, 128, %s4508_s10, %s4488_s12  }
0x1a25   : > { %s8350_s25 = sld [smem:[#allocation36_spill]]  ;;  %s844_s16 = scalar_lea.vmem [#allocation4], %s4639_s8 }
0x1a26   : > { %s8351_s2 = sld [smem:[#allocation34_spill]]  ;;  %s4519_s14 = sshll.u32 %s844_s16, 4  ;;  %s4520_s14 = int_to_ptr.vmem [resolvable:$true] %s4519_s14 }
0x1a27   : > { %s4493_s0 = scalar_lea.sflag [#allocation5], %s8191_s23 }
0x1a2b   : > { %s4517_s30 = scalar_lea.hbm %s8350_s25, %s6234_s22  ;;  %s6708_s22 = scalar_lea.hbm %s8350_s25, 16 }
0x1a2c   : > { %v6606_v41 = vld [vmem:[%s8351_s2] ss:$0 sm:$0xff]  ;;  %s4521_s15 = sshll.u32 %s4517_s30, 4  ;;  %s4522_s15 = int_to_ptr.hbm [resolvable:$true] %s4521_s15 }
0x1a2d   : > { %s6702_s11 = sshra.s32 %s4522_s15, 4  ;;  %s6703_s11 = int_to_ptr.hbm [resolvable:$true] %s6702_s11 }
0x1a2e   : > { %s6704_s12 = scalar_lea.hbm %s6703_s11, 8  ;;  %p6709_p9 = scmp.lt.s32.totalorder %s6703_s11, %s8350_s25 }
0x1a2f   : > { %p6705_p4 = scmp.ne.s32.totalorder %s6703_s11, %s6704_s12  ;;  %p6710_p10 = scmp.lt.s32.totalorder %s6708_s22, %s6704_s12 }
0x1a31   : > { %p6706_p7 = pnand %p6705_p4, %p6936_p5  ;;  %p6711_p11 = por %p6710_p10, %p6709_p9 }
0x1a33   : > { %p6707_p8 = pneg %p6706_p7 }
0x1a35   : > { %p6712_p12 = pnand %p6711_p11, %p6707_p8 }
0x1a9f   : > { %v4482_v42 = vpop.f32.mrf.mxu1 }
0x1aa0   : > { %v4483_v16 = vadd.f32 %v6606_v41, %v4482_v42 }
0x1aa2   : > { %4486 = vst [vmem:[%s844_s16] sm:$0xff] %v4483_v16 }
0x1aa3   : > { %6715 = shalt.err (!%p6712_p12)
}
0x1aa4   : > { %6520 = dma.vmem_to_hbm [thread:$0]  (%p6936_p5), %s4520_s14, 128, %s4522_s15, %s4493_s0  }
0x1aa7   : > { %v4484_v43 = vpop.f32.mrf.mxu1 }
0x1aa8 PF: > { %s8352_s16 = sld [smem:[#allocation10_spill]] }
0x1aa9   : > { %s8353_s23 = sld [smem:[#allocation8_spill]] }
0x1aae   : > { %p6530_p13 = scmp.ge.s32.totalorder %s8352_s16, 2 }
0x1aaf   : > { %s4533_s7 = sand.u32 1, %s8353_s23  }
0x1ab0   : > { %p6524_p0 = pnand %p6530_p13, %p6940_p6  ;;  %s4534_s30 = scalar_lea.sflag [#allocation3], %s4533_s7 }
0x1ab2   : > { %p6525_p1 = pneg %p6524_p0 }
0x1ab4   : > { %6733 = dma.done.wait (%p6525_p1), %s4534_s30, 128  }
0x1ab5   : > { %6735 = vsyncadd (%p6525_p1), %s4534_s30, 4294967168  ;;  %s4544_s5 = scalar_lea.sflag [#allocation5], %s4533_s7 }
0x1ab6   : > { %6737 = dma.done.wait (%p6525_p1), %s4544_s5, 128  }
0x1ab7   : > { %6739 = vsyncadd (%p6525_p1), %s4544_s5, 4294967168  ;;  %s8355_s30 = sld [smem:[#allocation11_spill]]  ;;  %s8358_s7 = smov %s6746_s4 }
0x1ab8   : > { %s8356_s28 = sld [smem:[#allocation9_spill]] }
0x1ab9   : > { %s8357_s8 = sld [smem:[#allocation12_spill]] }
0x1abd   : > { %p41_p5 = scmp.ge.s32.totalorder %s8355_s30, 4  }
0x1abe   : > { %s8359_s4 = smov %s8356_s28 }
0x1abf   :  { %43 = sbr.rel (!%p41_p5) target bundleno = 28 (0x1c), region = 240 }
0x1ac4   :  { %4550 = vsyncpa [#allocation3], 1 }
0x1ac5   :  { %4552 = vsyncpa [#allocation3 + $0x1], 1 }
0x1ac6   :  { %4553 = vsyncpa [#allocation5], 1 }
0x1ac7   :  { %4555 = vsyncpa [#allocation5 + $0x1], 1 }

</bundles_post_ra>
